<compile_context>
chip_gen: v7x
topology: tpu7x:2x2x1
jax: 0.10.0
libtpu: 0.0.40
codegen_flags: <defaults>
</compile_context>

<pallas_src>
import functools

import jax
import jax.numpy as jnp
from jax.experimental import pallas as pl
from jax.experimental.pallas import tpu as pltpu


_PAD = 8  # sublane-aligned left/right column padding of the staged images


def _fold_fsvar(w, b, fast_c, slow_c, ratio):
    """Fold FSVar's sequential channel scaling into conv weights/bias (exact)."""
    # The fold is only valid for positive scales (ReLU follows the scaling in
    # the original module, and positivity keeps sign/order of operations).
    assert ratio > 0, "FSVar fold requires ratio > 0"
    cout = w.shape[-1]
    ch = jnp.arange(cout)
    scale = jnp.where(ch < fast_c, ratio, 1.0).astype(jnp.float32)
    scale = jnp.where(ch >= cout - slow_c, scale / ratio, scale)
    return w * scale[None, None, None, :], b * scale


def _zero_halo(pref, bi, H, W, c):
    """Zero only the halo strips that the 3x3 taps read; never the interior."""
    Wp = W + 2 * _PAD
    z_row = jnp.zeros((Wp, c), jnp.float32)
    pref[bi, 0, :, :] = z_row                     # top halo row
    pref[bi, H + 1, :, :] = z_row                 # bottom halo row
    z_band = jnp.zeros((H, _PAD, c), jnp.float32)
    pref[bi, 1:H + 1, 0:_PAD, :] = z_band         # left pad band (aligned, 8 wide)
    pref[bi, 1:H + 1, _PAD + W:Wp, :] = z_band    # right pad band (aligned, 8 wide)


def _fused_cnn_kernel(x_ref, w1_ref, b1_ref, w2_ref, b2_ref, o_ref,
                      xp_ref, h1p_ref, col_ref, *,
                      H, W, cin, c1, c2, bb, split_k2):
    # x_ref  : (bb, H, W, cin)   NHWC image block, f32
    # w1_ref : (3, 3, cin, c1)   FSVar-folded conv1 weights, bf16 (HWIO)
    # b1_ref : (1, c1)           folded bias, f32
    # w2_ref : (9*c1, c2)        FSVar-folded conv2 weights, im2col layout, bf16
    # b2_ref : (1, c2)           folded bias, f32
    # o_ref  : (bb, c2, H*W)     NCHW-flat, lane-dense output, f32
    # xp_ref : (bb, H+2, W+2*_PAD, cin) f32 scratch (zero-padded input)
    # h1p_ref: (bb, H+2, W+2*_PAD, c1)  f32 scratch (zero-padded h1)
    # col_ref: (H*W, 9*c1)       bf16 scratch (layer-2 im2col column matrix)
    HW = H * W
    c0 = _PAD - 1  # leftmost column a tap reads

    for bi in range(bb):  # static unroll over the per-step image block
        # ---------------- layer 1: 9 accumulated K=cin dots --------------------
        _zero_halo(xp_ref, bi, H, W, cin)
        xp_ref[bi, 1:H + 1, _PAD:_PAD + W, :] = x_ref[bi]

        acc1 = jnp.zeros((HW, c1), jnp.float32)
        for ky in range(3):
            for kx in range(3):
                # Just-in-time ref slice: the padded image is never one live value.
                tap = xp_ref[bi, ky:ky + H, c0 + kx:c0 + kx + W, :]
                tap = tap.reshape(HW, cin).astype(jnp.bfloat16)
                acc1 = acc1 + jnp.dot(tap, w1_ref[ky, kx],
                                      preferred_element_type=jnp.float32)
        h1 = jnp.maximum(acc1 + b1_ref[...], 0.0)                  # (HW, c1) f32

        # ---------------- layer 2: K-stacked im2col, 1-2 MXU matmuls -----------
        _zero_halo(h1p_ref, bi, H, W, c1)
        h1p_ref[bi, 1:H + 1, _PAD:_PAD + W, :] = h1.reshape(H, W, c1)

        for t in range(9):
            ky, kx = divmod(t, 3)
            tap = h1p_ref[bi, ky:ky + H, c0 + kx:c0 + kx + W, :]
            col_ref[:, t * c1:(t + 1) * c1] = (
                tap.reshape(HW, c1).astype(jnp.bfloat16))

        if split_k2:
            # 128-deep MXU (v5e and older): two dots with K <= 128.
            acc2 = jnp.dot(col_ref[:, :128], w2_ref[:128, :],
                           preferred_element_type=jnp.float32)
            acc2 = acc2 + jnp.dot(col_ref[:, 128:], w2_ref[128:, :],
                                  preferred_element_type=jnp.float32)
        else:
            # v6e / v7x: K = 9*c1 = 144 fits in a single pass.
            acc2 = jnp.dot(col_ref[...], w2_ref[...],
                           preferred_element_type=jnp.float32)
        h2 = jnp.maximum(acc2 + b2_ref[...], 0.0)                  # (HW, c2) f32

        # NCHW-flat, lane-dense store: (c2, H*W) with H*W a multiple of 128.
        o_ref[bi] = jnp.transpose(h2, (1, 0))


def _pick_batch_block(B):
    """Images per grid step: amortise per-step overhead, keep >=2 steps (v7x)."""
    if B < 4:
        return 1
    for bb in (4, 2):
        if B % bb == 0 and B // bb >= 2:
            return bb
    return 1


def _mxu_needs_k_split():
    """True on chips whose MXU is 128 deep (v5e and older); split is always safe."""
    try:
        kind = jax.devices()[0].device_kind.lower()
    except Exception:
        return True
    return not any(tag in kind for tag in ("v6", "v7", "tpu7"))


@functools.partial(jax.jit, static_argnames=("fast_c", "slow_c", "ratio"))
def simple_cnn_forward(x_nchw, w1, b1, w2, b2, *,
                       fast_c=16, slow_c=16, ratio=10.0):
    """Equivalent of SimpleCNN.forward. x_nchw: (B, 3, H, W) f32, weights HWIO."""
    B, cin, H, W = x_nchw.shape
    c1, c2 = w1.shape[-1], w2.shape[-1]
    assert (H * W) % 128 == 0, "lane-dense output store needs H*W % 128 == 0"

    bb = _pick_batch_block(B)
    split_k2 = _mxu_needs_k_split() and (9 * c1 > 128)

    x = jnp.transpose(x_nchw, (0, 2, 3, 1))                         # NCHW -> NHWC

    w1f, b1f = _fold_fsvar(w1, b1, fast_c, slow_c, ratio)
    w2f, b2f = _fold_fsvar(w2, b2, fast_c, slow_c, ratio)
    w1b = w1f.astype(jnp.bfloat16)                                  # (3,3,cin,c1)
    w2b = w2f.reshape(9 * c1, c2).astype(jnp.bfloat16)              # im2col layout

    Wp = W + 2 * _PAD
    kernel = functools.partial(_fused_cnn_kernel, H=H, W=W, cin=cin,
                               c1=c1, c2=c2, bb=bb, split_k2=split_k2)

    out = pl.pallas_call(
        kernel,
        out_shape=jax.ShapeDtypeStruct((B, c2, H * W), jnp.float32),
        grid=(B // bb,),
        in_specs=[
            pl.BlockSpec((bb, H, W, cin), lambda g: (g, 0, 0, 0)),
            pl.BlockSpec((3, 3, cin, c1), lambda g: (0, 0, 0, 0)),
            pl.BlockSpec((1, c1), lambda g: (0, 0)),
            pl.BlockSpec((9 * c1, c2), lambda g: (0, 0)),
            pl.BlockSpec((1, c2), lambda g: (0, 0)),
        ],
        out_specs=pl.BlockSpec((bb, c2, H * W), lambda g: (g, 0, 0)),
        scratch_shapes=[
            pltpu.VMEM((bb, H + 2, Wp, cin), jnp.float32),   # padded input
            pltpu.VMEM((bb, H + 2, Wp, c1), jnp.float32),    # padded h1
            pltpu.VMEM((H * W, 9 * c1), jnp.bfloat16),       # layer-2 im2col
        ],
        compiler_params=pltpu.CompilerParams(
            dimension_semantics=("parallel",)),
    )(x, w1b, b1f.reshape(1, c1), w2b, b2f.reshape(1, c2))

    # torch flattens NCHW: (B, C, H, W) -> (B, C*H*W).  The kernel already wrote
    # (B, C, H*W), so this reshape is free.
    return out.reshape(B, c2 * H * W)


# ----------------- pure-JAX references (self-check only) -----------------
def _ref_conv_layer(x_nhwc, w, b, compute_dtype, precision=None):
    y = jax.lax.conv_general_dilated(
        x_nhwc.astype(compute_dtype), w.astype(compute_dtype),
        window_strides=(1, 1), padding=((1, 1), (1, 1)),
        dimension_numbers=("NHWC", "HWIO", "NHWC"),
        preferred_element_type=jnp.float32, precision=precision)
    return y + b[None, None, None, :]


def _nchw_flatten(y_nhwc):
    B, H, W, C = y_nhwc.shape
    return jnp.transpose(y_nhwc, (0, 3, 1, 2)).reshape(B, C * H * W)


def _ref_forward_folded(x_nchw, w1, b1, w2, b2, compute_dtype):
    """Folded-FSVar reference; compute_dtype=bf16 matches the kernel numerics."""
    prec = None if compute_dtype == jnp.bfloat16 else jax.lax.Precision.HIGHEST
    x = jnp.transpose(x_nchw, (0, 2, 3, 1))
    w1f, b1f = _fold_fsvar(w1, b1, 16, 16, 10.0)
    w2f, b2f = _fold_fsvar(w2, b2, 16, 16, 10.0)
    h1 = jnp.maximum(_ref_conv_layer(x, w1f, b1f, compute_dtype, prec), 0.0)
    h2 = jnp.maximum(_ref_conv_layer(h1, w2f, b2f, compute_dtype, prec), 0.0)
    return _nchw_flatten(h2)


def _ref_forward_faithful(x_nchw, w1, b1, w2, b2):
    """Faithful module semantics: f32 conv + explicit sequential FSVar."""
    def fsvar(y, fast_c, slow_c, ratio):
        cout = y.shape[-1]
        ch = jnp.arange(cout)[None, None, None, :]
        y = jnp.where(ch < fast_c, y * ratio, y)
        return jnp.where(ch >= cout - slow_c, y / ratio, y)

    x = jnp.transpose(x_nchw, (0, 2, 3, 1))
    h1 = _ref_conv_layer(x, w1, b1, jnp.float32, jax.lax.Precision.HIGHEST)
    h1 = jnp.maximum(fsvar(h1, 16, 16, 10.0), 0.0)
    h2 = _ref_conv_layer(h1, w2, b2, jnp.float32, jax.lax.Precision.HIGHEST)
    h2 = jnp.maximum(fsvar(h2, 16, 16, 10.0), 0.0)
    return _nchw_flatten(h2)


if __name__ == "__main__":
    key = jax.random.PRNGKey(0)
    k1, k2, k3, k4, k5 = jax.random.split(key, 5)

    B, H, W = 2, 16, 16
    x_nchw = jax.random.normal(k1, (B, 3, H, W), dtype=jnp.float32)

    # Deterministic synthetic parameters (HWIO conv weights).
    w1 = jax.random.normal(k2, (3, 3, 3, 16), dtype=jnp.float32) * 0.1
    b1 = jax.random.normal(k3, (16,), dtype=jnp.float32) * 0.1
    w2 = jax.random.normal(k4, (3, 3, 16, 32), dtype=jnp.float32) * 0.1
    b2 = jax.random.normal(k5, (32,), dtype=jnp.float32) * 0.1

    out = jax.block_until_ready(simple_cnn_forward(x_nchw, w1, b1, w2, b2))
    assert out.shape == (B, 32 * H * W), out.shape

    # 1) Kernel vs. a reference with matched numerics (folded weights, bf16
    #    products, f32 accumulation): only summation order differs -> tight.
    ref_bf16 = jax.block_until_ready(
        _ref_forward_folded(x_nchw, w1, b1, w2, b2, jnp.bfloat16))
    err = float(jnp.max(jnp.abs(out - ref_bf16)))
    assert jnp.allclose(out, ref_bf16, atol=2e-3, rtol=2e-3), err

    # 2) The trace-time FSVar fold is an exact linear identity: folded-weights
    #    forward vs. explicit sequential FSVar, both in f32.
    ref_folded_f32 = _ref_forward_folded(x_nchw, w1, b1, w2, b2, jnp.float32)
    ref_faithful = _ref_forward_faithful(x_nchw, w1, b1, w2, b2)
    err2 = float(jnp.max(jnp.abs(ref_folded_f32 - ref_faithful)))
    assert jnp.allclose(ref_folded_f32, ref_faithful, atol=1e-3, rtol=1e-3), err2

    print("KERNEL_OK")
</pallas_src>

<mosaic_0001>
module attributes {stable_mosaic.version = 11 : i64} {
  func.func @_fused_cnn_kernel(%arg0: i32, %arg1: memref<1x16x16x3xf32, #tpu.memory_space<vmem>>, %arg2: memref<3x3x3x16xbf16, #tpu.memory_space<vmem>>, %arg3: memref<1x16xf32, #tpu.memory_space<vmem>>, %arg4: memref<144x32xbf16, #tpu.memory_space<vmem>>, %arg5: memref<1x32xf32, #tpu.memory_space<vmem>>, %arg6: memref<1x32x256xf32, #tpu.memory_space<vmem>>, %arg7: memref<1x18x32x3xf32, #tpu.memory_space<vmem>>, %arg8: memref<1x18x32x16xf32, #tpu.memory_space<vmem>>, %arg9: memref<256x144xbf16, #tpu.memory_space<vmem>>) attributes {dimension_semantics = [#tpu.dimension_semantics<parallel>], iteration_bounds = array<i64: 2>, scalar_prefetch = 0 : i64, scratch_operands = 3 : i64, tpu.core_type = #tpu.core_type<tc>, window_params = [{transform_indices = @transform_0, window_bounds = array<i64: 1, 16, 16, 3>}, {pipeline_mode = #tpu.pipeline_mode<synchronous>, transform_indices = @transform_1, window_bounds = array<i64: 3, 3, 3, 16>}, {pipeline_mode = #tpu.pipeline_mode<synchronous>, transform_indices = @transform_2, window_bounds = array<i64: 1, 16>}, {pipeline_mode = #tpu.pipeline_mode<synchronous>, transform_indices = @transform_3, window_bounds = array<i64: 144, 32>}, {pipeline_mode = #tpu.pipeline_mode<synchronous>, transform_indices = @transform_4, window_bounds = array<i64: 1, 32>}, {transform_indices = @transform_5, window_bounds = array<i64: 1, 32, 256>}]} {
    %cst = arith.constant 0.000000e+00 : f32
    %0 = vector.broadcast %cst : f32 to vector<32x3xf32>
    %c0 = arith.constant 0 : index
    %c0_0 = arith.constant 0 : index
    %c0_1 = arith.constant 0 : index
    %c0_2 = arith.constant 0 : index
    %1 = vector.load %arg7[%c0, %c0_0, %c0_1, %c0_2] : memref<1x18x32x3xf32, #tpu.memory_space<vmem>>, vector<1x1x32x3xf32>
    %2 = vector.shape_cast %1 : vector<1x1x32x3xf32> to vector<32x3xf32>
    %3 = vector.shape_cast %0 : vector<32x3xf32> to vector<1x1x32x3xf32>
    tpu.vector_store %arg7[%c0, %c0_0, %c0_1, %c0_2], %3 {strides = array<i32>} : memref<1x18x32x3xf32, #tpu.memory_space<vmem>>, vector<1x1x32x3xf32>,
    %c0_3 = arith.constant 0 : index
    %c17 = arith.constant 17 : index
    %c0_4 = arith.constant 0 : index
    %c0_5 = arith.constant 0 : index
    %4 = vector.load %arg7[%c0_3, %c17, %c0_4, %c0_5] : memref<1x18x32x3xf32, #tpu.memory_space<vmem>>, vector<1x1x32x3xf32>
    %5 = vector.shape_cast %4 : vector<1x1x32x3xf32> to vector<32x3xf32>
    %6 = vector.shape_cast %0 : vector<32x3xf32> to vector<1x1x32x3xf32>
    tpu.vector_store %arg7[%c0_3, %c17, %c0_4, %c0_5], %6 {strides = array<i32>} : memref<1x18x32x3xf32, #tpu.memory_space<vmem>>, vector<1x1x32x3xf32>,
    %cst_6 = arith.constant 0.000000e+00 : f32
    %7 = vector.broadcast %cst_6 : f32 to vector<16x8x3xf32>
    %c0_7 = arith.constant 0 : index
    %c1 = arith.constant 1 : index
    %c0_8 = arith.constant 0 : index
    %c0_9 = arith.constant 0 : index
    %8 = vector.load %arg7[%c0_7, %c1, %c0_8, %c0_9] : memref<1x18x32x3xf32, #tpu.memory_space<vmem>>, vector<1x16x8x3xf32>
    %9 = vector.shape_cast %8 : vector<1x16x8x3xf32> to vector<16x8x3xf32>
    %10 = vector.shape_cast %7 : vector<16x8x3xf32> to vector<1x16x8x3xf32>
    tpu.vector_store %arg7[%c0_7, %c1, %c0_8, %c0_9], %10 {strides = array<i32>} : memref<1x18x32x3xf32, #tpu.memory_space<vmem>>, vector<1x16x8x3xf32>,
    %c0_10 = arith.constant 0 : index
    %c1_11 = arith.constant 1 : index
    %c24 = arith.constant 24 : index
    %c0_12 = arith.constant 0 : index
    %11 = vector.load %arg7[%c0_10, %c1_11, %c24, %c0_12] : memref<1x18x32x3xf32, #tpu.memory_space<vmem>>, vector<1x16x8x3xf32>
    %12 = vector.shape_cast %11 : vector<1x16x8x3xf32> to vector<16x8x3xf32>
    %13 = vector.shape_cast %7 : vector<16x8x3xf32> to vector<1x16x8x3xf32>
    tpu.vector_store %arg7[%c0_10, %c1_11, %c24, %c0_12], %13 {strides = array<i32>} : memref<1x18x32x3xf32, #tpu.memory_space<vmem>>, vector<1x16x8x3xf32>,
    %c0_13 = arith.constant 0 : index
    %c0_14 = arith.constant 0 : index
    %c0_15 = arith.constant 0 : index
    %c0_16 = arith.constant 0 : index
    %14 = vector.load %arg1[%c0_13, %c0_14, %c0_15, %c0_16] : memref<1x16x16x3xf32, #tpu.memory_space<vmem>>, vector<1x16x16x3xf32>
    %15 = vector.shape_cast %14 : vector<1x16x16x3xf32> to vector<16x16x3xf32>
    %c0_17 = arith.constant 0 : index
    %c1_18 = arith.constant 1 : index
    %c8 = arith.constant 8 : index
    %c0_19 = arith.constant 0 : index
    %16 = vector.load %arg7[%c0_17, %c1_18, %c8, %c0_19] : memref<1x18x32x3xf32, #tpu.memory_space<vmem>>, vector<1x16x16x3xf32>
    %17 = vector.shape_cast %16 : vector<1x16x16x3xf32> to vector<16x16x3xf32>
    %18 = vector.shape_cast %15 : vector<16x16x3xf32> to vector<1x16x16x3xf32>
    tpu.vector_store %arg7[%c0_17, %c1_18, %c8, %c0_19], %18 {strides = array<i32>} : memref<1x18x32x3xf32, #tpu.memory_space<vmem>>, vector<1x16x16x3xf32>,
    %cst_20 = arith.constant 0.000000e+00 : f32
    %19 = vector.broadcast %cst_20 : f32 to vector<256x16xf32>
    %c0_21 = arith.constant 0 : index
    %c0_22 = arith.constant 0 : index
    %c7 = arith.constant 7 : index
    %c0_23 = arith.constant 0 : index
    %20 = vector.load %arg7[%c0_21, %c0_22, %c7, %c0_23] : memref<1x18x32x3xf32, #tpu.memory_space<vmem>>, vector<1x16x16x3xf32>
    %21 = vector.shape_cast %20 : vector<1x16x16x3xf32> to vector<16x16x3xf32>
    %22 = vector.shape_cast %21 : vector<16x16x3xf32> to vector<256x3xf32>
    %23 = arith.truncf %22 : vector<256x3xf32> to vector<256x3xbf16>
    %c0_24 = arith.constant 0 : index
    %c0_25 = arith.constant 0 : index
    %c0_26 = arith.constant 0 : index
    %c0_27 = arith.constant 0 : index
    %24 = vector.load %arg2[%c0_24, %c0_25, %c0_26, %c0_27] : memref<3x3x3x16xbf16, #tpu.memory_space<vmem>>, vector<1x1x3x16xbf16>
    %25 = vector.shape_cast %24 : vector<1x1x3x16xbf16> to vector<3x16xbf16>
    %cst_28 = arith.constant dense<0.000000e+00> : vector<256x16xf32>
    %26 = tpu.matmul %23, %25, %cst_28 {dimension_numbers = #tpu.dot_dimension_numbers<[1], [0], [0], [1], [0, 0, 1, 1], [], []>} : vector<256x3xbf16>, vector<3x16xbf16>, vector<256x16xf32> -> vector<256x16xf32>
    %27 = arith.addf %19, %26 : vector<256x16xf32>
    %c0_29 = arith.constant 0 : index
    %c0_30 = arith.constant 0 : index
    %c8_31 = arith.constant 8 : index
    %c0_32 = arith.constant 0 : index
    %28 = vector.load %arg7[%c0_29, %c0_30, %c8_31, %c0_32] : memref<1x18x32x3xf32, #tpu.memory_space<vmem>>, vector<1x16x16x3xf32>
    %29 = vector.shape_cast %28 : vector<1x16x16x3xf32> to vector<16x16x3xf32>
    %30 = vector.shape_cast %29 : vector<16x16x3xf32> to vector<256x3xf32>
    %31 = arith.truncf %30 : vector<256x3xf32> to vector<256x3xbf16>
    %c0_33 = arith.constant 0 : index
    %c1_34 = arith.constant 1 : index
    %c0_35 = arith.constant 0 : index
    %c0_36 = arith.constant 0 : index
    %32 = vector.load %arg2[%c0_33, %c1_34, %c0_35, %c0_36] : memref<3x3x3x16xbf16, #tpu.memory_space<vmem>>, vector<1x1x3x16xbf16>
    %33 = vector.shape_cast %32 : vector<1x1x3x16xbf16> to vector<3x16xbf16>
    %cst_37 = arith.constant dense<0.000000e+00> : vector<256x16xf32>
    %34 = tpu.matmul %31, %33, %cst_37 {dimension_numbers = #tpu.dot_dimension_numbers<[1], [0], [0], [1], [0, 0, 1, 1], [], []>} : vector<256x3xbf16>, vector<3x16xbf16>, vector<256x16xf32> -> vector<256x16xf32>
    %35 = arith.addf %27, %34 : vector<256x16xf32>
    %c0_38 = arith.constant 0 : index
    %c0_39 = arith.constant 0 : index
    %c9 = arith.constant 9 : index
    %c0_40 = arith.constant 0 : index
    %36 = vector.load %arg7[%c0_38, %c0_39, %c9, %c0_40] : memref<1x18x32x3xf32, #tpu.memory_space<vmem>>, vector<1x16x16x3xf32>
    %37 = vector.shape_cast %36 : vector<1x16x16x3xf32> to vector<16x16x3xf32>
    %38 = vector.shape_cast %37 : vector<16x16x3xf32> to vector<256x3xf32>
    %39 = arith.truncf %38 : vector<256x3xf32> to vector<256x3xbf16>
    %c0_41 = arith.constant 0 : index
    %c2 = arith.constant 2 : index
    %c0_42 = arith.constant 0 : index
    %c0_43 = arith.constant 0 : index
    %40 = vector.load %arg2[%c0_41, %c2, %c0_42, %c0_43] : memref<3x3x3x16xbf16, #tpu.memory_space<vmem>>, vector<1x1x3x16xbf16>
    %41 = vector.shape_cast %40 : vector<1x1x3x16xbf16> to vector<3x16xbf16>
    %cst_44 = arith.constant dense<0.000000e+00> : vector<256x16xf32>
    %42 = tpu.matmul %39, %41, %cst_44 {dimension_numbers = #tpu.dot_dimension_numbers<[1], [0], [0], [1], [0, 0, 1, 1], [], []>} : vector<256x3xbf16>, vector<3x16xbf16>, vector<256x16xf32> -> vector<256x16xf32>
    %43 = arith.addf %35, %42 : vector<256x16xf32>
    %c0_45 = arith.constant 0 : index
    %c1_46 = arith.constant 1 : index
    %c7_47 = arith.constant 7 : index
    %c0_48 = arith.constant 0 : index
    %44 = vector.load %arg7[%c0_45, %c1_46, %c7_47, %c0_48] : memref<1x18x32x3xf32, #tpu.memory_space<vmem>>, vector<1x16x16x3xf32>
    %45 = vector.shape_cast %44 : vector<1x16x16x3xf32> to vector<16x16x3xf32>
    %46 = vector.shape_cast %45 : vector<16x16x3xf32> to vector<256x3xf32>
    %47 = arith.truncf %46 : vector<256x3xf32> to vector<256x3xbf16>
    %c1_49 = arith.constant 1 : index
    %c0_50 = arith.constant 0 : index
    %c0_51 = arith.constant 0 : index
    %c0_52 = arith.constant 0 : index
    %48 = vector.load %arg2[%c1_49, %c0_50, %c0_51, %c0_52] : memref<3x3x3x16xbf16, #tpu.memory_space<vmem>>, vector<1x1x3x16xbf16>
    %49 = vector.shape_cast %48 : vector<1x1x3x16xbf16> to vector<3x16xbf16>
    %cst_53 = arith.constant dense<0.000000e+00> : vector<256x16xf32>
    %50 = tpu.matmul %47, %49, %cst_53 {dimension_numbers = #tpu.dot_dimension_numbers<[1], [0], [0], [1], [0, 0, 1, 1], [], []>} : vector<256x3xbf16>, vector<3x16xbf16>, vector<256x16xf32> -> vector<256x16xf32>
    %51 = arith.addf %43, %50 : vector<256x16xf32>
    %c0_54 = arith.constant 0 : index
    %c1_55 = arith.constant 1 : index
    %c8_56 = arith.constant 8 : index
    %c0_57 = arith.constant 0 : index
    %52 = vector.load %arg7[%c0_54, %c1_55, %c8_56, %c0_57] : memref<1x18x32x3xf32, #tpu.memory_space<vmem>>, vector<1x16x16x3xf32>
    %53 = vector.shape_cast %52 : vector<1x16x16x3xf32> to vector<16x16x3xf32>
    %54 = vector.shape_cast %53 : vector<16x16x3xf32> to vector<256x3xf32>
    %55 = arith.truncf %54 : vector<256x3xf32> to vector<256x3xbf16>
    %c1_58 = arith.constant 1 : index
    %c1_59 = arith.constant 1 : index
    %c0_60 = arith.constant 0 : index
    %c0_61 = arith.constant 0 : index
    %56 = vector.load %arg2[%c1_58, %c1_59, %c0_60, %c0_61] : memref<3x3x3x16xbf16, #tpu.memory_space<vmem>>, vector<1x1x3x16xbf16>
    %57 = vector.shape_cast %56 : vector<1x1x3x16xbf16> to vector<3x16xbf16>
    %cst_62 = arith.constant dense<0.000000e+00> : vector<256x16xf32>
    %58 = tpu.matmul %55, %57, %cst_62 {dimension_numbers = #tpu.dot_dimension_numbers<[1], [0], [0], [1], [0, 0, 1, 1], [], []>} : vector<256x3xbf16>, vector<3x16xbf16>, vector<256x16xf32> -> vector<256x16xf32>
    %59 = arith.addf %51, %58 : vector<256x16xf32>
    %c0_63 = arith.constant 0 : index
    %c1_64 = arith.constant 1 : index
    %c9_65 = arith.constant 9 : index
    %c0_66 = arith.constant 0 : index
    %60 = vector.load %arg7[%c0_63, %c1_64, %c9_65, %c0_66] : memref<1x18x32x3xf32, #tpu.memory_space<vmem>>, vector<1x16x16x3xf32>
    %61 = vector.shape_cast %60 : vector<1x16x16x3xf32> to vector<16x16x3xf32>
    %62 = vector.shape_cast %61 : vector<16x16x3xf32> to vector<256x3xf32>
    %63 = arith.truncf %62 : vector<256x3xf32> to vector<256x3xbf16>
    %c1_67 = arith.constant 1 : index
    %c2_68 = arith.constant 2 : index
    %c0_69 = arith.constant 0 : index
    %c0_70 = arith.constant 0 : index
    %64 = vector.load %arg2[%c1_67, %c2_68, %c0_69, %c0_70] : memref<3x3x3x16xbf16, #tpu.memory_space<vmem>>, vector<1x1x3x16xbf16>
    %65 = vector.shape_cast %64 : vector<1x1x3x16xbf16> to vector<3x16xbf16>
    %cst_71 = arith.constant dense<0.000000e+00> : vector<256x16xf32>
    %66 = tpu.matmul %63, %65, %cst_71 {dimension_numbers = #tpu.dot_dimension_numbers<[1], [0], [0], [1], [0, 0, 1, 1], [], []>} : vector<256x3xbf16>, vector<3x16xbf16>, vector<256x16xf32> -> vector<256x16xf32>
    %67 = arith.addf %59, %66 : vector<256x16xf32>
    %c0_72 = arith.constant 0 : index
    %c2_73 = arith.constant 2 : index
    %c7_74 = arith.constant 7 : index
    %c0_75 = arith.constant 0 : index
    %68 = vector.load %arg7[%c0_72, %c2_73, %c7_74, %c0_75] : memref<1x18x32x3xf32, #tpu.memory_space<vmem>>, vector<1x16x16x3xf32>
    %69 = vector.shape_cast %68 : vector<1x16x16x3xf32> to vector<16x16x3xf32>
    %70 = vector.shape_cast %69 : vector<16x16x3xf32> to vector<256x3xf32>
    %71 = arith.truncf %70 : vector<256x3xf32> to vector<256x3xbf16>
    %c2_76 = arith.constant 2 : index
    %c0_77 = arith.constant 0 : index
    %c0_78 = arith.constant 0 : index
    %c0_79 = arith.constant 0 : index
    %72 = vector.load %arg2[%c2_76, %c0_77, %c0_78, %c0_79] : memref<3x3x3x16xbf16, #tpu.memory_space<vmem>>, vector<1x1x3x16xbf16>
    %73 = vector.shape_cast %72 : vector<1x1x3x16xbf16> to vector<3x16xbf16>
    %cst_80 = arith.constant dense<0.000000e+00> : vector<256x16xf32>
    %74 = tpu.matmul %71, %73, %cst_80 {dimension_numbers = #tpu.dot_dimension_numbers<[1], [0], [0], [1], [0, 0, 1, 1], [], []>} : vector<256x3xbf16>, vector<3x16xbf16>, vector<256x16xf32> -> vector<256x16xf32>
    %75 = arith.addf %67, %74 : vector<256x16xf32>
    %c0_81 = arith.constant 0 : index
    %c2_82 = arith.constant 2 : index
    %c8_83 = arith.constant 8 : index
    %c0_84 = arith.constant 0 : index
    %76 = vector.load %arg7[%c0_81, %c2_82, %c8_83, %c0_84] : memref<1x18x32x3xf32, #tpu.memory_space<vmem>>, vector<1x16x16x3xf32>
    %77 = vector.shape_cast %76 : vector<1x16x16x3xf32> to vector<16x16x3xf32>
    %78 = vector.shape_cast %77 : vector<16x16x3xf32> to vector<256x3xf32>
    %79 = arith.truncf %78 : vector<256x3xf32> to vector<256x3xbf16>
    %c2_85 = arith.constant 2 : index
    %c1_86 = arith.constant 1 : index
    %c0_87 = arith.constant 0 : index
    %c0_88 = arith.constant 0 : index
    %80 = vector.load %arg2[%c2_85, %c1_86, %c0_87, %c0_88] : memref<3x3x3x16xbf16, #tpu.memory_space<vmem>>, vector<1x1x3x16xbf16>
    %81 = vector.shape_cast %80 : vector<1x1x3x16xbf16> to vector<3x16xbf16>
    %cst_89 = arith.constant dense<0.000000e+00> : vector<256x16xf32>
    %82 = tpu.matmul %79, %81, %cst_89 {dimension_numbers = #tpu.dot_dimension_numbers<[1], [0], [0], [1], [0, 0, 1, 1], [], []>} : vector<256x3xbf16>, vector<3x16xbf16>, vector<256x16xf32> -> vector<256x16xf32>
    %83 = arith.addf %75, %82 : vector<256x16xf32>
    %c0_90 = arith.constant 0 : index
    %c2_91 = arith.constant 2 : index
    %c9_92 = arith.constant 9 : index
    %c0_93 = arith.constant 0 : index
    %84 = vector.load %arg7[%c0_90, %c2_91, %c9_92, %c0_93] : memref<1x18x32x3xf32, #tpu.memory_space<vmem>>, vector<1x16x16x3xf32>
    %85 = vector.shape_cast %84 : vector<1x16x16x3xf32> to vector<16x16x3xf32>
    %86 = vector.shape_cast %85 : vector<16x16x3xf32> to vector<256x3xf32>
    %87 = arith.truncf %86 : vector<256x3xf32> to vector<256x3xbf16>
    %c2_94 = arith.constant 2 : index
    %c2_95 = arith.constant 2 : index
    %c0_96 = arith.constant 0 : index
    %c0_97 = arith.constant 0 : index
    %88 = vector.load %arg2[%c2_94, %c2_95, %c0_96, %c0_97] : memref<3x3x3x16xbf16, #tpu.memory_space<vmem>>, vector<1x1x3x16xbf16>
    %89 = vector.shape_cast %88 : vector<1x1x3x16xbf16> to vector<3x16xbf16>
    %cst_98 = arith.constant dense<0.000000e+00> : vector<256x16xf32>
    %90 = tpu.matmul %87, %89, %cst_98 {dimension_numbers = #tpu.dot_dimension_numbers<[1], [0], [0], [1], [0, 0, 1, 1], [], []>} : vector<256x3xbf16>, vector<3x16xbf16>, vector<256x16xf32> -> vector<256x16xf32>
    %91 = arith.addf %83, %90 : vector<256x16xf32>
    %c0_99 = arith.constant 0 : index
    %c0_100 = arith.constant 0 : index
    %92 = vector.load %arg3[%c0_99, %c0_100] : memref<1x16xf32, #tpu.memory_space<vmem>>, vector<1x16xf32>
    %93 = vector.broadcast %92 : vector<1x16xf32> to vector<256x16xf32>
    %94 = arith.addf %91, %93 : vector<256x16xf32>
    %cst_101 = arith.constant 0.000000e+00 : f32
    %95 = vector.broadcast %cst_101 : f32 to vector<256x16xf32>
    %96 = arith.maximumf %94, %95 : vector<256x16xf32>
    %cst_102 = arith.constant 0.000000e+00 : f32
    %97 = vector.broadcast %cst_102 : f32 to vector<32x16xf32>
    %c0_103 = arith.constant 0 : index
    %c0_104 = arith.constant 0 : index
    %c0_105 = arith.constant 0 : index
    %c0_106 = arith.constant 0 : index
    %98 = vector.load %arg8[%c0_103, %c0_104, %c0_105, %c0_106] : memref<1x18x32x16xf32, #tpu.memory_space<vmem>>, vector<1x1x32x16xf32>
    %99 = vector.shape_cast %98 : vector<1x1x32x16xf32> to vector<32x16xf32>
    %100 = vector.shape_cast %97 : vector<32x16xf32> to vector<1x1x32x16xf32>
    tpu.vector_store %arg8[%c0_103, %c0_104, %c0_105, %c0_106], %100 {strides = array<i32>} : memref<1x18x32x16xf32, #tpu.memory_space<vmem>>, vector<1x1x32x16xf32>,
    %c0_107 = arith.constant 0 : index
    %c17_108 = arith.constant 17 : index
    %c0_109 = arith.constant 0 : index
    %c0_110 = arith.constant 0 : index
    %101 = vector.load %arg8[%c0_107, %c17_108, %c0_109, %c0_110] : memref<1x18x32x16xf32, #tpu.memory_space<vmem>>, vector<1x1x32x16xf32>
    %102 = vector.shape_cast %101 : vector<1x1x32x16xf32> to vector<32x16xf32>
    %103 = vector.shape_cast %97 : vector<32x16xf32> to vector<1x1x32x16xf32>
    tpu.vector_store %arg8[%c0_107, %c17_108, %c0_109, %c0_110], %103 {strides = array<i32>} : memref<1x18x32x16xf32, #tpu.memory_space<vmem>>, vector<1x1x32x16xf32>,
    %cst_111 = arith.constant 0.000000e+00 : f32
    %104 = vector.broadcast %cst_111 : f32 to vector<16x8x16xf32>
    %c0_112 = arith.constant 0 : index
    %c1_113 = arith.constant 1 : index
    %c0_114 = arith.constant 0 : index
    %c0_115 = arith.constant 0 : index
    %105 = vector.load %arg8[%c0_112, %c1_113, %c0_114, %c0_115] : memref<1x18x32x16xf32, #tpu.memory_space<vmem>>, vector<1x16x8x16xf32>
    %106 = vector.shape_cast %105 : vector<1x16x8x16xf32> to vector<16x8x16xf32>
    %107 = vector.shape_cast %104 : vector<16x8x16xf32> to vector<1x16x8x16xf32>
    tpu.vector_store %arg8[%c0_112, %c1_113, %c0_114, %c0_115], %107 {strides = array<i32>} : memref<1x18x32x16xf32, #tpu.memory_space<vmem>>, vector<1x16x8x16xf32>,
    %c0_116 = arith.constant 0 : index
    %c1_117 = arith.constant 1 : index
    %c24_118 = arith.constant 24 : index
    %c0_119 = arith.constant 0 : index
    %108 = vector.load %arg8[%c0_116, %c1_117, %c24_118, %c0_119] : memref<1x18x32x16xf32, #tpu.memory_space<vmem>>, vector<1x16x8x16xf32>
    %109 = vector.shape_cast %108 : vector<1x16x8x16xf32> to vector<16x8x16xf32>
    %110 = vector.shape_cast %104 : vector<16x8x16xf32> to vector<1x16x8x16xf32>
    tpu.vector_store %arg8[%c0_116, %c1_117, %c24_118, %c0_119], %110 {strides = array<i32>} : memref<1x18x32x16xf32, #tpu.memory_space<vmem>>, vector<1x16x8x16xf32>,
    %111 = vector.shape_cast %96 : vector<256x16xf32> to vector<16x16x16xf32>
    %c0_120 = arith.constant 0 : index
    %c1_121 = arith.constant 1 : index
    %c8_122 = arith.constant 8 : index
    %c0_123 = arith.constant 0 : index
    %112 = vector.load %arg8[%c0_120, %c1_121, %c8_122, %c0_123] : memref<1x18x32x16xf32, #tpu.memory_space<vmem>>, vector<1x16x16x16xf32>
    %113 = vector.shape_cast %112 : vector<1x16x16x16xf32> to vector<16x16x16xf32>
    %114 = vector.shape_cast %111 : vector<16x16x16xf32> to vector<1x16x16x16xf32>
    tpu.vector_store %arg8[%c0_120, %c1_121, %c8_122, %c0_123], %114 {strides = array<i32>} : memref<1x18x32x16xf32, #tpu.memory_space<vmem>>, vector<1x16x16x16xf32>,
    %c0_124 = arith.constant 0 : index
    %c0_125 = arith.constant 0 : index
    %c7_126 = arith.constant 7 : index
    %c0_127 = arith.constant 0 : index
    %115 = vector.load %arg8[%c0_124, %c0_125, %c7_126, %c0_127] : memref<1x18x32x16xf32, #tpu.memory_space<vmem>>, vector<1x16x16x16xf32>
    %116 = vector.shape_cast %115 : vector<1x16x16x16xf32> to vector<16x16x16xf32>
    %117 = vector.shape_cast %116 : vector<16x16x16xf32> to vector<256x16xf32>
    %118 = arith.truncf %117 : vector<256x16xf32> to vector<256x16xbf16>
    %c0_128 = arith.constant 0 : index
    %c0_129 = arith.constant 0 : index
    %119 = vector.load %arg9[%c0_128, %c0_129] : memref<256x144xbf16, #tpu.memory_space<vmem>>, vector<256x16xbf16>
    tpu.vector_store %arg9[%c0_128, %c0_129], %118 {strides = array<i32>} : memref<256x144xbf16, #tpu.memory_space<vmem>>, vector<256x16xbf16>,
    %c0_130 = arith.constant 0 : index
    %c0_131 = arith.constant 0 : index
    %c8_132 = arith.constant 8 : index
    %c0_133 = arith.constant 0 : index
    %120 = vector.load %arg8[%c0_130, %c0_131, %c8_132, %c0_133] : memref<1x18x32x16xf32, #tpu.memory_space<vmem>>, vector<1x16x16x16xf32>
    %121 = vector.shape_cast %120 : vector<1x16x16x16xf32> to vector<16x16x16xf32>
    %122 = vector.shape_cast %121 : vector<16x16x16xf32> to vector<256x16xf32>
    %123 = arith.truncf %122 : vector<256x16xf32> to vector<256x16xbf16>
    %c0_134 = arith.constant 0 : index
    %c16 = arith.constant 16 : index
    %124 = vector.load %arg9[%c0_134, %c16] : memref<256x144xbf16, #tpu.memory_space<vmem>>, vector<256x16xbf16>
    tpu.vector_store %arg9[%c0_134, %c16], %123 {strides = array<i32>} : memref<256x144xbf16, #tpu.memory_space<vmem>>, vector<256x16xbf16>,
    %c0_135 = arith.constant 0 : index
    %c0_136 = arith.constant 0 : index
    %c9_137 = arith.constant 9 : index
    %c0_138 = arith.constant 0 : index
    %125 = vector.load %arg8[%c0_135, %c0_136, %c9_137, %c0_138] : memref<1x18x32x16xf32, #tpu.memory_space<vmem>>, vector<1x16x16x16xf32>
    %126 = vector.shape_cast %125 : vector<1x16x16x16xf32> to vector<16x16x16xf32>
    %127 = vector.shape_cast %126 : vector<16x16x16xf32> to vector<256x16xf32>
    %128 = arith.truncf %127 : vector<256x16xf32> to vector<256x16xbf16>
    %c0_139 = arith.constant 0 : index
    %c32 = arith.constant 32 : index
    %129 = vector.load %arg9[%c0_139, %c32] : memref<256x144xbf16, #tpu.memory_space<vmem>>, vector<256x16xbf16>
    tpu.vector_store %arg9[%c0_139, %c32], %128 {strides = array<i32>} : memref<256x144xbf16, #tpu.memory_space<vmem>>, vector<256x16xbf16>,
    %c0_140 = arith.constant 0 : index
    %c1_141 = arith.constant 1 : index
    %c7_142 = arith.constant 7 : index
    %c0_143 = arith.constant 0 : index
    %130 = vector.load %arg8[%c0_140, %c1_141, %c7_142, %c0_143] : memref<1x18x32x16xf32, #tpu.memory_space<vmem>>, vector<1x16x16x16xf32>
    %131 = vector.shape_cast %130 : vector<1x16x16x16xf32> to vector<16x16x16xf32>
    %132 = vector.shape_cast %131 : vector<16x16x16xf32> to vector<256x16xf32>
    %133 = arith.truncf %132 : vector<256x16xf32> to vector<256x16xbf16>
    %c0_144 = arith.constant 0 : index
    %c48 = arith.constant 48 : index
    %134 = vector.load %arg9[%c0_144, %c48] : memref<256x144xbf16, #tpu.memory_space<vmem>>, vector<256x16xbf16>
    tpu.vector_store %arg9[%c0_144, %c48], %133 {strides = array<i32>} : memref<256x144xbf16, #tpu.memory_space<vmem>>, vector<256x16xbf16>,
    %c0_145 = arith.constant 0 : index
    %c1_146 = arith.constant 1 : index
    %c8_147 = arith.constant 8 : index
    %c0_148 = arith.constant 0 : index
    %135 = vector.load %arg8[%c0_145, %c1_146, %c8_147, %c0_148] : memref<1x18x32x16xf32, #tpu.memory_space<vmem>>, vector<1x16x16x16xf32>
    %136 = vector.shape_cast %135 : vector<1x16x16x16xf32> to vector<16x16x16xf32>
    %137 = vector.shape_cast %136 : vector<16x16x16xf32> to vector<256x16xf32>
    %138 = arith.truncf %137 : vector<256x16xf32> to vector<256x16xbf16>
    %c0_149 = arith.constant 0 : index
    %c64 = arith.constant 64 : index
    %139 = vector.load %arg9[%c0_149, %c64] : memref<256x144xbf16, #tpu.memory_space<vmem>>, vector<256x16xbf16>
    tpu.vector_store %arg9[%c0_149, %c64], %138 {strides = array<i32>} : memref<256x144xbf16, #tpu.memory_space<vmem>>, vector<256x16xbf16>,
    %c0_150 = arith.constant 0 : index
    %c1_151 = arith.constant 1 : index
    %c9_152 = arith.constant 9 : index
    %c0_153 = arith.constant 0 : index
    %140 = vector.load %arg8[%c0_150, %c1_151, %c9_152, %c0_153] : memref<1x18x32x16xf32, #tpu.memory_space<vmem>>, vector<1x16x16x16xf32>
    %141 = vector.shape_cast %140 : vector<1x16x16x16xf32> to vector<16x16x16xf32>
    %142 = vector.shape_cast %141 : vector<16x16x16xf32> to vector<256x16xf32>
    %143 = arith.truncf %142 : vector<256x16xf32> to vector<256x16xbf16>
    %c0_154 = arith.constant 0 : index
    %c80 = arith.constant 80 : index
    %144 = vector.load %arg9[%c0_154, %c80] : memref<256x144xbf16, #tpu.memory_space<vmem>>, vector<256x16xbf16>
    tpu.vector_store %arg9[%c0_154, %c80], %143 {strides = array<i32>} : memref<256x144xbf16, #tpu.memory_space<vmem>>, vector<256x16xbf16>,
    %c0_155 = arith.constant 0 : index
    %c2_156 = arith.constant 2 : index
    %c7_157 = arith.constant 7 : index
    %c0_158 = arith.constant 0 : index
    %145 = vector.load %arg8[%c0_155, %c2_156, %c7_157, %c0_158] : memref<1x18x32x16xf32, #tpu.memory_space<vmem>>, vector<1x16x16x16xf32>
    %146 = vector.shape_cast %145 : vector<1x16x16x16xf32> to vector<16x16x16xf32>
    %147 = vector.shape_cast %146 : vector<16x16x16xf32> to vector<256x16xf32>
    %148 = arith.truncf %147 : vector<256x16xf32> to vector<256x16xbf16>
    %c0_159 = arith.constant 0 : index
    %c96 = arith.constant 96 : index
    %149 = vector.load %arg9[%c0_159, %c96] : memref<256x144xbf16, #tpu.memory_space<vmem>>, vector<256x16xbf16>
    tpu.vector_store %arg9[%c0_159, %c96], %148 {strides = array<i32>} : memref<256x144xbf16, #tpu.memory_space<vmem>>, vector<256x16xbf16>,
    %c0_160 = arith.constant 0 : index
    %c2_161 = arith.constant 2 : index
    %c8_162 = arith.constant 8 : index
    %c0_163 = arith.constant 0 : index
    %150 = vector.load %arg8[%c0_160, %c2_161, %c8_162, %c0_163] : memref<1x18x32x16xf32, #tpu.memory_space<vmem>>, vector<1x16x16x16xf32>
    %151 = vector.shape_cast %150 : vector<1x16x16x16xf32> to vector<16x16x16xf32>
    %152 = vector.shape_cast %151 : vector<16x16x16xf32> to vector<256x16xf32>
    %153 = arith.truncf %152 : vector<256x16xf32> to vector<256x16xbf16>
    %c0_164 = arith.constant 0 : index
    %c112 = arith.constant 112 : index
    %154 = vector.load %arg9[%c0_164, %c112] : memref<256x144xbf16, #tpu.memory_space<vmem>>, vector<256x16xbf16>
    tpu.vector_store %arg9[%c0_164, %c112], %153 {strides = array<i32>} : memref<256x144xbf16, #tpu.memory_space<vmem>>, vector<256x16xbf16>,
    %c0_165 = arith.constant 0 : index
    %c2_166 = arith.constant 2 : index
    %c9_167 = arith.constant 9 : index
    %c0_168 = arith.constant 0 : index
    %155 = vector.load %arg8[%c0_165, %c2_166, %c9_167, %c0_168] : memref<1x18x32x16xf32, #tpu.memory_space<vmem>>, vector<1x16x16x16xf32>
    %156 = vector.shape_cast %155 : vector<1x16x16x16xf32> to vector<16x16x16xf32>
    %157 = vector.shape_cast %156 : vector<16x16x16xf32> to vector<256x16xf32>
    %158 = arith.truncf %157 : vector<256x16xf32> to vector<256x16xbf16>
    %c0_169 = arith.constant 0 : index
    %c128 = arith.constant 128 : index
    %159 = vector.load %arg9[%c0_169, %c128] : memref<256x144xbf16, #tpu.memory_space<vmem>>, vector<256x16xbf16>
    tpu.vector_store %arg9[%c0_169, %c128], %158 {strides = array<i32>} : memref<256x144xbf16, #tpu.memory_space<vmem>>, vector<256x16xbf16>,
    %c0_170 = arith.constant 0 : index
    %c0_171 = arith.constant 0 : index
    %160 = vector.load %arg9[%c0_170, %c0_171] : memref<256x144xbf16, #tpu.memory_space<vmem>>, vector<256x128xbf16>
    %c0_172 = arith.constant 0 : index
    %c0_173 = arith.constant 0 : index
    %161 = vector.load %arg4[%c0_172, %c0_173] : memref<144x32xbf16, #tpu.memory_space<vmem>>, vector<128x32xbf16>
    %cst_174 = arith.constant dense<0.000000e+00> : vector<256x32xf32>
    %162 = tpu.matmul %160, %161, %cst_174 {dimension_numbers = #tpu.dot_dimension_numbers<[1], [0], [0], [1], [0, 0, 1, 1], [], []>} : vector<256x128xbf16>, vector<128x32xbf16>, vector<256x32xf32> -> vector<256x32xf32>
    %c0_175 = arith.constant 0 : index
    %c128_176 = arith.constant 128 : index
    %163 = vector.load %arg9[%c0_175, %c128_176] : memref<256x144xbf16, #tpu.memory_space<vmem>>, vector<256x16xbf16>
    %c128_177 = arith.constant 128 : index
    %c0_178 = arith.constant 0 : index
    %164 = vector.load %arg4[%c128_177, %c0_178] : memref<144x32xbf16, #tpu.memory_space<vmem>>, vector<16x32xbf16>
    %cst_179 = arith.constant dense<0.000000e+00> : vector<256x32xf32>
    %165 = tpu.matmul %163, %164, %cst_179 {dimension_numbers = #tpu.dot_dimension_numbers<[1], [0], [0], [1], [0, 0, 1, 1], [], []>} : vector<256x16xbf16>, vector<16x32xbf16>, vector<256x32xf32> -> vector<256x32xf32>
    %166 = arith.addf %162, %165 : vector<256x32xf32>
    %c0_180 = arith.constant 0 : index
    %c0_181 = arith.constant 0 : index
    %167 = vector.load %arg5[%c0_180, %c0_181] : memref<1x32xf32, #tpu.memory_space<vmem>>, vector<1x32xf32>
    %168 = vector.broadcast %167 : vector<1x32xf32> to vector<256x32xf32>
    %169 = arith.addf %166, %168 : vector<256x32xf32>
    %cst_182 = arith.constant 0.000000e+00 : f32
    %170 = vector.broadcast %cst_182 : f32 to vector<256x32xf32>
    %171 = arith.maximumf %169, %170 : vector<256x32xf32>
    %172 = tpu.transpose %171, [1, 0] : vector<256x32xf32> -> vector<32x256xf32>
    %c0_183 = arith.constant 0 : index
    %c0_184 = arith.constant 0 : index
    %c0_185 = arith.constant 0 : index
    %173 = vector.load %arg6[%c0_183, %c0_184, %c0_185] : memref<1x32x256xf32, #tpu.memory_space<vmem>>, vector<1x32x256xf32>
    %174 = vector.shape_cast %173 : vector<1x32x256xf32> to vector<32x256xf32>
    %175 = vector.shape_cast %172 : vector<32x256xf32> to vector<1x32x256xf32>
    tpu.vector_store %arg6[%c0_183, %c0_184, %c0_185], %175 {strides = array<i32>} : memref<1x32x256xf32, #tpu.memory_space<vmem>>, vector<1x32x256xf32>,
    return
  }
  func.func @transform_0(%arg0: i32) -> (i32, i32, i32, i32) {
    %c0_i32 = arith.constant 0 : i32
    %c0_i32_0 = arith.constant 0 : i32
    %c0_i32_1 = arith.constant 0 : i32
    %c0_i32_2 = arith.constant 0 : i32
    return %arg0, %c0_i32, %c0_i32_0, %c0_i32_1 : i32, i32, i32, i32
  }
  func.func @transform_1(%arg0: i32) -> (i32, i32, i32, i32) {
    %c0_i32 = arith.constant 0 : i32
    %c0_i32_0 = arith.constant 0 : i32
    %c0_i32_1 = arith.constant 0 : i32
    %c0_i32_2 = arith.constant 0 : i32
    %c0_i32_3 = arith.constant 0 : i32
    return %c0_i32, %c0_i32_0, %c0_i32_1, %c0_i32_2 : i32, i32, i32, i32
  }
  func.func @transform_2(%arg0: i32) -> (i32, i32) {
    %c0_i32 = arith.constant 0 : i32
    %c0_i32_0 = arith.constant 0 : i32
    %c0_i32_1 = arith.constant 0 : i32
    return %c0_i32, %c0_i32_0 : i32, i32
  }
  func.func @transform_3(%arg0: i32) -> (i32, i32) {
    %c0_i32 = arith.constant 0 : i32
    %c0_i32_0 = arith.constant 0 : i32
    %c0_i32_1 = arith.constant 0 : i32
    return %c0_i32, %c0_i32_0 : i32, i32
  }
  func.func @transform_4(%arg0: i32) -> (i32, i32) {
    %c0_i32 = arith.constant 0 : i32
    %c0_i32_0 = arith.constant 0 : i32
    %c0_i32_1 = arith.constant 0 : i32
    return %c0_i32, %c0_i32_0 : i32, i32
  }
  func.func @transform_5(%arg0: i32) -> (i32, i32, i32) {
    %c0_i32 = arith.constant 0 : i32
    %c0_i32_0 = arith.constant 0 : i32
    %c0_i32_1 = arith.constant 0 : i32
    return %arg0, %c0_i32, %c0_i32_0 : i32, i32, i32
  }
}

</mosaic_0001>

<bundles_post_ra>
// kernel: simple_cnn_forward.1
= control target key start
LH: loop header
LB: loop body
LE: loop exit
PB: predicated region body
PF: predicated region fallthrough
CT: control target
= control target key end

     0   :  { %s5906_s18 = smov 0   ;;  %s7264_s0 = inlined_call_operand.vmem [shape: f32[2,16,16,3], index: 0, kind: input, shape index: {}]   ;;  %s7265_s1 = inlined_call_operand.vmem [shape: bf16[3,3,3,16], index: 1, kind: input, shape index: {}]   ;;  %s7266_s2 = inlined_call_operand.vmem [shape: f32[1,16], index: 2, kind: input, shape index: {}]   ;;  %s7267_s3 = inlined_call_operand.vmem [shape: bf16[144,32], index: 3, kind: input, shape index: {}]   ;;  %s7268_s4 = inlined_call_operand.vmem [shape: f32[1,32], index: 4, kind: input, shape index: {}]   ;;  %s7269_s5 = inlined_call_operand.vmem [shape: f32[2,32,256], index: 5, kind: output, shape index: {}]  }
   0x1 LB: > { %s4769_s19 = sadd.s32 4294967295, %s5865_s18   ;;  %p4773_p0 = scmp.ge.s32.totalorder %s5865_s18, 1  ;;  %s5865_s18 = sphi %s5906_s18, %s15_s18  }
   0x2   : > { %p187_p1 = scmp.lt.s32.totalorder %s5865_s18, 3 }
   0x4   : > { %p188_p2 = pnand %p4773_p0, %p187_p1 }
   0x5   : > { %v4778_v0 = vld [vmem:[%s7265_s1 + $0x2] sm:$0x3] (!%p188_p2)  ;;  %vm480_vm0 = vcmask (!%p188_p2), 1040384   ;;  %vm481_vm1 = vcmask (!%p188_p2), 1041408   ;;  %vm226_vm2 = vcmask (!%p188_p2), 23552   ;;  %v5867_v1 = vmov (!%p188_p2), 65535  }
   0x6   : > { %191 = sbr.rel (%p188_p2) target bundleno = 1210 (0x4ba), region = 40  ;;  %v482_v2 = vsel (!%p188_p2), %vm480_vm0, 4294967295, %v5867_v1  ;;  %v4828_v3 = vld [vmem:[%s7265_s1 + $0x6] sm:$0x3] (!%p188_p2)  ;;  %p5922_p3 = scmp.lt.s32.totalorder (!%p188_p2), %s4769_s19, 1  ;;  %v5868_v5 = vmov (!%p188_p2), 0.0  }
   0x7   : > { %v5926_v4 = vsel (!%p188_p2), %vm481_vm1, %v482_v2, 0  ;;  %228 = vst.msk [vmem:[#allocation2 + $0x8] sm:$0xff] (!%p188_p2), %vm226_vm2, %v5868_v5  ;;  %229 = vst.msk [vmem:[#allocation2 + $0x10] sm:$0xff] (!%p188_p2), %vm226_vm2, %v5868_v5  ;;  %v4845_v6 = vld [vmem:[%s7265_s1 + $0x8] sm:$0x3] (!%p188_p2)  ;;  %vm2990_vm3 = vcmask (!%p188_p2), 130048  }
   0x8   : > { %227 = vst.msk [vmem:[#allocation2] sm:$0xff] (!%p188_p2), %vm226_vm2, %v5868_v5  ;;  %230 = vst.msk [vmem:[#allocation2 + $0x18] sm:$0xff] (!%p188_p2), %vm226_vm2, %v5868_v5  ;;  %v485_v7 = vand.u32 (!%p188_p2), %v4778_v0, %v5926_v4  ;;  %v6013_v8 = vand.u32 (!%p188_p2), %v4828_v3, %v5926_v4  ;;  %v6022_v9 = vand.u32 (!%p188_p2), %v4845_v6, %v5926_v4  ;;  %v381_v10 = vld [vmem:[%s7265_s1] sm:$0x3] (!%p188_p2)  ;;  %v4862_v33 = vld [vmem:[%s7265_s1 + $0xa] sm:$0x3] (!%p188_p2) }
   0x9   : > { %232 = vst.msk [vmem:[#allocation2 + $0x220] sm:$0xff] (!%p188_p2), %vm226_vm2, %v5868_v5  ;;  %233 = vst.msk [vmem:[#allocation2 + $0x228] sm:$0xff] (!%p188_p2), %vm226_vm2, %v5868_v5  ;;  %v6028_v11 = vand.u32 (!%p188_p2), %v5926_v4, %v381_v10  ;;  %v6099_v52 = vand.u32 (!%p188_p2), %v4862_v33, %v5926_v4  ;;  %s5869_s20 = smov (!%p188_p2), 32   ;;  %s5870_s21 = smov (!%p188_p2), 16   ;;  %vm3241_vm4 = vcmask (!%p188_p2), 261248   ;;  %vm3370_vm5 = vcmask (!%p188_p2), 392448  }
   0xa   : > { %234 = vst.msk [vmem:[#allocation2 + $0x230] sm:$0xff] (!%p188_p2), %vm226_vm2, %v5868_v5  ;;  %235 = vst.msk [vmem:[#allocation2 + $0x238] sm:$0xff] (!%p188_p2), %vm226_vm2, %v5868_v5  ;;  %5155 = vmatprep.subr.bf16.mxu1 (!%p188_p2), %v485_v7  ;;  %5257 = vmatprep.subr.bf16.mxu0 (!%p188_p2), %v6013_v8  ;;  %s5871_s28 = smov (!%p188_p2), 96   ;;  %s5873_s30 = smov (!%p188_p2), 112   ;;  %vm3499_vm6 = vcmask (!%p188_p2), 523648   ;;  %vm3628_vm7 = vcmask (!%p188_p2), 654848  }
   0xb   : > { %237 = vst.msk [vmem:[#allocation2 + $0x20] sm:$0xff] (!%p188_p2), %vm226_vm2, %v5868_v5  ;;  %238 = vst.msk [vmem:[#allocation2 + $0x40] sm:$0xff] (!%p188_p2), %vm226_vm2, %v5868_v5  ;;  %5156 = vmatpush3.bf16.msra.mxu1 (!%p188_p2), %v485_v7  ;;  %5258 = vmatpush3.bf16.msra.mxu0 (!%p188_p2), %v6013_v8  ;;  %s5874_s6 = smov (!%p188_p2), 64   ;;  %vm3757_vm8 = vcmask (!%p188_p2), 786048   ;;  %vm3887_vm9 = vcmask (!%p188_p2), 917248   ;;  %vm4016_vm10 = vcmask (!%p188_p2), 1048448  }
   0xc   : > { %239 = vst.msk [vmem:[#allocation2 + $0x60] sm:$0xff] (!%p188_p2), %vm226_vm2, %v5868_v5  ;;  %240 = vst.msk [vmem:[#allocation2 + $0x80] sm:$0xff] (!%p188_p2), %vm226_vm2, %v5868_v5  ;;  %5291 = vmatprep.subr.bf16.mxu0 (!%p188_p2), %v6022_v9  ;;  %5189 = vmatprep.subr.bf16.mxu1 (!%p188_p2), %v6028_v11 }
   0xd   : > { %241 = vst.msk [vmem:[#allocation2 + $0xa0] sm:$0xff] %vm226_vm2, %v5868_v5  ;;  %242 = vst.msk [vmem:[#allocation2 + $0xc0] sm:$0xff] %vm226_vm2, %v5868_v5  ;;  %s7272_s19 = smov (!%p5922_p3, %s4769_s19), 1 }
   0xe   : > { %243 = vst.msk [vmem:[#allocation2 + $0xe0] sm:$0xff] %vm226_vm2, %v5868_v5  ;;  %244 = vst.msk [vmem:[#allocation2 + $0x100] sm:$0xff] %vm226_vm2, %v5868_v5  ;;  %s4959_s29 = sshll.u32 %s7272_s19, 8  ;;  %v382_v18 = vld [vmem:[#allocation2 + $0x8] sm:$0xff]  ;;  %v383_v19 = vld [vmem:[#allocation2 + $0x10] sm:$0xff]  ;;  %s4960_s26 = sshll.u32 %s7272_s19, 6 }
   0xf   : > { %245 = vst.msk [vmem:[#allocation2 + $0x120] sm:$0xff] %vm226_vm2, %v5868_v5  ;;  %246 = vst.msk [vmem:[#allocation2 + $0x140] sm:$0xff] %vm226_vm2, %v5868_v5  ;;  %s6036_s7 = scalar_lea.vmem %s7264_s0, %s4959_s29  ;;  %v414_v21 = vpack.c.bf16 %v383_v19, %v382_v18  ;;  %s5872_s29 = smov 48  }
  0x10   : > { %247 = vst.msk [vmem:[#allocation2 + $0x160] sm:$0xff] %vm226_vm2, %v5868_v5  ;;  %248 = vst.msk [vmem:[#allocation2 + $0x180] sm:$0xff] %vm226_vm2, %v5868_v5  ;;  %v269_v12 = vld [vmem:[%s6036_s7] sm:$0xff]  ;;  %v270_v13 = vld [vmem:[%s6036_s7 + $0x8] sm:$0xff] }
  0x11   : > { %249 = vst.msk [vmem:[#allocation2 + $0x1a0] sm:$0xff] %vm226_vm2, %v5868_v5  ;;  %250 = vst.msk [vmem:[#allocation2 + $0x1c0] sm:$0xff] %vm226_vm2, %v5868_v5  ;;  %v271_v14 = vld [vmem:[%s6036_s7 + $0x10] sm:$0xff]  ;;  %v272_v15 = vld [vmem:[%s6036_s7 + $0x18] sm:$0xff]  ;;  %5157 = vmatprep.mubr.msk.bf16.mxu1 %vm226_vm2, %v414_v21 }
  0x12   : > { %251 = vst.msk [vmem:[#allocation2 + $0x1e0] sm:$0xff] %vm226_vm2, %v5868_v5  ;;  %252 = vst.msk [vmem:[#allocation2 + $0x200] sm:$0xff] %vm226_vm2, %v5868_v5  ;;  %v273_v16 = vld [vmem:[%s6036_s7 + $0x20] sm:$0xff]  ;;  %v274_v17 = vld [vmem:[%s6036_s7 + $0x28] sm:$0xff] }
  0x13   : > { %253 = vst.msk [vmem:[#allocation2 + $0x38] sm:$0xff] %vm226_vm2, %v5868_v5  ;;  %254 = vst.msk [vmem:[#allocation2 + $0x58] sm:$0xff] %vm226_vm2, %v5868_v5  ;;  %v275_v20 = vld [vmem:[%s6036_s7 + $0x30] sm:$0xff]  ;;  %v276_v22 = vld [vmem:[%s6036_s7 + $0x38] sm:$0xff] }
  0x14   : > { %255 = vst.msk [vmem:[#allocation2 + $0x78] sm:$0xff] %vm226_vm2, %v5868_v5  ;;  %256 = vst.msk [vmem:[#allocation2 + $0x98] sm:$0xff] %vm226_vm2, %v5868_v5  ;;  %v277_v23 = vld [vmem:[%s6036_s7 + $0x40] sm:$0xff]  ;;  %v278_v24 = vld [vmem:[%s6036_s7 + $0x48] sm:$0xff] }
  0x15   : > { %257 = vst.msk [vmem:[#allocation2 + $0xb8] sm:$0xff] %vm226_vm2, %v5868_v5  ;;  %258 = vst.msk [vmem:[#allocation2 + $0xd8] sm:$0xff] %vm226_vm2, %v5868_v5  ;;  %v279_v25 = vld [vmem:[%s6036_s7 + $0x50] sm:$0xff]  ;;  %v280_v26 = vld [vmem:[%s6036_s7 + $0x58] sm:$0xff] }
  0x16   : > { %259 = vst.msk [vmem:[#allocation2 + $0xf8] sm:$0xff] %vm226_vm2, %v5868_v5  ;;  %260 = vst.msk [vmem:[#allocation2 + $0x118] sm:$0xff] %vm226_vm2, %v5868_v5  ;;  %v281_v27 = vld [vmem:[%s6036_s7 + $0x60] sm:$0xff]  ;;  %v282_v28 = vld [vmem:[%s6036_s7 + $0x68] sm:$0xff] }
  0x17   : > { %261 = vst.msk [vmem:[#allocation2 + $0x138] sm:$0xff] %vm226_vm2, %v5868_v5  ;;  %262 = vst.msk [vmem:[#allocation2 + $0x158] sm:$0xff] %vm226_vm2, %v5868_v5  ;;  %v283_v29 = vld [vmem:[%s6036_s7 + $0x70] sm:$0xff]  ;;  %v284_v30 = vld [vmem:[%s6036_s7 + $0x78] sm:$0xff] }
  0x18   : > { %263 = vst.msk [vmem:[#allocation2 + $0x178] sm:$0xff] %vm226_vm2, %v5868_v5  ;;  %264 = vst.msk [vmem:[#allocation2 + $0x198] sm:$0xff] %vm226_vm2, %v5868_v5  ;;  %v285_v31 = vld [vmem:[%s6036_s7 + $0x80] sm:$0xff]  ;;  %v286_v32 = vld [vmem:[%s6036_s7 + $0x88] sm:$0xff] }
  0x19   : > { %265 = vst.msk [vmem:[#allocation2 + $0x1b8] sm:$0xff] %vm226_vm2, %v5868_v5  ;;  %266 = vst.msk [vmem:[#allocation2 + $0x1d8] sm:$0xff] %vm226_vm2, %v5868_v5  ;;  %v287_v34 = vld [vmem:[%s6036_s7 + $0x90] sm:$0xff]  ;;  %v288_v35 = vld [vmem:[%s6036_s7 + $0x98] sm:$0xff] }
  0x1a   : > { %267 = vst.msk [vmem:[#allocation2 + $0x1f8] sm:$0xff] %vm226_vm2, %v5868_v5  ;;  %268 = vst.msk [vmem:[#allocation2 + $0x218] sm:$0xff] %vm226_vm2, %v5868_v5  ;;  %v289_v36 = vld [vmem:[%s6036_s7 + $0xa0] sm:$0xff]  ;;  %v290_v37 = vld [vmem:[%s6036_s7 + $0xa8] sm:$0xff] }
  0x1b   : > { %301 = vst.msk [vmem:[#allocation2 + $0x28] sm:$0xff] %vm226_vm2, %v269_v12  ;;  %302 = vst.msk [vmem:[#allocation2 + $0x30] sm:$0xff] %vm226_vm2, %v270_v13  ;;  %v292_v12 = vld [vmem:[%s6036_s7 + $0xb8] sm:$0xff]  ;;  %v293_v13 = vld [vmem:[%s6036_s7 + $0xc0] sm:$0xff] }
  0x1c   : > { %303 = vst.msk [vmem:[#allocation2 + $0x48] sm:$0xff] %vm226_vm2, %v271_v14  ;;  %304 = vst.msk [vmem:[#allocation2 + $0x50] sm:$0xff] %vm226_vm2, %v272_v15  ;;  %v294_v14 = vld [vmem:[%s6036_s7 + $0xc8] sm:$0xff]  ;;  %v295_v15 = vld [vmem:[%s6036_s7 + $0xd0] sm:$0xff] }
  0x1d   : > { %305 = vst.msk [vmem:[#allocation2 + $0x68] sm:$0xff] %vm226_vm2, %v273_v16  ;;  %306 = vst.msk [vmem:[#allocation2 + $0x70] sm:$0xff] %vm226_vm2, %v274_v17  ;;  %v296_v16 = vld [vmem:[%s6036_s7 + $0xd8] sm:$0xff]  ;;  %v297_v17 = vld [vmem:[%s6036_s7 + $0xe0] sm:$0xff] }
  0x1e   : > { %307 = vst.msk [vmem:[#allocation2 + $0x88] sm:$0xff] %vm226_vm2, %v275_v20  ;;  %308 = vst.msk [vmem:[#allocation2 + $0x90] sm:$0xff] %vm226_vm2, %v276_v22  ;;  %v298_v21 = vld [vmem:[%s6036_s7 + $0xe8] sm:$0xff] }
  0x1f   : > { %309 = vst.msk [vmem:[#allocation2 + $0xa8] sm:$0xff] %vm226_vm2, %v277_v23  ;;  %310 = vst.msk [vmem:[#allocation2 + $0xb0] sm:$0xff] %vm226_vm2, %v278_v24  ;;  %v299_v23 = vld [vmem:[%s6036_s7 + $0xf0] sm:$0xff]  ;;  %v300_v24 = vld [vmem:[%s6036_s7 + $0xf8] sm:$0xff] }
  0x20   : > { %311 = vst.msk [vmem:[#allocation2 + $0xc8] sm:$0xff] %vm226_vm2, %v279_v25  ;;  %312 = vst.msk [vmem:[#allocation2 + $0xd0] sm:$0xff] %vm226_vm2, %v280_v26 }
  0x21   : > { %313 = vst.msk [vmem:[#allocation2 + $0xe8] sm:$0xff] %vm226_vm2, %v281_v27  ;;  %314 = vst.msk [vmem:[#allocation2 + $0xf0] sm:$0xff] %vm226_vm2, %v282_v28 }
  0x22   : > { %315 = vst.msk [vmem:[#allocation2 + $0x108] sm:$0xff] %vm226_vm2, %v283_v29  ;;  %316 = vst.msk [vmem:[#allocation2 + $0x110] sm:$0xff] %vm226_vm2, %v284_v30  ;;  %v384_v38 = vld [vmem:[#allocation2 + $0x28] sm:$0xff]  ;;  %v385_v39 = vld [vmem:[#allocation2 + $0x30] sm:$0xff] }
  0x23   : > { %317 = vst.msk [vmem:[#allocation2 + $0x128] sm:$0xff] %vm226_vm2, %v285_v31  ;;  %318 = vst.msk [vmem:[#allocation2 + $0x130] sm:$0xff] %vm226_vm2, %v286_v32  ;;  %v1154_v40 = vld [vmem:[#allocation2 + $0x27] sm:$0xff]  ;;  %v6088_v41 = vpack.c.bf16 %v385_v39, %v384_v38  ;;  %v1155_v42 = vld [vmem:[#allocation2 + $0x2f] sm:$0xff] }
  0x24   : > { %319 = vst.msk [vmem:[#allocation2 + $0x148] sm:$0xff] %vm226_vm2, %v287_v34  ;;  %320 = vst.msk [vmem:[#allocation2 + $0x150] sm:$0xff] %vm226_vm2, %v288_v35  ;;  %v1156_v43 = vld [vmem:[#allocation2 + $0x47] sm:$0xff]  ;;  %v1157_v44 = vld [vmem:[#allocation2 + $0x4f] sm:$0xff]  ;;  %v6090_v45 = vpack.c.bf16 %v1155_v42, %v1154_v40 }
  0x25   : > { %321 = vst.msk [vmem:[#allocation2 + $0x168] sm:$0xff] %vm226_vm2, %v289_v36  ;;  %322 = vst.msk [vmem:[#allocation2 + $0x170] sm:$0xff] %vm226_vm2, %v290_v37  ;;  %v6092_v46 = vpack.c.bf16 %v1157_v44, %v1156_v43  ;;  %v386_v47 = vld [vmem:[#allocation2 + $0x48] sm:$0xff]  ;;  %v387_v48 = vld [vmem:[#allocation2 + $0x50] sm:$0xff]  ;;  %5158 = vmatmul.mubr.msk.bf16.vlgmr.msra.gmra.mrb[0].mxu1 %vm226_vm2, %v6088_v41 }
  0x26   : > { %v6096_v49 = vpack.c.bf16 %v387_v48, %v386_v47  ;;  %v1158_v50 = vld [vmem:[#allocation2 + $0x67] sm:$0xff]  ;;  %v1159_v51 = vld [vmem:[#allocation2 + $0x6f] sm:$0xff]  ;;  %5259 = vmatprep.mubr.msk.bf16.mxu0 %vm226_vm2, %v6090_v45  ;;  %5190 = vmatpush3.bf16.msra.mxu1 %v6028_v11  ;;  %324 = vst.msk [vmem:[#allocation2 + $0x190] sm:$0xff] %vm226_vm2, %v292_v12  ;;  %325 = vst.msk [vmem:[#allocation2 + $0x1a8] sm:$0xff] %vm226_vm2, %v293_v13 }
  0x27   : > { %v388_v53 = vld [vmem:[#allocation2 + $0x68] sm:$0xff]  ;;  %v389_v54 = vld [vmem:[#allocation2 + $0x70] sm:$0xff]  ;;  %v6103_v55 = vpack.c.bf16 %v1159_v51, %v1158_v50  ;;  %5260 = vmatmul.mubr.msk.bf16.vlgmr.msra.gmra.mrb[0].mxu0 %vm226_vm2, %v6092_v46  ;;  %326 = vst.msk [vmem:[#allocation2 + $0x1b0] sm:$0xff] %vm226_vm2, %v294_v14  ;;  %327 = vst.msk [vmem:[#allocation2 + $0x1c8] sm:$0xff] %vm226_vm2, %v295_v15 }
  0x28   : > { %5161 = vmatprep.mubr.msk.bf16.mxu1 %vm226_vm2, %v6096_v49  ;;  %v390_v56 = vld [vmem:[#allocation2 + $0x88] sm:$0xff]  ;;  %v391_v57 = vld [vmem:[#allocation2 + $0x90] sm:$0xff]  ;;  %5292 = vmatpush3.bf16.msra.mxu0 %v6022_v9  ;;  %v6113_v60 = vpack.c.bf16 %v389_v54, %v388_v53  ;;  %328 = vst.msk [vmem:[#allocation2 + $0x1d0] sm:$0xff] %vm226_vm2, %v296_v16  ;;  %329 = vst.msk [vmem:[#allocation2 + $0x1e8] sm:$0xff] %vm226_vm2, %v297_v17 }
  0x29   : > { %5263 = vmatprep.mubr.msk.bf16.mxu0 %vm226_vm2, %v6103_v55  ;;  %v1160_v58 = vld [vmem:[#allocation2 + $0x87] sm:$0xff]  ;;  %v1161_v59 = vld [vmem:[#allocation2 + $0x8f] sm:$0xff]  ;;  %5325 = vmatprep.subr.bf16.mxu0 %v6099_v52  ;;  %v6116_v63 = vpack.c.bf16 %v391_v57, %v390_v56  ;;  %330 = vst.msk [vmem:[#allocation2 + $0x1f0] sm:$0xff] %vm226_vm2, %v298_v21  ;;  %331 = vst.msk [vmem:[#allocation2 + $0x208] sm:$0xff] %vm226_vm2, %v299_v23 }
  0x2a   : > { %v1162_v61 = vld [vmem:[#allocation2 + $0xa7] sm:$0xff]  ;;  %v1163_v62 = vld [vmem:[#allocation2 + $0xaf] sm:$0xff]  ;;  %v6118_v0 = vpack.c.bf16 %v1161_v59, %v1160_v58  ;;  %332 = vst.msk [vmem:[#allocation2 + $0x210] sm:$0xff] %vm226_vm2, %v300_v24  ;;  %v4811_v40 = vld [vmem:[%s7265_s1 + $0x4] sm:$0x3] }
  0x2b   : > { %v6120_v1 = vpack.c.bf16 %v1163_v62, %v1162_v61  ;;  %v392_v2 = vld [vmem:[#allocation2 + $0xa8] sm:$0xff]  ;;  %v393_v3 = vld [vmem:[#allocation2 + $0xb0] sm:$0xff]  ;;  %v959_v43 = vand.u32 %v4811_v40, %v5926_v4  ;;  %2991 = vst.msk [vmem:[#allocation3] sm:$0xff] %vm2990_vm3, %v5868_v5  ;;  %2992 = vst.msk [vmem:[#allocation3 + $0x8] sm:$0xff] %vm2990_vm3, %v5868_v5 }
  0x2c   : > { %v1164_v6 = vld [vmem:[#allocation2 + $0xc7] sm:$0xff]  ;;  %v1165_v7 = vld [vmem:[#allocation2 + $0xcf] sm:$0xff]  ;;  %v6141_v18 = vpack.c.bf16 %v393_v3, %v392_v2  ;;  %2993 = vst.msk [vmem:[#allocation3 + $0x10] sm:$0xff] %vm2990_vm3, %v5868_v5  ;;  %2994 = vst.msk [vmem:[#allocation3 + $0x18] sm:$0xff] %vm2990_vm3, %v5868_v5 }
  0x2d   : > { %5162 = vmatmul.mubr.msk.bf16.gmra.mrb[4].mxu1 %vm226_vm2, %v6113_v60  ;;  %v394_v9 = vld [vmem:[#allocation2 + $0xc8] sm:$0xff]  ;;  %v395_v10 = vld [vmem:[#allocation2 + $0xd0] sm:$0xff]  ;;  %v6152_v25 = vpack.c.bf16 %v1165_v7, %v1164_v6  ;;  %5223 = vmatprep.subr.bf16.mxu1 %v959_v43  ;;  %2996 = vst.msk [vmem:[#allocation3 + $0x220] sm:$0xff] %vm2990_vm3, %v5868_v5  ;;  %2997 = vst.msk [vmem:[#allocation3 + $0x228] sm:$0xff] %vm2990_vm3, %v5868_v5 }
  0x2e   : > { %5165 = vmatprep.mubr.msk.bf16.mxu1 %vm226_vm2, %v6116_v63  ;;  %v291_v11 = vld [vmem:[%s6036_s7 + $0xb0] sm:$0xff]  ;;  %v1166_v19 = vld [vmem:[#allocation2 + $0xe7] sm:$0xff]  ;;  %v6147_v22 = vpack.c.bf16 %v395_v10, %v394_v9  ;;  %2998 = vst.msk [vmem:[#allocation3 + $0x230] sm:$0xff] %vm2990_vm3, %v5868_v5  ;;  %2999 = vst.msk [vmem:[#allocation3 + $0x238] sm:$0xff] %vm2990_vm3, %v5868_v5  ;;  %s5875_s7 = smov 80  }
  0x2f   : > { %5264 = vmatmul.mubr.msk.bf16.gmra.mrb[4].mxu0 %vm226_vm2, %v6118_v0  ;;  %323 = vst.msk [vmem:[#allocation2 + $0x188] sm:$0xff] %vm226_vm2, %v291_v11  ;;  %v1167_v20 = vld [vmem:[#allocation2 + $0xef] sm:$0xff]  ;;  %v1168_v31 = vld [vmem:[#allocation2 + $0x107] sm:$0xff] }
  0x30   : > { %5267 = vmatprep.mubr.msk.bf16.mxu0 %vm226_vm2, %v6120_v1  ;;  %v6156_v26 = vpack.c.bf16 %v1167_v20, %v1166_v19  ;;  %v396_v27 = vld [vmem:[#allocation2 + $0xe8] sm:$0xff]  ;;  %v397_v28 = vld [vmem:[#allocation2 + $0xf0] sm:$0xff]  ;;  %3001 = vst.msk [vmem:[#allocation3 + $0x20] sm:$0xff] %vm2990_vm3, %v5868_v5  ;;  %3002 = vst.msk [vmem:[#allocation3 + $0x40] sm:$0xff] %vm2990_vm3, %v5868_v5 }
  0x31   : > { %v398_v29 = vld [vmem:[#allocation2 + $0x108] sm:$0xff]  ;;  %v399_v30 = vld [vmem:[#allocation2 + $0x110] sm:$0xff]  ;;  %v6166_v33 = vpack.c.bf16 %v397_v28, %v396_v27  ;;  %3003 = vst.msk [vmem:[#allocation3 + $0x60] sm:$0xff] %vm2990_vm3, %v5868_v5  ;;  %3004 = vst.msk [vmem:[#allocation3 + $0x80] sm:$0xff] %vm2990_vm3, %v5868_v5 }
  0x32   : > { %v1169_v32 = vld [vmem:[#allocation2 + $0x10f] sm:$0xff]  ;;  %v6168_v34 = vpack.c.bf16 %v399_v30, %v398_v29  ;;  %v4879_v47 = vld [vmem:[%s7265_s1 + $0xc] sm:$0x3]  ;;  %3005 = vst.msk [vmem:[#allocation3 + $0xa0] sm:$0xff] %vm2990_vm3, %v5868_v5  ;;  %3006 = vst.msk [vmem:[#allocation3 + $0xc0] sm:$0xff] %vm2990_vm3, %v5868_v5 }
  0x33   : > { %v6170_v35 = vpack.c.bf16 %v1169_v32, %v1168_v31  ;;  %v400_v36 = vld [vmem:[#allocation2 + $0x128] sm:$0xff]  ;;  %v401_v37 = vld [vmem:[#allocation2 + $0x130] sm:$0xff]  ;;  %v6194_v50 = vand.u32 %v4879_v47, %v5926_v4  ;;  %3007 = vst.msk [vmem:[#allocation3 + $0xe0] sm:$0xff] %vm2990_vm3, %v5868_v5  ;;  %3008 = vst.msk [vmem:[#allocation3 + $0x100] sm:$0xff] %vm2990_vm3, %v5868_v5 }
  0x34   : > { %v402_v38 = vld [vmem:[#allocation2 + $0x148] sm:$0xff]  ;;  %v403_v39 = vld [vmem:[#allocation2 + $0x150] sm:$0xff]  ;;  %v6183_v42 = vpack.c.bf16 %v401_v37, %v400_v36  ;;  %3009 = vst.msk [vmem:[#allocation3 + $0x120] sm:$0xff] %vm2990_vm3, %v5868_v5  ;;  %3010 = vst.msk [vmem:[#allocation3 + $0x140] sm:$0xff] %vm2990_vm3, %v5868_v5 }
  0x35   : > { %5166 = vmatmul.mubr.msk.bf16.gmra.mrb[8].mxu1 %vm226_vm2, %v6141_v18  ;;  %v6186_v44 = vpack.c.bf16 %v403_v39, %v402_v38  ;;  %v404_v48 = vld [vmem:[#allocation2 + $0x168] sm:$0xff]  ;;  %v407_v53 = vld [vmem:[#allocation2 + $0x190] sm:$0xff]  ;;  %3011 = vst.msk [vmem:[#allocation3 + $0x160] sm:$0xff] %vm2990_vm3, %v5868_v5  ;;  %3012 = vst.msk [vmem:[#allocation3 + $0x180] sm:$0xff] %vm2990_vm3, %v5868_v5 }
  0x36   : > { %5169 = vmatprep.mubr.msk.bf16.mxu1 %vm226_vm2, %v6147_v22  ;;  %v406_v51 = vld [vmem:[#allocation2 + $0x188] sm:$0xff]  ;;  %v409_v58 = vld [vmem:[#allocation2 + $0x1b0] sm:$0xff]  ;;  %3013 = vst.msk [vmem:[#allocation3 + $0x1a0] sm:$0xff] %vm2990_vm3, %v5868_v5  ;;  %3014 = vst.msk [vmem:[#allocation3 + $0x1c0] sm:$0xff] %vm2990_vm3, %v5868_v5 }
  0x37   : > { %5268 = vmatmul.mubr.msk.bf16.gmra.mrb[8].mxu0 %vm226_vm2, %v6152_v25  ;;  %v6206_v56 = vpack.c.bf16 %v407_v53, %v406_v51  ;;  %v408_v57 = vld [vmem:[#allocation2 + $0x1a8] sm:$0xff]  ;;  %v411_v59 = vld [vmem:[#allocation2 + $0x1d0] sm:$0xff]  ;;  %3015 = vst.msk [vmem:[#allocation3 + $0x1e0] sm:$0xff] %vm2990_vm3, %v5868_v5  ;;  %3016 = vst.msk [vmem:[#allocation3 + $0x200] sm:$0xff] %vm2990_vm3, %v5868_v5 }
  0x38   : > { %5271 = vmatprep.mubr.msk.bf16.mxu0 %vm226_vm2, %v6156_v26  ;;  %v6216_v61 = vpack.c.bf16 %v409_v58, %v408_v57  ;;  %v412_v2 = vld [vmem:[#allocation2 + $0x1e8] sm:$0xff]  ;;  %v413_v3 = vld [vmem:[#allocation2 + $0x1f0] sm:$0xff]  ;;  %3017 = vst.msk [vmem:[#allocation3 + $0x38] sm:$0xff] %vm2990_vm3, %v5868_v5  ;;  %3018 = vst.msk [vmem:[#allocation3 + $0x58] sm:$0xff] %vm2990_vm3, %v5868_v5 }
  0x39   : > { %v333_v6 = vld [vmem:[#allocation2 + $0x7] sm:$0xff]  ;;  %v334_v7 = vld [vmem:[#allocation2 + $0xf] sm:$0xff]  ;;  %v6228_v9 = vpack.c.bf16 %v413_v3, %v412_v2  ;;  %3019 = vst.msk [vmem:[#allocation3 + $0x78] sm:$0xff] %vm2990_vm3, %v5868_v5  ;;  %3020 = vst.msk [vmem:[#allocation3 + $0x98] sm:$0xff] %vm2990_vm3, %v5868_v5 }
  0x3a   : > { %v365_v10 = vpack.c.bf16 %v334_v7, %v333_v6  ;;  %v1479_v11 = vld [vmem:[#allocation2 + $0x210] sm:$0xff]  ;;  %v351_v16 = vld [vmem:[#allocation2 + $0x127] sm:$0xff]  ;;  %3021 = vst.msk [vmem:[#allocation3 + $0xb8] sm:$0xff] %vm2990_vm3, %v5868_v5  ;;  %3022 = vst.msk [vmem:[#allocation3 + $0xd8] sm:$0xff] %vm2990_vm3, %v5868_v5 }
  0x3b   : > { %v1742_v12 = vld [vmem:[#allocation2 + $0x29] sm:$0xff]  ;;  %v1743_v13 = vld [vmem:[#allocation2 + $0x31] sm:$0xff]  ;;  %3023 = vst.msk [vmem:[#allocation3 + $0xf8] sm:$0xff] %vm2990_vm3, %v5868_v5  ;;  %3024 = vst.msk [vmem:[#allocation3 + $0x118] sm:$0xff] %vm2990_vm3, %v5868_v5 }
  0x3c   : > { %v6264_v15 = vpack.c.bf16 %v1743_v13, %v1742_v12  ;;  %v352_v17 = vld [vmem:[#allocation2 + $0x12f] sm:$0xff]  ;;  %v353_v19 = vld [vmem:[#allocation2 + $0x147] sm:$0xff]  ;;  %3025 = vst.msk [vmem:[#allocation3 + $0x138] sm:$0xff] %vm2990_vm3, %v5868_v5  ;;  %3026 = vst.msk [vmem:[#allocation3 + $0x158] sm:$0xff] %vm2990_vm3, %v5868_v5 }
  0x3d   : > { %5170 = vmatmul.mubr.msk.bf16.gmra.mrb[12].mxu1 %vm226_vm2, %v6166_v33  ;;  %v354_v20 = vld [vmem:[#allocation2 + $0x14f] sm:$0xff]  ;;  %v6274_v24 = vpack.c.bf16 %v352_v17, %v351_v16  ;;  %v355_v37 = vld [vmem:[#allocation2 + $0x167] sm:$0xff]  ;;  %3027 = vst.msk [vmem:[#allocation3 + $0x178] sm:$0xff] %vm2990_vm3, %v5868_v5  ;;  %3028 = vst.msk [vmem:[#allocation3 + $0x198] sm:$0xff] %vm2990_vm3, %v5868_v5 }
  0x3e   : > { %5173 = vmatprep.mubr.msk.bf16.mxu1 %vm226_vm2, %v6168_v34  ;;  %v1744_v21 = vld [vmem:[#allocation2 + $0x49] sm:$0xff]  ;;  %v1745_v23 = vld [vmem:[#allocation2 + $0x51] sm:$0xff]  ;;  %v6276_v29 = vpack.c.bf16 %v354_v20, %v353_v19  ;;  %3029 = vst.msk [vmem:[#allocation3 + $0x1b8] sm:$0xff] %vm2990_vm3, %v5868_v5  ;;  %3030 = vst.msk [vmem:[#allocation3 + $0x1d8] sm:$0xff] %vm2990_vm3, %v5868_v5 }
  0x3f   : > { %5272 = vmatmul.mubr.msk.bf16.gmra.mrb[12].mxu0 %vm226_vm2, %v6170_v35  ;;  %v1746_v27 = vld [vmem:[#allocation2 + $0x69] sm:$0xff]  ;;  %v1747_v28 = vld [vmem:[#allocation2 + $0x71] sm:$0xff]  ;;  %v6281_v31 = vpack.c.bf16 %v1745_v23, %v1744_v21  ;;  %3031 = vst.msk [vmem:[#allocation3 + $0x1f8] sm:$0xff] %vm2990_vm3, %v5868_v5  ;;  %3032 = vst.msk [vmem:[#allocation3 + $0x218] sm:$0xff] %vm2990_vm3, %v5868_v5 }
  0x40   : > { %5293 = vmatprep.mubr.msk.bf16.mxu0 %vm226_vm2, %v6088_v41  ;;  %v405_v41 = vld [vmem:[#allocation2 + $0x170] sm:$0xff]  ;;  %v4896_v30 = vld [vmem:[%s7265_s1 + $0xe] sm:$0x3]  ;;  %v6283_v32 = vpack.c.bf16 %v1747_v28, %v1746_v27  ;;  %v5850_v5 = vld [vmem:[%s7267_s3 + $0x40] sm:$0xff]  }
  0x41   : > { %v6203_v54 = vpack.c.bf16 %v405_v41, %v404_v48  ;;  %v6288_v36 = vand.u32 %v4896_v30, %v5926_v4  ;;  %v356_v38 = vld [vmem:[#allocation2 + $0x16f] sm:$0xff]  ;;  %v357_v39 = vld [vmem:[#allocation2 + $0x187] sm:$0xff] }
  0x42   : > { %v358_v40 = vld [vmem:[#allocation2 + $0x18f] sm:$0xff]  ;;  %v6297_v48 = vpack.c.bf16 %v356_v38, %v355_v37  ;;  %v363_v16 = vld [vmem:[#allocation2 + $0x1e7] sm:$0xff] }
  0x43   : > { %v1749_v47 = vld [vmem:[#allocation2 + $0x91] sm:$0xff]  ;;  %v1750_v41 = vld [vmem:[#allocation2 + $0xa9] sm:$0xff]  ;;  %v6300_v53 = vpack.c.bf16 %v358_v40, %v357_v39 }
  0x44   : > { %v1751_v51 = vld [vmem:[#allocation2 + $0xb1] sm:$0xff]  ;;  %v1752_v3 = vld [vmem:[#allocation2 + $0xc9] sm:$0xff] }
  0x45   : > { %5174 = vmatmul.mubr.msk.bf16.gmra.mrb[16].mxu1 %vm226_vm2, %v6183_v42  ;;  %v6304_v58 = vpack.c.bf16 %v1751_v51, %v1750_v41  ;;  %v362_v2 = vld [vmem:[#allocation2 + $0x1cf] sm:$0xff] }
  0x46   : > { %5177 = vmatprep.mubr.msk.bf16.mxu1 %vm226_vm2, %v6186_v44  ;;  %v1753_v6 = vld [vmem:[#allocation2 + $0xd1] sm:$0xff]  ;;  %v860_v19 = vld [vmem:[#allocation2 + $0x9] sm:$0xff] }
  0x47   : > { %5294 = vmatmul.mubr.msk.bf16.vlgmr.msra.gmra.mrb[0].mxu0 %vm226_vm2, %v6096_v49  ;;  %v6318_v12 = vpack.c.bf16 %v1753_v6, %v1752_v3  ;;  %v364_v17 = vld [vmem:[#allocation2 + $0x1ef] sm:$0xff] }
  0x48   : > { %5326 = vmatpush3.bf16.msra.mxu0 %v6099_v52  ;;  %5297 = vmatprep.mubr.msk.bf16.mxu0 %vm226_vm2, %v6113_v60  ;;  %v410_v52 = vld [vmem:[#allocation2 + $0x1c8] sm:$0xff]  ;;  %v861_v20 = vld [vmem:[#allocation2 + $0x11] sm:$0xff]  ;;  %v6330_v27 = vpack.c.bf16 %v364_v17, %v363_v16 }
  0x49   : > { %5359 = vmatprep.subr.bf16.mxu0 %v6194_v50  ;;  %v6218_v62 = vpack.c.bf16 %v411_v59, %v410_v52  ;;  %v360_v52 = vld [vmem:[#allocation2 + $0x1af] sm:$0xff]  ;;  %v361_v59 = vld [vmem:[#allocation2 + $0x1c7] sm:$0xff]  ;;  %v892_v37 = vpack.c.bf16 %v861_v20, %v860_v19 }
  0x4a   : > { %v1756_v21 = vld [vmem:[#allocation2 + $0x109] sm:$0xff]  ;;  %v1757_v23 = vld [vmem:[#allocation2 + $0x111] sm:$0xff] }
  0x4b   : > { %v1758_v28 = vld [vmem:[#allocation2 + $0x129] sm:$0xff]  ;;  %v1759_v30 = vld [vmem:[#allocation2 + $0x131] sm:$0xff]  ;;  %v6332_v38 = vpack.c.bf16 %v1757_v23, %v1756_v21 }
  0x4c   : > { %v6334_v39 = vpack.c.bf16 %v1759_v30, %v1758_v28  ;;  %v1760_v40 = vld [vmem:[#allocation2 + $0x149] sm:$0xff]  ;;  %v1763_v41 = vld [vmem:[#allocation2 + $0x171] sm:$0xff] }
  0x4d   : > { %5178 = vmatmul.mubr.msk.bf16.gmra.mrb[20].mxu1 %vm226_vm2, %v6203_v54  ;;  %v1767_v3 = vld [vmem:[#allocation2 + $0x1b1] sm:$0xff]  ;;  %v1772_v20 = vld [vmem:[#allocation2 + $0x209] sm:$0xff] }
  0x4e   : > { %5181 = vmatprep.mubr.msk.bf16.mxu1 %vm226_vm2, %v6206_v56  ;;  %v1771_v16 = vld [vmem:[#allocation2 + $0x1f1] sm:$0xff] }
  0x4f   : > { %5298 = vmatmul.mubr.msk.bf16.gmra.mrb[4].mxu0 %vm226_vm2, %v6116_v63  ;;  %v1773_v21 = vld [vmem:[#allocation2 + $0x211] sm:$0xff] }
  0x50   : > { %5301 = vmatprep.mubr.msk.bf16.mxu0 %vm226_vm2, %v6141_v18  ;;  %v6380_v23 = vpack.c.bf16 %v1773_v21, %v1772_v20  ;;  %v4913_v28 = vld [vmem:[%s7265_s1 + $0x10] sm:$0x3] }
  0x51   : > { %v2724_v30 = vand.u32 %v4913_v28, %v5926_v4  ;;  %v1184_v4 = vld [vmem:[#allocation2 + $0x207] sm:$0xff] }
  0x55   : > { %5182 = vmatmul.mubr.msk.bf16.gmra.mrb[24].mxu1 %vm226_vm2, %v6216_v61 }
  0x56   : > { %5185 = vmatprep.mubr.msk.bf16.mxu1 %vm226_vm2, %v6218_v62 }
  0x57   : > { %5302 = vmatmul.mubr.msk.bf16.gmra.mrb[8].mxu0 %vm226_vm2, %v6147_v22 }
  0x58   : > { %5305 = vmatprep.mubr.msk.bf16.mxu0 %vm226_vm2, %v6166_v33 }
  0x5d   : > { %5186 = vmatmul.mubr.msk.bf16.gmra.mrb[28].mxu1 %vm226_vm2, %v6228_v9 }
  0x5e   : > { %5191 = vmatprep.mubr.msk.bf16.mxu1 %vm226_vm2, %v365_v10  ;;  %v1754_v10 = vld [vmem:[#allocation2 + $0xe9] sm:$0xff] }
  0x5f   : > { %5306 = vmatmul.mubr.msk.bf16.gmra.mrb[12].mxu0 %vm226_vm2, %v6168_v34 }
  0x60   : > { %5309 = vmatprep.mubr.msk.bf16.mxu0 %vm226_vm2, %v6183_v42 }
  0x65   : > { %5192 = vmatmul.mubr.msk.bf16.vlgmr.msra.gmra.mrb[0].mxu1 %vm226_vm2, %v6090_v45  ;;  %v1478_v45 = vld [vmem:[#allocation2 + $0x208] sm:$0xff] }
  0x66   : > { %5195 = vmatprep.mubr.msk.bf16.mxu1 %vm226_vm2, %v6092_v46  ;;  %5224 = vmatpush3.bf16.msra.mxu1 %v959_v43  ;;  %v6262_v14 = vpack.c.bf16 %v1479_v11, %v1478_v45  ;;  %v1748_v43 = vld [vmem:[#allocation2 + $0x89] sm:$0xff]  ;;  %v1755_v45 = vld [vmem:[#allocation2 + $0xf1] sm:$0xff]  ;;  %v6316_v11 = vpack.c.bf16 %v362_v2, %v361_v59 }
  0x67   : > { %5310 = vmatmul.mubr.msk.bf16.gmra.mrb[16].mxu0 %vm226_vm2, %v6186_v44  ;;  %5543 = vmatprep.subr.bf16.mxu1 %v6013_v8  ;;  %v6302_v57 = vpack.c.bf16 %v1749_v47, %v1748_v43  ;;  %v6320_v13 = vpack.c.bf16 %v1755_v45, %v1754_v10  ;;  %v1761_v43 = vld [vmem:[#allocation2 + $0x151] sm:$0xff]  ;;  %v1762_v47 = vld [vmem:[#allocation2 + $0x169] sm:$0xff] }
  0x68   : > { %5313 = vmatprep.mubr.msk.bf16.mxu0 %vm226_vm2, %v6203_v54  ;;  %v6343_v51 = vpack.c.bf16 %v1761_v43, %v1760_v40  ;;  %v1765_v59 = vld [vmem:[#allocation2 + $0x191] sm:$0xff]  ;;  %v1766_v2 = vld [vmem:[#allocation2 + $0x1a9] sm:$0xff] }
  0x69   : > { %v6358_v10 = vpack.c.bf16 %v1767_v3, %v1766_v2  ;;  %v1770_v45 = vld [vmem:[#allocation2 + $0x1e9] sm:$0xff] }
  0x6a   : > { %v6370_v19 = vpack.c.bf16 %v1771_v16, %v1770_v45 }
  0x6d   : > { %5196 = vmatmul.mubr.msk.bf16.gmra.mrb[4].mxu1 %vm226_vm2, %v6103_v55 }
  0x6e   : > { %5199 = vmatprep.mubr.msk.bf16.mxu1 %vm226_vm2, %v6118_v0 }
  0x6f   : > { %5314 = vmatmul.mubr.msk.bf16.gmra.mrb[20].mxu0 %vm226_vm2, %v6206_v56 }
  0x70   : > { %5317 = vmatprep.mubr.msk.bf16.mxu0 %vm226_vm2, %v6216_v61 }
  0x75   : > { %5200 = vmatmul.mubr.msk.bf16.gmra.mrb[8].mxu1 %vm226_vm2, %v6120_v1 }
  0x76   : > { %5203 = vmatprep.mubr.msk.bf16.mxu1 %vm226_vm2, %v6152_v25 }
  0x77   : > { %5318 = vmatmul.mubr.msk.bf16.gmra.mrb[24].mxu0 %vm226_vm2, %v6218_v62 }
  0x78   : > { %5321 = vmatprep.mubr.msk.bf16.mxu0 %vm226_vm2, %v6228_v9 }
  0x7d   : > { %5204 = vmatmul.mubr.msk.bf16.gmra.mrb[12].mxu1 %vm226_vm2, %v6156_v26 }
  0x7e   : > { %5207 = vmatprep.mubr.msk.bf16.mxu1 %vm226_vm2, %v6170_v35 }
  0x7f   : > { %5322 = vmatmul.mubr.msk.bf16.gmra.mrb[28].mxu0 %vm226_vm2, %v6262_v14 }
  0x80   : > { %5327 = vmatprep.mubr.msk.bf16.mxu0 %vm226_vm2, %v6264_v15 }
  0x85   : > { %5208 = vmatmul.mubr.msk.bf16.gmra.mrb[16].mxu1 %vm226_vm2, %v6274_v24 }
  0x86   : > { %5211 = vmatprep.mubr.msk.bf16.mxu1 %vm226_vm2, %v6276_v29 }
  0x87   : > { %5328 = vmatmul.mubr.msk.bf16.vlgmr.msra.gmra.mrb[0].mxu0 %vm226_vm2, %v6281_v31 }
  0x88   : > { %5360 = vmatpush3.bf16.msra.mxu0 %v6194_v50  ;;  %5331 = vmatprep.mubr.msk.bf16.mxu0 %vm226_vm2, %v6283_v32  ;;  %v359_v50 = vld [vmem:[#allocation2 + $0x1a7] sm:$0xff] }
  0x89   : > { %5393 = vmatprep.subr.bf16.mxu0 %v6288_v36  ;;  %v6314_v7 = vpack.c.bf16 %v360_v52, %v359_v50  ;;  %v6345_v50 = vpack.c.bf16 %v1763_v41, %v1762_v47  ;;  %v1764_v52 = vld [vmem:[#allocation2 + $0x189] sm:$0xff] }
  0x8a   : > { %v6356_v6 = vpack.c.bf16 %v1765_v59, %v1764_v52 }
  0x8d   : > { %5212 = vmatmul.mubr.msk.bf16.gmra.mrb[20].mxu1 %vm226_vm2, %v6297_v48 }
  0x8e   : > { %5215 = vmatprep.mubr.msk.bf16.mxu1 %vm226_vm2, %v6300_v53 }
  0x8f   : > { %5332 = vmatmul.mubr.msk.bf16.gmra.mrb[4].mxu0 %vm226_vm2, %v6302_v57 }
  0x90   : > { %5335 = vmatprep.mubr.msk.bf16.mxu0 %vm226_vm2, %v6304_v58 }
  0x95   : > { %5216 = vmatmul.mubr.msk.bf16.gmra.mrb[24].mxu1 %vm226_vm2, %v6314_v7 }
  0x96   : > { %5219 = vmatprep.mubr.msk.bf16.mxu1 %vm226_vm2, %v6316_v11 }
  0x97   : > { %5336 = vmatmul.mubr.msk.bf16.gmra.mrb[8].mxu0 %vm226_vm2, %v6318_v12 }
  0x98   : > { %5339 = vmatprep.mubr.msk.bf16.mxu0 %vm226_vm2, %v6320_v13 }
  0x9d   : > { %5220 = vmatmul.mubr.msk.bf16.gmra.mrb[28].mxu1 %vm226_vm2, %v6330_v27 }
  0x9e   : > { %5225 = vmatprep.mubr.msk.bf16.mxu1 %vm226_vm2, %v892_v37 }
  0x9f   : > { %5340 = vmatmul.mubr.msk.bf16.gmra.mrb[12].mxu0 %vm226_vm2, %v6332_v38 }
  0xa0   : > { %5343 = vmatprep.mubr.msk.bf16.mxu0 %vm226_vm2, %v6334_v39 }
  0xa5   : > { %5226 = vmatmul.mubr.msk.bf16.vlgmr.msra.gmra.mrb[0].mxu1 %vm226_vm2, %v6264_v15  ;;  %v1769_v15 = vld [vmem:[#allocation2 + $0x1d1] sm:$0xff] }
  0xa6   : > { %5229 = vmatprep.mubr.msk.bf16.mxu1 %vm226_vm2, %v6281_v31  ;;  %5544 = vmatpush3.bf16.msra.mxu1 %v6013_v8  ;;  %v1768_v8 = vld [vmem:[#allocation2 + $0x1c9] sm:$0xff] }
  0xa7   : > { %5344 = vmatmul.mubr.msk.bf16.gmra.mrb[16].mxu0 %vm226_vm2, %v6343_v51  ;;  %v6368_v17 = vpack.c.bf16 %v1769_v15, %v1768_v8  ;;  %5461 = vmatprep.subr.bf16.mxu1 %v5850_v5  ;;  %v3065_v8 = vld [vmem:[#allocation3 + $0x7] sm:$0xff]  ;;  %v3066_v15 = vld [vmem:[#allocation3 + $0xf] sm:$0xff] }
  0xa8   : > { %5347 = vmatprep.mubr.msk.bf16.mxu0 %vm226_vm2, %v6345_v50 }
  0xad   : > { %5230 = vmatmul.mubr.msk.bf16.gmra.mrb[4].mxu1 %vm226_vm2, %v6283_v32 }
  0xae   : > { %5233 = vmatprep.mubr.msk.bf16.mxu1 %vm226_vm2, %v6302_v57 }
  0xaf   : > { %5348 = vmatmul.mubr.msk.bf16.gmra.mrb[20].mxu0 %vm226_vm2, %v6356_v6 }
  0xb0   : > { %5351 = vmatprep.mubr.msk.bf16.mxu0 %vm226_vm2, %v6358_v10 }
  0xb5   : > { %5234 = vmatmul.mubr.msk.bf16.gmra.mrb[8].mxu1 %vm226_vm2, %v6304_v58 }
  0xb6   : > { %5237 = vmatprep.mubr.msk.bf16.mxu1 %vm226_vm2, %v6318_v12 }
  0xb7   : > { %5352 = vmatmul.mubr.msk.bf16.gmra.mrb[24].mxu0 %vm226_vm2, %v6368_v17 }
  0xb8   : > { %5355 = vmatprep.mubr.msk.bf16.mxu0 %vm226_vm2, %v6370_v19 }
  0xbd   : > { %5238 = vmatmul.mubr.msk.bf16.gmra.mrb[12].mxu1 %vm226_vm2, %v6320_v13 }
  0xbe   : > { %5241 = vmatprep.mubr.msk.bf16.mxu1 %vm226_vm2, %v6332_v38 }
  0xbf   : > { %5356 = vmatmul.mubr.msk.bf16.gmra.mrb[28].mxu0 %vm226_vm2, %v6380_v23 }
  0xc0   : > { %5361 = vmatprep.mubr.msk.bf16.mxu0 %vm226_vm2, %v6092_v46  ;;  %v1185_v46 = vld [vmem:[#allocation2 + $0x20f] sm:$0xff] }
  0xc5   : > { %5242 = vmatmul.mubr.msk.bf16.gmra.mrb[16].mxu1 %vm226_vm2, %v6334_v39 }
  0xc6   : > { %5245 = vmatprep.mubr.msk.bf16.mxu1 %vm226_vm2, %v6343_v51 }
  0xc7   : > { %5362 = vmatmul.mubr.msk.bf16.vlgmr.msra.gmra.mrb[0].mxu0 %vm226_vm2, %v6103_v55  ;;  %v1201_v55 = vpack.c.bf16 %v1185_v46, %v1184_v4 }
  0xc8   : > { %5394 = vmatpush3.bf16.msra.mxu0 %v6288_v36  ;;  %5365 = vmatprep.mubr.msk.bf16.mxu0 %vm226_vm2, %v6118_v0  ;;  %v2067_v0 = vld [vmem:[#allocation2 + $0x227] sm:$0xff] }
  0xc9   : > { %5427 = vmatprep.subr.bf16.mxu0 %v2724_v30 }
  0xcd   : > { %5246 = vmatmul.mubr.msk.bf16.gmra.mrb[20].mxu1 %vm226_vm2, %v6345_v50 }
  0xce   : > { %5249 = vmatprep.mubr.msk.bf16.mxu1 %vm226_vm2, %v6356_v6 }
  0xcf   : > { %5366 = vmatmul.mubr.msk.bf16.gmra.mrb[4].mxu0 %vm226_vm2, %v6120_v1  ;;  %v2068_v1 = vld [vmem:[#allocation2 + $0x22f] sm:$0xff] }
  0xd0   : > { %5369 = vmatprep.mubr.msk.bf16.mxu0 %vm226_vm2, %v6152_v25  ;;  %v2084_v25 = vpack.c.bf16 %v2068_v1, %v2067_v0 }
  0xd5   : > { %5250 = vmatmul.mubr.msk.bf16.gmra.mrb[24].mxu1 %vm226_vm2, %v6358_v10 }
  0xd6   : > { %5253 = vmatprep.mubr.msk.bf16.mxu1 %vm226_vm2, %v6368_v17 }
  0xd7   : > { %5370 = vmatmul.mubr.msk.bf16.gmra.mrb[8].mxu0 %vm226_vm2, %v6156_v26 }
  0xd8   : > { %5373 = vmatprep.mubr.msk.bf16.mxu0 %vm226_vm2, %v6170_v35 }
  0xdd   : > { %5254 = vmatmul.mubr.msk.bf16.gmra.mrb[28].mxu1 %vm226_vm2, %v6370_v19 }
  0xde   : > { %5275 = vmatprep.mubr.msk.bf16.mxu1 %vm226_vm2, %v6274_v24 }
  0xdf   : > { %5374 = vmatmul.mubr.msk.bf16.gmra.mrb[12].mxu0 %vm226_vm2, %v6274_v24 }
  0xe0   : > { %5377 = vmatprep.mubr.msk.bf16.mxu0 %vm226_vm2, %v6276_v29 }
  0xe5   : > { %5276 = vmatmul.mubr.msk.bf16.vlgmr.msra.gmra.mrb[16].mxu1 %vm226_vm2, %v6276_v29 }
  0xe6   : > { %5279 = vmatprep.mubr.msk.bf16.mxu1 %vm226_vm2, %v6297_v48  ;;  %5462 = vmatpush3.bf16.msra.mxu1 %v5850_v5 }
  0xe7   : > { %5378 = vmatmul.mubr.msk.bf16.gmra.mrb[16].mxu0 %vm226_vm2, %v6297_v48  ;;  %v3258_v48 = vld [vmem:[#allocation3 + $0x9] sm:$0xff] }
  0xe8   : > { %5381 = vmatprep.mubr.msk.bf16.mxu0 %vm226_vm2, %v6300_v53 }
  0xed   : > { %5280 = vmatmul.mubr.msk.bf16.gmra.mrb[20].mxu1 %vm226_vm2, %v6300_v53  ;;  %v3259_v53 = vld [vmem:[#allocation3 + $0x11] sm:$0xff] }
  0xee   : > { %5283 = vmatprep.mubr.msk.bf16.mxu1 %vm226_vm2, %v6314_v7 }
  0xef   : > { %5382 = vmatmul.mubr.msk.bf16.gmra.mrb[20].mxu0 %vm226_vm2, %v6314_v7  ;;  %v3130_v7 = vld [vmem:[#allocation3 + $0x10] sm:$0xff] }
  0xf0   : > { %5385 = vmatprep.mubr.msk.bf16.mxu0 %vm226_vm2, %v6316_v11 }
  0xf5   : > { %5284 = vmatmul.mubr.msk.bf16.gmra.mrb[24].mxu1 %vm226_vm2, %v6316_v11 }
  0xf6   : > { %5287 = vmatprep.mubr.msk.bf16.mxu1 %vm226_vm2, %v6330_v27 }
  0xf7   : > { %5386 = vmatmul.mubr.msk.bf16.gmra.mrb[24].mxu0 %vm226_vm2, %v6330_v27 }
  0xf8   : > { %5389 = vmatprep.mubr.msk.bf16.mxu0 %vm226_vm2, %v1201_v55 }
  0xfd   : > { %5288 = vmatmul.mubr.msk.bf16.gmra.mrb[28].mxu1 %vm226_vm2, %v1201_v55 }
  0xff   : > { %5390 = vmatmul.mubr.msk.bf16.gmra.mrb[28].mxu0 %vm226_vm2, %v2084_v25 }
 0x100   : > { %5395 = vmatprep.mubr.msk.bf16.mxu0 %vm226_vm2, %v6096_v49  ;;  %v2361_v49 = vld [vmem:[#allocation2 + $0x228] sm:$0xff] }
 0x107   : > { %5396 = vmatmul.mubr.msk.bf16.vlgmr.msra.gmra.mrb[0].mxu0 %vm226_vm2, %v6113_v60  ;;  %v2362_v60 = vld [vmem:[#allocation2 + $0x230] sm:$0xff] }
 0x108   : > { %5428 = vmatpush3.bf16.msra.mxu0 %v2724_v30  ;;  %5399 = vmatprep.mubr.msk.bf16.mxu0 %vm226_vm2, %v6116_v63  ;;  %v2378_v63 = vpack.c.bf16 %v2362_v60, %v2361_v49 }
 0x10f   : > { %5400 = vmatmul.mubr.msk.bf16.gmra.mrb[4].mxu0 %vm226_vm2, %v6141_v18  ;;  %v2655_v18 = vld [vmem:[#allocation2 + $0x229] sm:$0xff] }
 0x110   : > { %5403 = vmatprep.mubr.msk.bf16.mxu0 %vm226_vm2, %v6147_v22  ;;  %v2656_v22 = vld [vmem:[#allocation2 + $0x231] sm:$0xff] }
 0x111   : > { %v2672_v35 = vpack.c.bf16 %v2656_v22, %v2655_v18 }
 0x117   : > { %5404 = vmatmul.mubr.msk.bf16.gmra.mrb[8].mxu0 %vm226_vm2, %v6166_v33 }
 0x118   : > { %5407 = vmatprep.mubr.msk.bf16.mxu0 %vm226_vm2, %v6168_v34 }
 0x11f   : > { %5408 = vmatmul.mubr.msk.bf16.gmra.mrb[12].mxu0 %vm226_vm2, %v6183_v42 }
 0x120   : > { %5411 = vmatprep.mubr.msk.bf16.mxu0 %vm226_vm2, %v6186_v44 }
 0x127   : > { %5412 = vmatmul.mubr.msk.bf16.gmra.mrb[16].mxu0 %vm226_vm2, %v6203_v54 }
 0x128   : > { %5415 = vmatprep.mubr.msk.bf16.mxu0 %vm226_vm2, %v6206_v56 }
 0x12f   : > { %5416 = vmatmul.mubr.msk.bf16.gmra.mrb[20].mxu0 %vm226_vm2, %v6216_v61 }
 0x130   : > { %5419 = vmatprep.mubr.msk.bf16.mxu0 %vm226_vm2, %v6218_v62 }
 0x137   : > { %5420 = vmatmul.mubr.msk.bf16.gmra.mrb[24].mxu0 %vm226_vm2, %v6228_v9 }
 0x138   : > { %5423 = vmatprep.mubr.msk.bf16.mxu0 %vm226_vm2, %v6262_v14 }
 0x13f   : > { %5424 = vmatmul.mubr.msk.bf16.gmra.mrb[28].mxu0 %vm226_vm2, %v2378_v63 }
 0x140   : > { %5429 = vmatprep.mubr.msk.bf16.mxu0 %vm226_vm2, %v6281_v31 }
 0x147   : > { %5430 = vmatmul.mubr.msk.bf16.vlgmr.msra.gmra.mrb[0].mxu0 %vm226_vm2, %v6283_v32 }
 0x148   : > { %5433 = vmatprep.mubr.msk.bf16.mxu0 %vm226_vm2, %v6302_v57  ;;  %v3129_v57 = vld [vmem:[#allocation3 + $0x8] sm:$0xff] }
 0x149   : > { %v3161_v11 = vpack.c.bf16 %v3130_v7, %v3129_v57 }
 0x14b   : > { %3193 = vrot.lane.b32.xlu0 %v3161_v11, %s5870_s21 }
 0x14f   : > { %5434 = vmatmul.mubr.msk.bf16.gmra.mrb[4].mxu0 %vm226_vm2, %v6304_v58  ;;  %v3290_v58 = vpack.c.bf16 %v3259_v53, %v3258_v48 }
 0x150   : > { %5437 = vmatprep.mubr.msk.bf16.mxu0 %vm226_vm2, %v6318_v12 }
 0x151   : > { %3322 = vrot.lane.b32.xlu1 %v3290_v58, %s5869_s20 }
 0x157   : > { %5438 = vmatmul.mubr.msk.bf16.gmra.mrb[8].mxu0 %vm226_vm2, %v6320_v13 }
 0x158   : > { %5441 = vmatprep.mubr.msk.bf16.mxu0 %vm226_vm2, %v6332_v38 }
 0x15f   : > { %5442 = vmatmul.mubr.msk.bf16.gmra.mrb[12].mxu0 %vm226_vm2, %v6334_v39 }
 0x160   : > { %5445 = vmatprep.mubr.msk.bf16.mxu0 %vm226_vm2, %v6343_v51 }
 0x167   : > { %5446 = vmatmul.mubr.msk.bf16.gmra.mrb[16].mxu0 %vm226_vm2, %v6345_v50 }
 0x168   : > { %5449 = vmatprep.mubr.msk.bf16.mxu0 %vm226_vm2, %v6356_v6 }
 0x16f   : > { %5450 = vmatmul.mubr.msk.bf16.gmra.mrb[20].mxu0 %vm226_vm2, %v6358_v10  ;;  %v6666_v10 = vld [vmem:[%s7266_s2] ss:$0 sm:$0xff] }
 0x170   : > { %5453 = vmatprep.mubr.msk.bf16.mxu0 %vm226_vm2, %v6368_v17 }
 0x177   : > { %5454 = vmatmul.mubr.msk.bf16.gmra.mrb[24].mxu0 %vm226_vm2, %v6370_v19  ;;  %v3097_v19 = vpack.c.bf16 %v3066_v15, %v3065_v8 }
 0x178   : > { %5457 = vmatprep.mubr.msk.bf16.mxu0 %vm226_vm2, %v6380_v23  ;;  %v6513_v26 = vpop.f32.mrb[0].mxu1 }
 0x179   : > { %v6515_v33 = vpop.f32.mrb[1].mxu1  ;;  %3113 = vst.msk [vmem:[#allocation4] sm:$0xff] %vm2990_vm3, %v3097_v19 }
 0x17a   : > { %v6517_v34 = vpop.f32.mrb[2].mxu1 }
 0x17b   : > { %v6519_v42 = vpop.f32.mrb[3].mxu1 }
 0x17f   : > { %5458 = vmatmul.mubr.msk.bf16.gmra.mrb[28].mxu0 %vm226_vm2, %v2672_v35 }
 0x180   : > { %v6522_v44 = vpop.f32.mrb[4].mxu1 }
 0x181   : > { %v6524_v54 = vpop.f32.mrb[5].mxu1 }
 0x182   : > { %v6526_v56 = vpop.f32.mrb[6].mxu1 }
 0x183   : > { %v6528_v61 = vpop.f32.mrb[7].mxu1 }
 0x188   : > { %v6530_v62 = vpop.f32.mrb[8].mxu1 }
 0x189   : > { %v6532_v9 = vpop.f32.mrb[9].mxu1 }
 0x18a   : > { %v6534_v14 = vpop.f32.mrb[10].mxu1 }
 0x18b   : > { %v6536_v24 = vpop.f32.mrb[11].mxu1 }
 0x190   : > { %v6538_v29 = vpop.f32.mrb[12].mxu1 }
 0x191   : > { %v6540_v31 = vpop.f32.mrb[13].mxu1 }
 0x192   : > { %v6542_v32 = vpop.f32.mrb[14].mxu1 }
 0x193   : > { %v6544_v36 = vpop.f32.mrb[15].mxu1 }
 0x1b8   : > { %v6628_v12 = vpop.f32.mrb[16].mxu1 }
 0x1b9   : > { %v6630_v13 = vpop.f32.mrb[17].mxu1 }
 0x1ba   : > { %v6635_v27 = vpop.f32.mrb[18].mxu1 }
 0x1bb   : > { %v6637_v37 = vpop.f32.mrb[19].mxu1 }
 0x1bd   : > { %v3194_v23 = vpop.permute.xlu0 %3193 }
 0x1be   : > { %3242 = vst.msk [vmem:[#allocation4] sm:$0xff] %vm3241_vm4, %v3194_v23 }
 0x1c0   : > { %v6639_v38 = vpop.f32.mrb[20].mxu1 }
 0x1c1   : > { %v6641_v39 = vpop.f32.mrb[21].mxu1 }
 0x1c2   : > { %v6643_v40 = vpop.f32.mrb[22].mxu1 }
 0x1c3   : > { %v6645_v43 = vpop.f32.mrb[23].mxu1  ;;  %v3323_v17 = vpop.permute.xlu1 %3322 }
 0x1c4   : > { %3371 = vst.msk [vmem:[#allocation4] sm:$0xff] %vm3370_vm5, %v3323_v17 }
 0x1c8   : > { %v6647_v47 = vpop.f32.mrb[24].mxu1 }
 0x1c9   : > { %v6649_v41 = vpop.f32.mrb[25].mxu1 }
 0x1ca   : > { %v6651_v51 = vpop.f32.mrb[26].mxu1 }
 0x1cb   : > { %v6653_v50 = vpop.f32.mrb[27].mxu1 }
 0x1d0   : > { %v6655_v52 = vpop.f32.mrb[28].mxu1 }
 0x1d1   : > { %v6657_v59 = vpop.f32.mrb[29].mxu1 }
 0x1d2   : > { %v6659_v2 = vpop.f32.mrb[30].mxu1 }
 0x1d3   : > { %v6661_v3 = vpop.f32.mrb[31].mxu1 }
 0x21a   : > { %v5431_v6 = vpop.f32.mrb[0].mxu0 }
 0x21b   : > { %v5545_v45 = vadd.f32 %v5431_v6, %v6513_v26  ;;  %v2760_v16 = vpop.f32.mrb[1].mxu0 }
 0x21c   : > { %v5546_v20 = vadd.f32 %v2760_v16, %v6515_v33  ;;  %v5432_v21 = vpop.f32.mrb[2].mxu0 }
 0x21d   : > { %v2928_v28 = vadd.f32 %v5545_v45, %v6666_v10  ;;  %v5547_v30 = vadd.f32 %v5432_v21, %v6517_v34  ;;  %v2763_v4 = vpop.f32.mrb[3].mxu0 }
 0x21e   : > { %v2926_v46 = vadd.f32 %v5546_v20, %v6666_v10  ;;  %v5548_v55 = vadd.f32 %v2763_v4, %v6519_v42 }
 0x21f   : > { %v2960_v0 = vmax.f32 %v2928_v28, 0.0  ;;  %v2929_v1 = vadd.f32 %v5547_v30, %v6666_v10 }
 0x220   : > { %v2958_v25 = vmax.f32 %v2926_v46, 0.0  ;;  %v2927_v49 = vadd.f32 %v5548_v55, %v6666_v10 }
 0x221   : > { %3035 = vst.msk [vmem:[#allocation3 + $0x48] sm:$0xff] %vm2990_vm3, %v2960_v0  ;;  %v2961_v60 = vmax.f32 %v2929_v1, 0.0 }
 0x222   : > { %3033 = vst.msk [vmem:[#allocation3 + $0x28] sm:$0xff] %vm2990_vm3, %v2958_v25  ;;  %v2959_v63 = vmax.f32 %v2927_v49, 0.0  ;;  %v5435_v18 = vpop.f32.mrb[4].mxu0 }
 0x223   : > { %3036 = vst.msk [vmem:[#allocation3 + $0x50] sm:$0xff] %vm2990_vm3, %v2961_v60  ;;  %v5549_v22 = vadd.f32 %v5435_v18, %v6522_v44  ;;  %v2776_v26 = vpop.f32.mrb[5].mxu0 }
 0x224   : > { %3034 = vst.msk [vmem:[#allocation3 + $0x30] sm:$0xff] %vm2990_vm3, %v2959_v63  ;;  %v5550_v33 = vadd.f32 %v2776_v26, %v6524_v54  ;;  %v5436_v34 = vpop.f32.mrb[6].mxu0  ;;  %v6694_v54 = vld [vmem:[%s7267_s3] sm:$0xff]  }
 0x225   : > { %v2932_v35 = vadd.f32 %v5549_v22, %v6666_v10  ;;  %v5551_v42 = vadd.f32 %v5436_v34, %v6526_v56  ;;  %v2779_v48 = vpop.f32.mrb[7].mxu0  ;;  %5495 = vmatprep.subr.bf16.mxu1 %v6694_v54 }
 0x226   : > { %v2930_v53 = vadd.f32 %v5550_v33, %v6666_v10  ;;  %v5552_v57 = vadd.f32 %v2779_v48, %v6528_v61 }
 0x227   : > { %v2964_v58 = vmax.f32 %v2932_v35, 0.0  ;;  %v2933_v7 = vadd.f32 %v5551_v42, %v6666_v10 }
 0x228   : > { %v2962_v11 = vmax.f32 %v2930_v53, 0.0  ;;  %v2931_v44 = vadd.f32 %v5552_v57, %v6666_v10  ;;  %v3775_v56 = vld [vmem:[#allocation3 + $0x47] sm:$0xff] }
 0x229   : > { %3039 = vst.msk [vmem:[#allocation3 + $0x88] sm:$0xff] %vm2990_vm3, %v2964_v58  ;;  %v2965_v5 = vmax.f32 %v2933_v7, 0.0  ;;  %v3904_v1 = vld [vmem:[#allocation3 + $0x48] sm:$0xff] }
 0x22a   : > { %v4033_v6 = vld [vmem:[#allocation3 + $0x49] sm:$0xff]  ;;  %v4034_v8 = vld [vmem:[#allocation3 + $0x51] sm:$0xff]  ;;  %3037 = vst.msk [vmem:[#allocation3 + $0x68] sm:$0xff] %vm2990_vm3, %v2962_v11  ;;  %v2963_v61 = vmax.f32 %v2931_v44, 0.0  ;;  %v5439_v15 = vpop.f32.mrb[8].mxu0 }
 0x22b   : > { %v3776_v45 = vld [vmem:[#allocation3 + $0x4f] sm:$0xff]  ;;  %3040 = vst.msk [vmem:[#allocation3 + $0x90] sm:$0xff] %vm2990_vm3, %v2965_v5  ;;  %v5553_v16 = vadd.f32 %v5439_v15, %v6530_v62  ;;  %v2792_v17 = vpop.f32.mrb[9].mxu0  ;;  %v6701_v20 = vpack.c.bf16 %v4034_v8, %v4033_v6  ;;  %v3387_v62 = vld [vmem:[#allocation3 + $0x27] sm:$0xff] }
 0x22c   : > { %v3807_v19 = vpack.c.bf16 %v3776_v45, %v3775_v56  ;;  %3038 = vst.msk [vmem:[#allocation3 + $0x70] sm:$0xff] %vm2990_vm3, %v2963_v61  ;;  %v5554_v21 = vadd.f32 %v2792_v17, %v6532_v9  ;;  %v5440_v23 = vpop.f32.mrb[10].mxu0  ;;  %v3905_v28 = vld [vmem:[#allocation3 + $0x50] sm:$0xff] }
 0x22d   : > { %v3388_v30 = vld [vmem:[#allocation3 + $0x2f] sm:$0xff]  ;;  %v2936_v4 = vadd.f32 %v5553_v16, %v6666_v10  ;;  %v5555_v46 = vadd.f32 %v5440_v23, %v6534_v14  ;;  %v2795_v55 = vpop.f32.mrb[11].mxu0  ;;  %4081 = vst.msk [vmem:[#allocation4 + $0x8] sm:$0xff] %vm2990_vm3, %v6701_v20  ;;  %v3936_v60 = vpack.c.bf16 %v3905_v28, %v3904_v1 }
 0x22e   : > { %3839 = vrot.lane.b32.xlu0 %v3807_v19, %s5871_s28  ;;  %3453 = vrot.lane.b32.xlu1 %v3807_v19, %s5872_s29  ;;  %3115 = vst.msk [vmem:[#allocation4 + $0x20] sm:$0xff] %vm2990_vm3, %v3807_v19  ;;  %v2934_v9 = vadd.f32 %v5554_v21, %v6666_v10  ;;  %v5556_v0 = vadd.f32 %v2795_v55, %v6536_v24  ;;  %v3260_v35 = vld [vmem:[#allocation3 + $0x29] sm:$0xff]  ;;  %v3261_v58 = vld [vmem:[#allocation3 + $0x31] sm:$0xff] }
 0x22f   : > { %v6714_v25 = vpack.c.bf16 %v3388_v30, %v3387_v62  ;;  %v2968_v14 = vmax.f32 %v2936_v4, 0.0  ;;  %v2937_v49 = vadd.f32 %v5555_v46, %v6666_v10  ;;  %v6747_v28 = vpack.c.bf16 %v3261_v58, %v3260_v35  ;;  %v4063_v30 = vld [vmem:[#allocation3 + $0x229] sm:$0xff]  ;;  %v4064_v4 = vld [vmem:[#allocation3 + $0x231] sm:$0xff] }
 0x230   : > { %v2966_v63 = vmax.f32 %v2934_v9, 0.0  ;;  %v2935_v18 = vadd.f32 %v5556_v0, %v6666_v10  ;;  %v4080_v9 = vpack.c.bf16 %v4064_v4, %v4063_v30  ;;  %v3131_v0 = vld [vmem:[#allocation3 + $0x28] sm:$0xff]  ;;  %v3132_v1 = vld [vmem:[#allocation3 + $0x30] sm:$0xff] }
 0x231   : > { %3114 = vst.msk [vmem:[#allocation4 + $0x10] sm:$0xff] %vm2990_vm3, %v6714_v25  ;;  %3043 = vst.msk [vmem:[#allocation3 + $0xc8] sm:$0xff] %vm2990_vm3, %v2968_v14  ;;  %v2969_v22 = vmax.f32 %v2937_v49, 0.0  ;;  %v3777_v6 = vld [vmem:[#allocation3 + $0x67] sm:$0xff]  ;;  %v6773_v58 = vpack.c.bf16 %v3132_v1, %v3131_v0 }
 0x232   : > { %3968 = vrot.lane.b32.xlu0 %v3936_v60, %s5873_s30  ;;  %3582 = vrot.lane.b32.xlu1 %v3936_v60, %s5874_s6  ;;  %v4037_v24 = vld [vmem:[#allocation3 + $0x89] sm:$0xff]  ;;  %v4038_v26 = vld [vmem:[#allocation3 + $0x91] sm:$0xff]  ;;  %3041 = vst.msk [vmem:[#allocation3 + $0xa8] sm:$0xff] %vm2990_vm3, %v2966_v63  ;;  %v2967_v33 = vmax.f32 %v2935_v18, 0.0  ;;  %v5443_v34 = vpop.f32.mrb[12].mxu0  ;;  %4096 = vst.msk [vmem:[#allocation4 + $0xf8] sm:$0xff] %vm2990_vm3, %v4080_v9 }
 0x233   : > { %v4035_v42 = vld [vmem:[#allocation3 + $0x69] sm:$0xff]  ;;  %v4036_v48 = vld [vmem:[#allocation3 + $0x71] sm:$0xff]  ;;  %3044 = vst.msk [vmem:[#allocation3 + $0xd0] sm:$0xff] %vm2990_vm3, %v2969_v22  ;;  %v5557_v53 = vadd.f32 %v5443_v34, %v6538_v29  ;;  %v2808_v57 = vpop.f32.mrb[13].mxu0  ;;  %v6726_v7 = vpack.c.bf16 %v4038_v26, %v4037_v24 }
 0x234   : > { %v6728_v11 = vpack.c.bf16 %v4036_v48, %v4035_v42  ;;  %3042 = vst.msk [vmem:[#allocation3 + $0xb0] sm:$0xff] %vm2990_vm3, %v2967_v33  ;;  %v5558_v44 = vadd.f32 %v2808_v57, %v6540_v31  ;;  %v5444_v5 = vpop.f32.mrb[14].mxu0  ;;  %v4129_v56 = vld [vmem:[#allocation4 + $0x8] sm:$0xff] }
 0x235   : > { %v3778_v8 = vld [vmem:[#allocation3 + $0x6f] sm:$0xff]  ;;  %v2940_v61 = vadd.f32 %v5557_v53, %v6666_v10  ;;  %v5559_v15 = vadd.f32 %v5444_v5, %v6542_v32  ;;  %v2811_v45 = vpop.f32.mrb[15].mxu0  ;;  %5463 = vmatprep.mubr.msk.bf16.mxu1 %vm2990_vm3, %v4129_v56  ;;  %v3393_v29 = vld [vmem:[#allocation3 + $0x87] sm:$0xff]  ;;  %4083 = vst.msk [vmem:[#allocation4 + $0x28] sm:$0xff] %vm2990_vm3, %v6726_v7 }
 0x236   : > { %3711 = vrot.lane.b32.xlu1 %v6701_v20, %s5875_s7  ;;  %v6739_v31 = vpack.c.bf16 %v3778_v8, %v3777_v6  ;;  %v3074_v16 = vld [vmem:[#allocation3 + $0x8f] sm:$0xff]  ;;  %4082 = vst.msk [vmem:[#allocation4 + $0x18] sm:$0xff] %vm2990_vm3, %v6728_v11  ;;  %v2938_v17 = vadd.f32 %v5558_v44, %v6666_v10  ;;  %v5560_v32 = vadd.f32 %v2811_v45, %v6544_v36 }
 0x237   : > { %3197 = vrot.lane.b32.xlu0 %v3936_v60, %s5870_s21  ;;  %v3101_v19 = vpack.c.bf16 %v3074_v16, %v3393_v29  ;;  %v2972_v21 = vmax.f32 %v2940_v61, 0.0  ;;  %v2941_v23 = vadd.f32 %v5559_v15, %v6666_v10  ;;  %v3394_v62 = vld [vmem:[#allocation3 + $0x8f] sm:$0xff] }
 0x238   : > { %3116 = vst.msk [vmem:[#allocation4 + $0x30] sm:$0xff] %vm2990_vm3, %v6739_v31  ;;  %v2970_v46 = vmax.f32 %v2938_v17, 0.0  ;;  %v2939_v55 = vadd.f32 %v5560_v32, %v6666_v10  ;;  %v3397_v14 = vld [vmem:[#allocation3 + $0xc7] sm:$0xff]  ;;  %v6762_v35 = vpack.c.bf16 %v3394_v62, %v3393_v29  ;;  %v3523_v44 = vld [vmem:[#allocation3 + $0x90] sm:$0xff] }
 0x239   : > { %3117 = vst.msk [vmem:[#allocation4 + $0x40] sm:$0xff] %vm2990_vm3, %v3101_v19  ;;  %3047 = vst.msk [vmem:[#allocation3 + $0x108] sm:$0xff] %vm2990_vm3, %v2972_v21  ;;  %v2973_v36 = vmax.f32 %v2941_v23, 0.0  ;;  %v3781_v5 = vld [vmem:[#allocation3 + $0xa7] sm:$0xff]  ;;  %v5853_v23 = vld [vmem:[%s7267_s3 + $0x10] sm:$0xff]  }
 0x23a   : > { %3324 = vrot.lane.b32.xlu1 %v6747_v28, %s5869_s20  ;;  %v4041_v49 = vld [vmem:[#allocation3 + $0xc9] sm:$0xff]  ;;  %v4042_v60 = vld [vmem:[#allocation3 + $0xd1] sm:$0xff]  ;;  %3045 = vst.msk [vmem:[#allocation3 + $0xe8] sm:$0xff] %vm2990_vm3, %v2970_v46  ;;  %v2971_v63 = vmax.f32 %v2939_v55, 0.0  ;;  %v5447_v18 = vpop.f32.mrb[16].mxu0 }
 0x23b   : > { %3326 = vrot.lane.b32.xlu0 %v6701_v20, %s5869_s20  ;;  %v3398_v22 = vld [vmem:[#allocation3 + $0xcf] sm:$0xff]  ;;  %3048 = vst.msk [vmem:[#allocation3 + $0x110] sm:$0xff] %vm2990_vm3, %v2973_v36  ;;  %v5561_v33 = vadd.f32 %v5447_v18, %v6628_v12  ;;  %v2824_v34 = vpop.f32.mrb[17].mxu0  ;;  %v6764_v42 = vpack.c.bf16 %v4042_v60, %v4041_v49 }
 0x23c   : > { %v4039_v24 = vld [vmem:[#allocation3 + $0xa9] sm:$0xff]  ;;  %v4040_v26 = vld [vmem:[#allocation3 + $0xb1] sm:$0xff]  ;;  %v6766_v48 = vpack.c.bf16 %v3398_v22, %v3397_v14  ;;  %3046 = vst.msk [vmem:[#allocation3 + $0xf0] sm:$0xff] %vm2990_vm3, %v2971_v63  ;;  %v5562_v53 = vadd.f32 %v2824_v34, %v6630_v13  ;;  %v5448_v57 = vpop.f32.mrb[18].mxu0 }
 0x23d   : > { %v5852_v20 = vld [vmem:[%s7267_s3 + $0x8] sm:$0xff]   ;;  %v6775_v12 = vpack.c.bf16 %v4040_v26, %v4039_v24  ;;  %v2944_v6 = vadd.f32 %v5561_v33, %v6666_v10  ;;  %v5563_v8 = vadd.f32 %v5448_v57, %v6635_v27  ;;  %v2827_v61 = vpop.f32.mrb[19].mxu0  ;;  %v4130_v15 = vld [vmem:[#allocation4 + $0x18] sm:$0xff]  ;;  %4085 = vst.msk [vmem:[#allocation4 + $0x48] sm:$0xff] %vm2990_vm3, %v6764_v42 }
 0x23e   : > { %v3782_v56 = vld [vmem:[#allocation3 + $0xaf] sm:$0xff]  ;;  %3457 = vrot.lane.b32.xlu1 %v6762_v35, %s5872_s29  ;;  %3119 = vst.msk [vmem:[#allocation4 + $0x60] sm:$0xff] %vm2990_vm3, %v6766_v48  ;;  %v2942_v45 = vadd.f32 %v5562_v53, %v6666_v10  ;;  %v5564_v29 = vadd.f32 %v2827_v61, %v6637_v37  ;;  %5464 = vmatmul.mubr.msk.bf16.vlgmr.msra.gmra.mrb[32].mxu1 %vm2990_vm3, %v4130_v15 }
 0x23f   : > { %v6783_v13 = vpack.c.bf16 %v3782_v56, %v3781_v5  ;;  %3195 = vrot.lane.b32.xlu0 %v6773_v58, %s5870_s21  ;;  %v4131_v27 = vld [vmem:[#allocation4 + $0x28] sm:$0xff]  ;;  %4084 = vst.msk [vmem:[#allocation4 + $0x38] sm:$0xff] %vm2990_vm3, %v6775_v12  ;;  %v2976_v17 = vmax.f32 %v2944_v6, 0.0  ;;  %v2945_v32 = vadd.f32 %v5563_v8, %v6666_v10  ;;  %5496 = vmatpush3.bf16.msra.mxu1 %v6694_v54  ;;  %v3907_v6 = vld [vmem:[#allocation3 + $0x70] sm:$0xff] }
 0x240   : > { %v3522_v16 = vld [vmem:[#allocation3 + $0x88] sm:$0xff]  ;;  %5467 = vmatprep.mubr.msk.bf16.mxu1 %vm2990_vm3, %v4131_v27  ;;  %v2974_v37 = vmax.f32 %v2942_v45, 0.0  ;;  %v2943_v21 = vadd.f32 %v5564_v29, %v6666_v10  ;;  %5497 = vmatprep.subr.bf16.mxu1 %v5852_v20 }
 0x241   : > { %v6796_v19 = vpack.c.bf16 %v3523_v44, %v3522_v16  ;;  %3118 = vst.msk [vmem:[#allocation4 + $0x50] sm:$0xff] %vm2990_vm3, %v6783_v13  ;;  %3051 = vst.msk [vmem:[#allocation3 + $0x148] sm:$0xff] %vm2990_vm3, %v2976_v17  ;;  %v2977_v30 = vmax.f32 %v2945_v32, 0.0  ;;  %v3401_v4 = vld [vmem:[#allocation3 + $0x107] sm:$0xff] }
 0x242   : > { %v4045_v46 = vld [vmem:[#allocation3 + $0x109] sm:$0xff]  ;;  %v4046_v54 = vld [vmem:[#allocation3 + $0x111] sm:$0xff]  ;;  %3049 = vst.msk [vmem:[#allocation3 + $0x128] sm:$0xff] %vm2990_vm3, %v2974_v37  ;;  %v2975_v55 = vmax.f32 %v2943_v21, 0.0  ;;  %v5451_v62 = vpop.f32.mrb[20].mxu0 }
 0x243   : > { %3586 = vrot.lane.b32.xlu1 %v6796_v19, %s5874_s6  ;;  %3451 = vrot.lane.b32.xlu0 %v6714_v25, %s5872_s29  ;;  %v3402_v9 = vld [vmem:[#allocation3 + $0x10f] sm:$0xff]  ;;  %3052 = vst.msk [vmem:[#allocation3 + $0x150] sm:$0xff] %vm2990_vm3, %v2977_v30  ;;  %v5565_v1 = vadd.f32 %v5451_v62, %v6639_v38  ;;  %v2840_v14 = vpop.f32.mrb[21].mxu0  ;;  %v6813_v49 = vpack.c.bf16 %v4046_v54, %v4045_v46  ;;  %v3785_v22 = vld [vmem:[#allocation3 + $0xe7] sm:$0xff]  ;;  %v5854_v38 = vld [vmem:[%s7267_s3 + $0x18] sm:$0xff]  }
 0x244   : > { %v4043_v36 = vld [vmem:[#allocation3 + $0xe9] sm:$0xff]  ;;  %v4044_v0 = vld [vmem:[#allocation3 + $0xf1] sm:$0xff]  ;;  %v6815_v60 = vpack.c.bf16 %v3402_v9, %v3401_v4  ;;  %5498 = vmatpush3.bf16.msra.mxu1 %v5852_v20  ;;  %3050 = vst.msk [vmem:[#allocation3 + $0x130] sm:$0xff] %vm2990_vm3, %v2975_v55  ;;  %v5566_v63 = vadd.f32 %v2840_v14, %v6641_v39  ;;  %v5452_v18 = vpop.f32.mrb[22].mxu0 }
 0x245   : > { %v6819_v25 = vpack.c.bf16 %v4044_v0, %v4043_v36  ;;  %v3786_v24 = vld [vmem:[#allocation3 + $0xef] sm:$0xff]  ;;  %5499 = vmatprep.subr.bf16.mxu1 %v5853_v23  ;;  %v2948_v26 = vadd.f32 %v5565_v1, %v6666_v10  ;;  %v5567_v33 = vadd.f32 %v5452_v18, %v6643_v40  ;;  %v2843_v34 = vpop.f32.mrb[23].mxu0  ;;  %4087 = vst.msk [vmem:[#allocation4 + $0x68] sm:$0xff] %vm2990_vm3, %v6813_v49 }
 0x246   : > { %v4132_v20 = vld [vmem:[#allocation4 + $0x38] sm:$0xff]  ;;  %v6830_v39 = vpack.c.bf16 %v3786_v24, %v3785_v22  ;;  %3121 = vst.msk [vmem:[#allocation4 + $0x80] sm:$0xff] %vm2990_vm3, %v6815_v60  ;;  %v2946_v53 = vadd.f32 %v5566_v63, %v6666_v10  ;;  %v5568_v57 = vadd.f32 %v2843_v34, %v6645_v43  ;;  %v4133_v40 = vld [vmem:[#allocation4 + $0x48] sm:$0xff] }
 0x247   : > { %3715 = vrot.lane.b32.xlu1 %v6726_v7, %s5875_s7  ;;  %3580 = vrot.lane.b32.xlu0 %v6773_v58, %s5874_s6  ;;  %4086 = vst.msk [vmem:[#allocation4 + $0x58] sm:$0xff] %vm2990_vm3, %v6819_v25  ;;  %v2980_v44 = vmax.f32 %v2948_v26, 0.0  ;;  %v2949_v5 = vadd.f32 %v5567_v33, %v6666_v10  ;;  %v5855_v58 = vld [vmem:[%s7267_s3 + $0x20] sm:$0xff]   ;;  %v3906_v61 = vld [vmem:[#allocation3 + $0x68] sm:$0xff] }
 0x248   : > { %5468 = vmatmul.mubr.msk.bf16.gmra.mrb[36].mxu1 %vm2990_vm3, %v4132_v20  ;;  %3120 = vst.msk [vmem:[#allocation4 + $0x70] sm:$0xff] %vm2990_vm3, %v6830_v39  ;;  %v2978_v56 = vmax.f32 %v2946_v53, 0.0  ;;  %v2947_v43 = vadd.f32 %v5568_v57, %v6666_v10  ;;  %v3405_v15 = vld [vmem:[#allocation3 + $0x147] sm:$0xff]  ;;  %v6857_v30 = vpack.c.bf16 %v3907_v6, %v3906_v61 }
 0x249   : > { %5471 = vmatprep.mubr.msk.bf16.mxu1 %vm2990_vm3, %v4133_v40  ;;  %5500 = vmatpush3.bf16.msra.mxu1 %v5853_v23  ;;  %3055 = vst.msk [vmem:[#allocation3 + $0x188] sm:$0xff] %vm2990_vm3, %v2980_v44  ;;  %v2981_v8 = vmax.f32 %v2949_v5, 0.0  ;;  %v3789_v62 = vld [vmem:[#allocation3 + $0x127] sm:$0xff] }
 0x24a   : > { %5501 = vmatprep.subr.bf16.mxu1 %v5854_v38  ;;  %v4049_v45 = vld [vmem:[#allocation3 + $0x149] sm:$0xff]  ;;  %v4050_v29 = vld [vmem:[#allocation3 + $0x151] sm:$0xff]  ;;  %3053 = vst.msk [vmem:[#allocation3 + $0x168] sm:$0xff] %vm2990_vm3, %v2978_v56  ;;  %v2979_v27 = vmax.f32 %v2947_v43, 0.0  ;;  %v5455_v16 = vpop.f32.mrb[24].mxu0 }
 0x24b   : > { %3841 = vrot.lane.b32.xlu1 %v6739_v31, %s5871_s28  ;;  %3709 = vrot.lane.b32.xlu0 %v6747_v28, %s5875_s7  ;;  %v3406_v17 = vld [vmem:[#allocation3 + $0x14f] sm:$0xff]  ;;  %3056 = vst.msk [vmem:[#allocation3 + $0x190] sm:$0xff] %vm2990_vm3, %v2981_v8  ;;  %v5569_v21 = vadd.f32 %v5455_v16, %v6647_v47  ;;  %v2856_v23 = vpop.f32.mrb[25].mxu0  ;;  %v6859_v4 = vpack.c.bf16 %v4050_v29, %v4049_v45 }
 0x24c   : > { %v4047_v32 = vld [vmem:[#allocation3 + $0x129] sm:$0xff]  ;;  %v4048_v37 = vld [vmem:[#allocation3 + $0x131] sm:$0xff]  ;;  %v6861_v46 = vpack.c.bf16 %v3406_v17, %v3405_v15  ;;  %3054 = vst.msk [vmem:[#allocation3 + $0x170] sm:$0xff] %vm2990_vm3, %v2979_v27  ;;  %v5570_v28 = vadd.f32 %v2856_v23, %v6649_v41  ;;  %v5456_v54 = vpop.f32.mrb[26].mxu0 }
 0x24d   : > { %5502 = vmatpush3.bf16.msra.mxu1 %v5854_v38  ;;  %v6865_v55 = vpack.c.bf16 %v4048_v37, %v4047_v32  ;;  %v3790_v9 = vld [vmem:[#allocation3 + $0x12f] sm:$0xff]  ;;  %v2952_v36 = vadd.f32 %v5569_v21, %v6666_v10  ;;  %v5571_v0 = vadd.f32 %v5456_v54, %v6651_v51  ;;  %v2859_v1 = vpop.f32.mrb[27].mxu0  ;;  %4089 = vst.msk [vmem:[#allocation4 + $0x88] sm:$0xff] %vm2990_vm3, %v6859_v4 }
 0x24e   : > { %5503 = vmatprep.subr.bf16.mxu1 %v5855_v58  ;;  %v5856_v47 = vld [vmem:[%s7267_s3 + $0x28] sm:$0xff]   ;;  %v4134_v14 = vld [vmem:[#allocation4 + $0x58] sm:$0xff]  ;;  %v6876_v41 = vpack.c.bf16 %v3790_v9, %v3789_v62  ;;  %3123 = vst.msk [vmem:[#allocation4 + $0xa0] sm:$0xff] %vm2990_vm3, %v6861_v46  ;;  %v2950_v63 = vadd.f32 %v5570_v28, %v6666_v10  ;;  %v5572_v18 = vadd.f32 %v2859_v1, %v6653_v50  ;;  %v3527_v62 = vld [vmem:[#allocation3 + $0xd0] sm:$0xff] }
 0x24f   : > { %3970 = vrot.lane.b32.xlu1 %v6857_v30, %s5873_s30  ;;  %3843 = vrot.lane.b32.xlu0 %v6762_v35, %s5871_s28  ;;  %v4135_v51 = vld [vmem:[#allocation4 + $0x68] sm:$0xff]  ;;  %4088 = vst.msk [vmem:[#allocation4 + $0x78] sm:$0xff] %vm2990_vm3, %v6865_v55  ;;  %v2984_v22 = vmax.f32 %v2952_v36, 0.0  ;;  %v2953_v24 = vadd.f32 %v5571_v0, %v6666_v10  ;;  %v5857_v35 = vld [vmem:[%s7267_s3 + $0x30] sm:$0xff]  }
 0x250   : > { %5472 = vmatmul.mubr.msk.bf16.gmra.mrb[40].mxu1 %vm2990_vm3, %v4134_v14  ;;  %3122 = vst.msk [vmem:[#allocation4 + $0x90] sm:$0xff] %vm2990_vm3, %v6876_v41  ;;  %v2982_v38 = vmax.f32 %v2950_v63, 0.0  ;;  %v2951_v50 = vadd.f32 %v5572_v18, %v6666_v10  ;;  %v3409_v33 = vld [vmem:[#allocation3 + $0x187] sm:$0xff] }
 0x251   : > { %5475 = vmatprep.mubr.msk.bf16.mxu1 %vm2990_vm3, %v4135_v51  ;;  %5504 = vmatpush3.bf16.msra.mxu1 %v5855_v58  ;;  %3059 = vst.msk [vmem:[#allocation3 + $0x1c8] sm:$0xff] %vm2990_vm3, %v2984_v22  ;;  %v2985_v26 = vmax.f32 %v2953_v24, 0.0  ;;  %v3793_v45 = vld [vmem:[#allocation3 + $0x167] sm:$0xff] }
 0x252   : > { %5505 = vmatprep.subr.bf16.mxu1 %v5856_v47  ;;  %v4053_v34 = vld [vmem:[#allocation3 + $0x189] sm:$0xff]  ;;  %v4054_v20 = vld [vmem:[#allocation3 + $0x191] sm:$0xff]  ;;  %3057 = vst.msk [vmem:[#allocation3 + $0x1a8] sm:$0xff] %vm2990_vm3, %v2982_v38  ;;  %v2983_v53 = vmax.f32 %v2951_v50, 0.0  ;;  %v5459_v57 = vpop.f32.mrb[28].mxu0 }
 0x253   : > { %3199 = vrot.lane.b32.xlu1 %v6857_v30, %s5870_s21  ;;  %3972 = vrot.lane.b32.xlu0 %v6796_v19, %s5873_s30  ;;  %v3410_v40 = vld [vmem:[#allocation3 + $0x18f] sm:$0xff]  ;;  %3060 = vst.msk [vmem:[#allocation3 + $0x1d0] sm:$0xff] %vm2990_vm3, %v2985_v26  ;;  %v5573_v56 = vadd.f32 %v5459_v57, %v6655_v52  ;;  %v2872_v43 = vpop.f32.mrb[29].mxu0  ;;  %v6903_v6 = vpack.c.bf16 %v4054_v20, %v4053_v34  ;;  %v5858_v52 = vld [vmem:[%s7267_s3 + $0x38] sm:$0xff]  }
 0x254   : > { %v4051_v44 = vld [vmem:[#allocation3 + $0x169] sm:$0xff]  ;;  %v4052_v5 = vld [vmem:[#allocation3 + $0x171] sm:$0xff]  ;;  %v6905_v58 = vpack.c.bf16 %v3410_v40, %v3409_v33  ;;  %3058 = vst.msk [vmem:[#allocation3 + $0x1b0] sm:$0xff] %vm2990_vm3, %v2983_v53  ;;  %v5574_v8 = vadd.f32 %v2872_v43, %v6657_v59  ;;  %v5460_v61 = vpop.f32.mrb[30].mxu0 }
 0x255   : > { %5506 = vmatpush3.bf16.msra.mxu1 %v5856_v47  ;;  %v6909_v15 = vpack.c.bf16 %v4052_v5, %v4051_v44  ;;  %v3794_v29 = vld [vmem:[#allocation3 + $0x16f] sm:$0xff]  ;;  %v2956_v27 = vadd.f32 %v5573_v56, %v6666_v10  ;;  %v5575_v16 = vadd.f32 %v5460_v61, %v6659_v2  ;;  %v2875_v17 = vpop.f32.mrb[31].mxu0  ;;  %4091 = vst.msk [vmem:[#allocation4 + $0xa8] sm:$0xff] %vm2990_vm3, %v6903_v6 }
 0x256   : > { %5507 = vmatprep.subr.bf16.mxu1 %v5857_v35  ;;  %v4136_v32 = vld [vmem:[#allocation4 + $0x78] sm:$0xff]  ;;  %v6920_v59 = vpack.c.bf16 %v3794_v29, %v3793_v45  ;;  %3125 = vst.msk [vmem:[#allocation4 + $0xc0] sm:$0xff] %vm2990_vm3, %v6905_v58  ;;  %v2954_v37 = vadd.f32 %v5574_v8, %v6666_v10  ;;  %v5576_v21 = vadd.f32 %v2875_v17, %v6661_v3  ;;  %v4137_v2 = vld [vmem:[#allocation4 + $0x88] sm:$0xff]  ;;  %v3911_v57 = vld [vmem:[#allocation3 + $0xb0] sm:$0xff] }
 0x257   : > { %3328 = vrot.lane.b32.xlu1 %v6728_v11, %s5869_s20  ;;  %3201 = vrot.lane.b32.xlu0 %v6796_v19, %s5870_s21  ;;  %4090 = vst.msk [vmem:[#allocation4 + $0x98] sm:$0xff] %vm2990_vm3, %v6909_v15  ;;  %v2988_v23 = vmax.f32 %v2956_v27, 0.0  ;;  %v2957_v28 = vadd.f32 %v5575_v16, %v6666_v10  ;;  %v3526_v9 = vld [vmem:[#allocation3 + $0xc8] sm:$0xff]  ;;  %v4144_v29 = vld [vmem:[#allocation4 + $0xf8] sm:$0xff]  ;;  %v3915_v16 = vld [vmem:[#allocation3 + $0xf0] sm:$0xff] }
 0x258   : > { %5476 = vmatmul.mubr.msk.bf16.gmra.mrb[44].mxu1 %vm2990_vm3, %v4136_v32  ;;  %3124 = vst.msk [vmem:[#allocation4 + $0xb0] sm:$0xff] %vm2990_vm3, %v6920_v59  ;;  %v2986_v54 = vmax.f32 %v2954_v37, 0.0  ;;  %v2955_v3 = vadd.f32 %v5576_v21, %v6666_v10  ;;  %v3413_v47 = vld [vmem:[#allocation3 + $0x1c7] sm:$0xff]  ;;  %v3553_v18 = vpack.c.bf16 %v3527_v62, %v3526_v9  ;;  %v3539_v62 = vld [vmem:[#allocation3 + $0x190] sm:$0xff] }
 0x259   : > { %5479 = vmatprep.mubr.msk.bf16.mxu1 %vm2990_vm3, %v4137_v2  ;;  %5508 = vmatpush3.bf16.msra.mxu1 %v5857_v35  ;;  %3063 = vst.msk [vmem:[#allocation3 + $0x208] sm:$0xff] %vm2990_vm3, %v2988_v23  ;;  %v2989_v19 = vmax.f32 %v2957_v28, 0.0  ;;  %v3797_v38 = vld [vmem:[#allocation3 + $0x1a7] sm:$0xff] }
 0x25a   : > { %5509 = vmatprep.subr.bf16.mxu1 %v5858_v52  ;;  %v4057_v36 = vld [vmem:[#allocation3 + $0x1c9] sm:$0xff]  ;;  %v4058_v0 = vld [vmem:[#allocation3 + $0x1d1] sm:$0xff]  ;;  %3061 = vst.msk [vmem:[#allocation3 + $0x1e8] sm:$0xff] %vm2990_vm3, %v2986_v54  ;;  %v2987_v1 = vmax.f32 %v2955_v3, 0.0 }
 0x25b   : > { %3461 = vrot.lane.b32.xlu1 %v6766_v48, %s5872_s29  ;;  %3330 = vrot.lane.b32.xlu0 %v6726_v7, %s5869_s20  ;;  %v3414_v14 = vld [vmem:[#allocation3 + $0x1cf] sm:$0xff]  ;;  %3064 = vst.msk [vmem:[#allocation3 + $0x210] sm:$0xff] %vm2990_vm3, %v2989_v19  ;;  %v6943_v51 = vpack.c.bf16 %v4058_v0, %v4057_v36 }
 0x25c   : > { %v4055_v10 = vld [vmem:[#allocation3 + $0x1a9] sm:$0xff]  ;;  %v4056_v63 = vld [vmem:[#allocation3 + $0x1b1] sm:$0xff]  ;;  %v6945_v22 = vpack.c.bf16 %v3414_v14, %v3413_v47  ;;  %3062 = vst.msk [vmem:[#allocation3 + $0x1f0] sm:$0xff] %vm2990_vm3, %v2987_v1 }
 0x25d   : > { %5510 = vmatpush3.bf16.msra.mxu1 %v5858_v52  ;;  %v4076_v24 = vpack.c.bf16 %v4056_v63, %v4055_v10  ;;  %v3798_v50 = vld [vmem:[#allocation3 + $0x1af] sm:$0xff]  ;;  %4093 = vst.msk [vmem:[#allocation4 + $0xc8] sm:$0xff] %vm2990_vm3, %v6943_v51 }
 0x25e   : > { %v4138_v35 = vld [vmem:[#allocation4 + $0x98] sm:$0xff]  ;;  %v6951_v7 = vpack.c.bf16 %v3798_v50, %v3797_v38  ;;  %3127 = vst.msk [vmem:[#allocation4 + $0xe0] sm:$0xff] %vm2990_vm3, %v6945_v22  ;;  %v4139_v26 = vld [vmem:[#allocation4 + $0xa8] sm:$0xff]  ;;  %v3531_v52 = vld [vmem:[#allocation3 + $0x110] sm:$0xff] }
 0x25f   : > { %3590 = vrot.lane.b32.xlu1 %v3553_v18, %s5874_s6  ;;  %3455 = vrot.lane.b32.xlu0 %v6739_v31, %s5872_s29  ;;  %4092 = vst.msk [vmem:[#allocation4 + $0xb8] sm:$0xff] %vm2990_vm3, %v4076_v24  ;;  %v3923_v14 = vld [vmem:[#allocation3 + $0x170] sm:$0xff] }
 0x260   : > { %5480 = vmatmul.mubr.msk.bf16.gmra.mrb[48].mxu1 %vm2990_vm3, %v4138_v35  ;;  %3126 = vst.msk [vmem:[#allocation4 + $0xd0] sm:$0xff] %vm2990_vm3, %v6951_v7 }
 0x261   : > { %5483 = vmatprep.mubr.msk.bf16.mxu1 %vm2990_vm3, %v4139_v26  ;;  %v3801_v5 = vld [vmem:[#allocation3 + $0x1e7] sm:$0xff] }
 0x262   : > { %v4061_v33 = vld [vmem:[#allocation3 + $0x209] sm:$0xff]  ;;  %v4062_v34 = vld [vmem:[#allocation3 + $0x211] sm:$0xff] }
 0x263   : > { %3719 = vrot.lane.b32.xlu1 %v6764_v42, %s5875_s7  ;;  %3584 = vrot.lane.b32.xlu0 %v6857_v30, %s5874_s6  ;;  %v4059_v20 = vld [vmem:[#allocation3 + $0x1e9] sm:$0xff]  ;;  %v4060_v31 = vld [vmem:[#allocation3 + $0x1f1] sm:$0xff]  ;;  %v4079_v53 = vpack.c.bf16 %v4062_v34, %v4061_v33 }
 0x264   : > { %v4078_v40 = vpack.c.bf16 %v4060_v31, %v4059_v20  ;;  %v3802_v56 = vld [vmem:[#allocation3 + $0x1ef] sm:$0xff] }
 0x265   : > { %4095 = vst.msk [vmem:[#allocation4 + $0xe8] sm:$0xff] %vm2990_vm3, %v4079_v53  ;;  %v4141_v43 = vld [vmem:[#allocation4 + $0xc8] sm:$0xff]  ;;  %v6973_v8 = vpack.c.bf16 %v3802_v56, %v3801_v5  ;;  %v3543_v34 = vld [vmem:[#allocation3 + $0x1d0] sm:$0xff] }
 0x266   : > { %v4140_v44 = vld [vmem:[#allocation4 + $0xb8] sm:$0xff]  ;;  %v3910_v30 = vld [vmem:[#allocation3 + $0xa8] sm:$0xff]  ;;  %4094 = vst.msk [vmem:[#allocation4 + $0xd8] sm:$0xff] %vm2990_vm3, %v4078_v40 }
 0x267   : > { %3845 = vrot.lane.b32.xlu1 %v6783_v13, %s5871_s28  ;;  %3713 = vrot.lane.b32.xlu0 %v6728_v11, %s5875_s7  ;;  %v3939_v61 = vpack.c.bf16 %v3911_v57, %v3910_v30  ;;  %3128 = vst.msk [vmem:[#allocation4 + $0xf0] sm:$0xff] %vm2990_vm3, %v6973_v8  ;;  %v3927_v30 = vld [vmem:[#allocation3 + $0x1b0] sm:$0xff] }
 0x268   : > { %5484 = vmatmul.mubr.msk.bf16.gmra.mrb[52].mxu1 %vm2990_vm3, %v4140_v44  ;;  %v3666_v44 = vld [vmem:[#allocation3 + $0x171] sm:$0xff] }
 0x269   : > { %5487 = vmatprep.mubr.msk.bf16.mxu1 %vm2990_vm3, %v4141_v43 }
 0x26b   : > { %3974 = vrot.lane.b32.xlu1 %v3939_v61, %s5873_s30  ;;  %3847 = vrot.lane.b32.xlu0 %v6766_v48, %s5871_s28  ;;  %v3530_v48 = vld [vmem:[#allocation3 + $0x108] sm:$0xff] }
 0x26c   : > { %v4143_v45 = vld [vmem:[#allocation4 + $0xe8] sm:$0xff]  ;;  %v3555_v27 = vpack.c.bf16 %v3531_v52, %v3530_v48  ;;  %v3285_v48 = vld [vmem:[#allocation3 + $0x1b1] sm:$0xff] }
 0x26d   : > { %v4142_v11 = vld [vmem:[#allocation4 + $0xd8] sm:$0xff]  ;;  %v3284_v52 = vld [vmem:[#allocation3 + $0x1a9] sm:$0xff] }
 0x26f   : > { %3203 = vrot.lane.b32.xlu1 %v3939_v61, %s5870_s21  ;;  %3976 = vrot.lane.b32.xlu0 %v3553_v18, %s5873_s30 }
 0x270   : > { %5488 = vmatmul.mubr.msk.bf16.gmra.mrb[56].mxu1 %vm2990_vm3, %v4142_v11 }
 0x271   : > { %5491 = vmatprep.mubr.msk.bf16.mxu1 %vm2990_vm3, %v4143_v45 }
 0x273   : > { %3332 = vrot.lane.b32.xlu1 %v6775_v12, %s5869_s20  ;;  %3205 = vrot.lane.b32.xlu0 %v3553_v18, %s5870_s21 }
 0x277   : > { %3465 = vrot.lane.b32.xlu1 %v6815_v60, %s5872_s29  ;;  %3334 = vrot.lane.b32.xlu0 %v6764_v42, %s5869_s20  ;;  %v3914_v42 = vld [vmem:[#allocation3 + $0xe8] sm:$0xff] }
 0x278   : > { %5492 = vmatmul.mubr.msk.bf16.gmra.mrb[60].mxu1 %vm2990_vm3, %v4144_v29  ;;  %v3941_v17 = vpack.c.bf16 %v3915_v16, %v3914_v42  ;;  %v3303_v16 = vpack.c.bf16 %v3285_v48, %v3284_v52 }
 0x27b   : > { %3594 = vrot.lane.b32.xlu1 %v3555_v27, %s5874_s6  ;;  %3459 = vrot.lane.b32.xlu0 %v6783_v13, %s5872_s29  ;;  %v3535_v13 = vld [vmem:[#allocation3 + $0x150] sm:$0xff] }
 0x27f   : > { %3723 = vrot.lane.b32.xlu1 %v6813_v49, %s5875_s7  ;;  %3588 = vrot.lane.b32.xlu0 %v3939_v61, %s5874_s6 }
 0x283   : > { %3849 = vrot.lane.b32.xlu1 %v6830_v39, %s5871_s28  ;;  %3717 = vrot.lane.b32.xlu0 %v6775_v12, %s5875_s7  ;;  %v3534_v12 = vld [vmem:[#allocation3 + $0x148] sm:$0xff] }
 0x284   : > { %v3557_v32 = vpack.c.bf16 %v3535_v13, %v3534_v12  ;;  %v3287_v13 = vld [vmem:[#allocation3 + $0x1d1] sm:$0xff] }
 0x287   : > { %3978 = vrot.lane.b32.xlu1 %v3941_v17, %s5873_s30  ;;  %3851 = vrot.lane.b32.xlu0 %v6815_v60, %s5871_s28  ;;  %v3919_v60 = vld [vmem:[#allocation3 + $0x130] sm:$0xff] }
 0x28b   : > { %3207 = vrot.lane.b32.xlu1 %v3941_v17, %s5870_s21  ;;  %3980 = vrot.lane.b32.xlu0 %v3555_v27, %s5873_s30 }
 0x28f   : > { %3336 = vrot.lane.b32.xlu1 %v6819_v25, %s5869_s20  ;;  %3209 = vrot.lane.b32.xlu0 %v3555_v27, %s5870_s21 }
 0x293   : > { %3469 = vrot.lane.b32.xlu1 %v6861_v46, %s5872_s29  ;;  %3338 = vrot.lane.b32.xlu0 %v6813_v49, %s5869_s20  ;;  %v3918_v49 = vld [vmem:[#allocation3 + $0x128] sm:$0xff] }
 0x294   : > { %v3943_v2 = vpack.c.bf16 %v3919_v60, %v3918_v49 }
 0x297   : > { %3598 = vrot.lane.b32.xlu1 %v3557_v32, %s5874_s6  ;;  %3463 = vrot.lane.b32.xlu0 %v6830_v39, %s5872_s29 }
 0x29b   : > { %3727 = vrot.lane.b32.xlu1 %v6859_v4, %s5875_s7  ;;  %3592 = vrot.lane.b32.xlu0 %v3941_v17, %s5874_s6  ;;  %v3418_v17 = vld [vmem:[#allocation3 + $0x20f] sm:$0xff] }
 0x29f   : > { %3853 = vrot.lane.b32.xlu1 %v6876_v41, %s5871_s28  ;;  %3721 = vrot.lane.b32.xlu0 %v6819_v25, %s5875_s7 }
 0x2a0   : > { %v3840_v37 = vpop.permute.xlu0 %3839  ;;  %v3454_v21 = vpop.permute.xlu1 %3453 }
 0x2a3   : > { %3982 = vrot.lane.b32.xlu1 %v3943_v2, %s5873_s30  ;;  %3855 = vrot.lane.b32.xlu0 %v6861_v46, %s5871_s28  ;;  %v3538_v46 = vld [vmem:[#allocation3 + $0x188] sm:$0xff] }
 0x2a4   : > { %v3969_v39 = vpop.permute.xlu0 %3968  ;;  %v3583_v23 = vpop.permute.xlu1 %3582  ;;  %v3559_v9 = vpack.c.bf16 %v3539_v62, %v3538_v46  ;;  %v3676_v62 = vld [vmem:[#allocation3 + $0x211] sm:$0xff] }
 0x2a7   : > { %3211 = vrot.lane.b32.xlu1 %v3943_v2, %s5870_s21  ;;  %3984 = vrot.lane.b32.xlu0 %v3557_v32, %s5873_s30 }
 0x2a8   : > { %v3712_v28 = vpop.permute.xlu1 %3711 }
 0x2a9   : > { %v3198_v54 = vpop.permute.xlu0 %3197 }
 0x2aa   : > { %3244 = vst.msk [vmem:[#allocation4 + $0x20] sm:$0xff] %vm3241_vm4, %v3198_v54 }
 0x2ab   : > { %3340 = vrot.lane.b32.xlu1 %v6865_v55, %s5869_s20  ;;  %3213 = vrot.lane.b32.xlu0 %v3557_v32, %s5870_s21  ;;  %v3417_v32 = vld [vmem:[#allocation3 + $0x207] sm:$0xff] }
 0x2ac   : > { %v3325_v25 = vpop.permute.xlu1 %3324 }
 0x2ad   : > { %v3327_v3 = vpop.permute.xlu0 %3326 }
 0x2ae   : > { %3373 = vst.msk [vmem:[#allocation4 + $0x20] sm:$0xff] %vm3370_vm5, %v3327_v3  ;;  %v3675_v3 = vld [vmem:[#allocation3 + $0x209] sm:$0xff] }
 0x2af   : > { %3473 = vrot.lane.b32.xlu1 %v6905_v58, %s5872_s29  ;;  %3342 = vrot.lane.b32.xlu0 %v6859_v4, %s5869_s20 }
 0x2b0   : > { %v3458_v19 = vpop.permute.xlu1 %3457 }
 0x2b1   : > { %v3196_v47 = vpop.permute.xlu0 %3195 }
 0x2b2   : > { %3243 = vst.msk [vmem:[#allocation4 + $0x10] sm:$0xff] %vm3241_vm4, %v3196_v47 }
 0x2b3   : > { %3602 = vrot.lane.b32.xlu1 %v3559_v9, %s5874_s6  ;;  %3372 = vst.msk [vmem:[#allocation4 + $0x10] sm:$0xff] %vm3370_vm5, %v3325_v25  ;;  %3467 = vrot.lane.b32.xlu0 %v6876_v41, %s5872_s29  ;;  %v3922_v41 = vld [vmem:[#allocation3 + $0x168] sm:$0xff] }
 0x2b4   : > { %3501 = vst.msk [vmem:[#allocation4 + $0x10] sm:$0xff] %vm3499_vm6, %v3454_v21  ;;  %v3945_v63 = vpack.c.bf16 %v3923_v14, %v3922_v41 }
 0x2b5   : > { %v3587_v36 = vpop.permute.xlu1 %3586  ;;  %v3452_v4 = vpop.permute.xlu0 %3451  ;;  %3630 = vst.msk [vmem:[#allocation4 + $0x10] sm:$0xff] %vm3628_vm7, %v3583_v23  ;;  %v3546_v23 = vld [vmem:[#allocation3 + $0x208] sm:$0xff] }
 0x2b6   : > { %3500 = vst.msk [vmem:[#allocation4] sm:$0xff] %vm3499_vm6, %v3452_v4  ;;  %v3931_v4 = vld [vmem:[#allocation3 + $0x1f0] sm:$0xff] }
 0x2b7   : > { %3731 = vrot.lane.b32.xlu1 %v6903_v6, %s5875_s7  ;;  %3759 = vst.msk [vmem:[#allocation4 + $0x10] sm:$0xff] %vm3757_vm8, %v3712_v28  ;;  %3596 = vrot.lane.b32.xlu0 %v3943_v2, %s5874_s6 }
 0x2b9   : > { %v3716_v0 = vpop.permute.xlu1 %3715  ;;  %v3581_v1 = vpop.permute.xlu0 %3580 }
 0x2ba   : > { %3629 = vst.msk [vmem:[#allocation4] sm:$0xff] %vm3628_vm7, %v3581_v1 }
 0x2bb   : > { %3857 = vrot.lane.b32.xlu1 %v6920_v59, %s5871_s28  ;;  %3725 = vrot.lane.b32.xlu0 %v6865_v55, %s5875_s7 }
 0x2bd   : > { %v3842_v10 = vpop.permute.xlu1 %3841  ;;  %v3710_v18 = vpop.permute.xlu0 %3709 }
 0x2be   : > { %3889 = vst.msk [vmem:[#allocation4 + $0x10] sm:$0xff] %vm3887_vm9, %v3842_v10 }
 0x2bf   : > { %3758 = vst.msk [vmem:[#allocation4] sm:$0xff] %vm3757_vm8, %v3710_v18  ;;  %3986 = vrot.lane.b32.xlu1 %v3945_v63, %s5873_s30  ;;  %3859 = vrot.lane.b32.xlu0 %v6905_v58, %s5871_s28  ;;  %v3289_v18 = vld [vmem:[#allocation3 + $0x1f1] sm:$0xff] }
 0x2c0   : > { %3888 = vst.msk [vmem:[#allocation4] sm:$0xff] %vm3887_vm9, %v3840_v37  ;;  %v3434_v37 = vpack.c.bf16 %v3418_v17, %v3417_v32 }
 0x2c1   : > { %4017 = vst.msk [vmem:[#allocation4] sm:$0xff] %vm4016_vm10, %v3969_v39  ;;  %v3971_v24 = vpop.permute.xlu1 %3970  ;;  %v3844_v55 = vpop.permute.xlu0 %3843  ;;  %v3547_v39 = vld [vmem:[#allocation3 + $0x210] sm:$0xff] }
 0x2c2   : > { %4018 = vst.msk [vmem:[#allocation4 + $0x10] sm:$0xff] %vm4016_vm10, %v3971_v24  ;;  %v7111_v54 = vpack.c.bf16 %v3547_v39, %v3546_v23  ;;  %v3805_v24 = vld [vmem:[#allocation3 + $0x227] sm:$0xff] }
 0x2c3   : > { %3215 = vrot.lane.b32.xlu1 %v3945_v63, %s5870_s21  ;;  %3988 = vrot.lane.b32.xlu0 %v3559_v9, %s5873_s30 }
 0x2c5   : > { %v3200_v38 = vpop.permute.xlu1 %3199  ;;  %v3973_v50 = vpop.permute.xlu0 %3972 }
 0x2c6   : > { %3245 = vst.msk [vmem:[#allocation4 + $0x30] sm:$0xff] %vm3241_vm4, %v3200_v38 }
 0x2c7   : > { %3344 = vrot.lane.b32.xlu1 %v6909_v15, %s5869_s20  ;;  %3217 = vrot.lane.b32.xlu0 %v3559_v9, %s5870_s21  ;;  %v3542_v15 = vld [vmem:[#allocation3 + $0x1c8] sm:$0xff] }
 0x2c8   : > { %v4097_v58 = vld [vmem:[#allocation4] sm:$0xff]  ;;  %v3561_v31 = vpack.c.bf16 %v3543_v34, %v3542_v15  ;;  %v3935_v34 = vld [vmem:[#allocation3 + $0x230] sm:$0xff] }
 0x2c9   : > { %5511 = vmatprep.mubr.bf16.mxu1 %v4097_v58  ;;  %v3329_v35 = vpop.permute.xlu1 %3328  ;;  %v4098_v26 = vld [vmem:[#allocation4 + $0x10] sm:$0xff]  ;;  %v3202_v33 = vpop.permute.xlu0 %3201 }
 0x2ca   : > { %3374 = vst.msk [vmem:[#allocation4 + $0x30] sm:$0xff] %vm3370_vm5, %v3329_v35  ;;  %5512 = vmatmul.mubr.bf16.vlgmr.msra.gmra.mrb[32].mxu1 %v4098_v26 }
 0x2cb   : > { %3246 = vst.msk [vmem:[#allocation4 + $0x40] sm:$0xff] %vm3241_vm4, %v3202_v33  ;;  %3477 = vrot.lane.b32.xlu1 %v6945_v22, %s5872_s29  ;;  %3346 = vrot.lane.b32.xlu0 %v6903_v6, %s5869_s20  ;;  %v3665_v6 = vld [vmem:[#allocation3 + $0x169] sm:$0xff] }
 0x2cc   : > { %3503 = vst.msk [vmem:[#allocation4 + $0x30] sm:$0xff] %vm3499_vm6, %v3458_v19  ;;  %v3687_v43 = vpack.c.bf16 %v3666_v44, %v3665_v6  ;;  %v3692_v19 = vpack.c.bf16 %v3676_v62, %v3675_v3  ;;  %v3934_v33 = vld [vmem:[#allocation3 + $0x228] sm:$0xff] }
 0x2cd   : > { %3632 = vst.msk [vmem:[#allocation4 + $0x30] sm:$0xff] %vm3628_vm7, %v3587_v36  ;;  %v3462_v20 = vpop.permute.xlu1 %3461  ;;  %v3331_v53 = vpop.permute.xlu0 %3330 }
 0x2ce   : > { %3761 = vst.msk [vmem:[#allocation4 + $0x30] sm:$0xff] %vm3757_vm8, %v3716_v0 }
 0x2cf   : > { %3375 = vst.msk [vmem:[#allocation4 + $0x40] sm:$0xff] %vm3370_vm5, %v3331_v53  ;;  %3606 = vrot.lane.b32.xlu1 %v3561_v31, %s5874_s6  ;;  %3471 = vrot.lane.b32.xlu0 %v6920_v59, %s5872_s29  ;;  %v3926_v59 = vld [vmem:[#allocation3 + $0x1a8] sm:$0xff] }
 0x2d0   : > { %v3947_v11 = vpack.c.bf16 %v3927_v30, %v3926_v59 }
 0x2d1   : > { %v3591_v57 = vpop.permute.xlu1 %3590  ;;  %v3456_v40 = vpop.permute.xlu0 %3455 }
 0x2d2   : > { %3502 = vst.msk [vmem:[#allocation4 + $0x20] sm:$0xff] %vm3499_vm6, %v3456_v40 }
 0x2d3   : > { %3735 = vrot.lane.b32.xlu1 %v6943_v51, %s5875_s7  ;;  %3600 = vrot.lane.b32.xlu0 %v3945_v63, %s5874_s6  ;;  %v3288_v63 = vld [vmem:[#allocation3 + $0x1e9] sm:$0xff] }
 0x2d5   : > { %v3720_v5 = vpop.permute.xlu1 %3719  ;;  %v3585_v56 = vpop.permute.xlu0 %3584 }
 0x2d6   : > { %3631 = vst.msk [vmem:[#allocation4 + $0x20] sm:$0xff] %vm3628_vm7, %v3585_v56 }
 0x2d7   : > { %3861 = vrot.lane.b32.xlu1 %v6951_v7, %s5871_s28  ;;  %3729 = vrot.lane.b32.xlu0 %v3687_v43, %s5875_s7 }
 0x2d9   : > { %v3846_v61 = vpop.permute.xlu1 %3845  ;;  %v3714_v45 = vpop.permute.xlu0 %3713 }
 0x2da   : > { %3891 = vst.msk [vmem:[#allocation4 + $0x30] sm:$0xff] %vm3887_vm9, %v3846_v61 }
 0x2db   : > { %3760 = vst.msk [vmem:[#allocation4 + $0x20] sm:$0xff] %vm3757_vm8, %v3714_v45  ;;  %3990 = vrot.lane.b32.xlu1 %v3947_v11, %s5873_s30  ;;  %3863 = vrot.lane.b32.xlu0 %v6945_v22, %s5871_s28  ;;  %v3286_v22 = vld [vmem:[#allocation3 + $0x1c9] sm:$0xff] }
 0x2dc   : > { %3890 = vst.msk [vmem:[#allocation4 + $0x20] sm:$0xff] %vm3887_vm9, %v3844_v55  ;;  %v3304_v2 = vpack.c.bf16 %v3287_v13, %v3286_v22  ;;  %v3806_v55 = vld [vmem:[#allocation3 + $0x22f] sm:$0xff] }
 0x2dd   : > { %4019 = vst.msk [vmem:[#allocation4 + $0x20] sm:$0xff] %vm4016_vm10, %v3973_v50  ;;  %v3975_v51 = vpop.permute.xlu1 %3974  ;;  %v3848_v29 = vpop.permute.xlu0 %3847  ;;  %v3305_v50 = vpack.c.bf16 %v3289_v18, %v3288_v63  ;;  %v3822_v35 = vpack.c.bf16 %v3806_v55, %v3805_v24 }
 0x2de   : > { %4020 = vst.msk [vmem:[#allocation4 + $0x30] sm:$0xff] %vm4016_vm10, %v3975_v51 }
 0x2df   : > { %3219 = vrot.lane.b32.xlu1 %v3947_v11, %s5870_s21  ;;  %3992 = vrot.lane.b32.xlu0 %v3561_v31, %s5873_s30 }
 0x2e1   : > { %v3204_v27 = vpop.permute.xlu1 %3203  ;;  %v3977_v42 = vpop.permute.xlu0 %3976 }
 0x2e2   : > { %3247 = vst.msk [vmem:[#allocation4 + $0x50] sm:$0xff] %vm3241_vm4, %v3204_v27 }
 0x2e3   : > { %3348 = vrot.lane.b32.xlu1 %v3303_v16, %s5869_s20  ;;  %3221 = vrot.lane.b32.xlu0 %v3561_v31, %s5870_s21 }
 0x2e4   : > { %v4099_v12 = vld [vmem:[#allocation4 + $0x20] sm:$0xff] }
 0x2e5   : > { %5515 = vmatprep.mubr.bf16.mxu1 %v4099_v12  ;;  %v3333_v60 = vpop.permute.xlu1 %3332  ;;  %v4100_v49 = vld [vmem:[#allocation4 + $0x30] sm:$0xff]  ;;  %v3206_v21 = vpop.permute.xlu0 %3205 }
 0x2e6   : > { %3376 = vst.msk [vmem:[#allocation4 + $0x50] sm:$0xff] %vm3370_vm5, %v3333_v60  ;;  %5516 = vmatmul.mubr.bf16.gmra.mrb[36].mxu1 %v4100_v49 }
 0x2e7   : > { %3248 = vst.msk [vmem:[#allocation4 + $0x60] sm:$0xff] %vm3241_vm4, %v3206_v21  ;;  %3481 = vrot.lane.b32.xlu1 %v3434_v37, %s5872_s29  ;;  %3350 = vrot.lane.b32.xlu0 %v3304_v2, %s5869_s20 }
 0x2e8   : > { %3505 = vst.msk [vmem:[#allocation4 + $0x50] sm:$0xff] %vm3499_vm6, %v3462_v20 }
 0x2e9   : > { %3634 = vst.msk [vmem:[#allocation4 + $0x50] sm:$0xff] %vm3628_vm7, %v3591_v57  ;;  %v3466_v28 = vpop.permute.xlu1 %3465  ;;  %v3335_v25 = vpop.permute.xlu0 %3334 }
 0x2ea   : > { %3763 = vst.msk [vmem:[#allocation4 + $0x50] sm:$0xff] %vm3757_vm8, %v3720_v5 }
 0x2eb   : > { %3377 = vst.msk [vmem:[#allocation4 + $0x60] sm:$0xff] %vm3370_vm5, %v3335_v25  ;;  %3610 = vrot.lane.b32.xlu1 %v7111_v54, %s5874_s6  ;;  %3475 = vrot.lane.b32.xlu0 %v6951_v7, %s5872_s29  ;;  %v3930_v7 = vld [vmem:[#allocation3 + $0x1e8] sm:$0xff] }
 0x2ec   : > { %v3949_v1 = vpack.c.bf16 %v3931_v4, %v3930_v7 }
 0x2ed   : > { %v3595_v46 = vpop.permute.xlu1 %3594  ;;  %v3460_v9 = vpop.permute.xlu0 %3459 }
 0x2ee   : > { %3504 = vst.msk [vmem:[#allocation4 + $0x40] sm:$0xff] %vm3499_vm6, %v3460_v9 }
 0x2ef   : > { %3739 = vrot.lane.b32.xlu1 %v3692_v19, %s5875_s7  ;;  %3604 = vrot.lane.b32.xlu0 %v3947_v11, %s5874_s6 }
 0x2f1   : > { %v3724_v47 = vpop.permute.xlu1 %3723  ;;  %v3589_v36 = vpop.permute.xlu0 %3588 }
 0x2f2   : > { %3633 = vst.msk [vmem:[#allocation4 + $0x40] sm:$0xff] %vm3628_vm7, %v3589_v36 }
 0x2f3   : > { %3865 = vrot.lane.b32.xlu1 %v6973_v8, %s5871_s28  ;;  %3733 = vrot.lane.b32.xlu0 %v3303_v16, %s5875_s7 }
 0x2f5   : > { %v3850_v0 = vpop.permute.xlu1 %3849  ;;  %v3718_v14 = vpop.permute.xlu0 %3717 }
 0x2f6   : > { %3893 = vst.msk [vmem:[#allocation4 + $0x50] sm:$0xff] %vm3887_vm9, %v3850_v0 }
 0x2f7   : > { %3762 = vst.msk [vmem:[#allocation4 + $0x40] sm:$0xff] %vm3757_vm8, %v3718_v14  ;;  %3994 = vrot.lane.b32.xlu1 %v3949_v1, %s5873_s30  ;;  %3867 = vrot.lane.b32.xlu0 %v3434_v37, %s5871_s28 }
 0x2f8   : > { %3892 = vst.msk [vmem:[#allocation4 + $0x40] sm:$0xff] %vm3887_vm9, %v3848_v29 }
 0x2f9   : > { %4021 = vst.msk [vmem:[#allocation4 + $0x40] sm:$0xff] %vm4016_vm10, %v3977_v42  ;;  %v3979_v41 = vpop.permute.xlu1 %3978  ;;  %v3852_v10 = vpop.permute.xlu0 %3851 }
 0x2fa   : > { %4022 = vst.msk [vmem:[#allocation4 + $0x50] sm:$0xff] %vm4016_vm10, %v3979_v41 }
 0x2fb   : > { %3223 = vrot.lane.b32.xlu1 %v3949_v1, %s5870_s21  ;;  %3479 = vrot.lane.b32.xlu0 %v6973_v8, %s5872_s29  ;;  %v3951_v8 = vpack.c.bf16 %v3935_v34, %v3934_v33  ;;  %s7243_s29 = scalar_lea.vmem %s7269_s5, %s4960_s26 }
 0x2fd   : > { %v3208_v38 = vpop.permute.xlu1 %3207  ;;  %v3981_v58 = vpop.permute.xlu0 %3980 }
 0x2fe   : > { %3249 = vst.msk [vmem:[#allocation4 + $0x70] sm:$0xff] %vm3241_vm4, %v3208_v38 }
 0x2ff   : > { %3352 = vrot.lane.b32.xlu1 %v3305_v50, %s5869_s20  ;;  %3608 = vrot.lane.b32.xlu0 %v3949_v1, %s5874_s6 }
 0x300   : > { %v4101_v26 = vld [vmem:[#allocation4 + $0x40] sm:$0xff] }
 0x301   : > { %5519 = vmatprep.mubr.bf16.mxu1 %v4101_v26  ;;  %v3337_v15 = vpop.permute.xlu1 %3336  ;;  %v4102_v20 = vld [vmem:[#allocation4 + $0x50] sm:$0xff]  ;;  %v3210_v31 = vpop.permute.xlu0 %3209 }
 0x302   : > { %3378 = vst.msk [vmem:[#allocation4 + $0x70] sm:$0xff] %vm3370_vm5, %v3337_v15  ;;  %5520 = vmatmul.mubr.bf16.gmra.mrb[40].mxu1 %v4102_v20 }
 0x303   : > { %3250 = vst.msk [vmem:[#allocation4 + $0x80] sm:$0xff] %vm3241_vm4, %v3210_v31  ;;  %3869 = vrot.lane.b32.xlu1 %v3822_v35, %s5871_s28  ;;  %3737 = vrot.lane.b32.xlu0 %v3305_v50, %s5875_s7 }
 0x304   : > { %3507 = vst.msk [vmem:[#allocation4 + $0x70] sm:$0xff] %vm3499_vm6, %v3466_v28 }
 0x305   : > { %3636 = vst.msk [vmem:[#allocation4 + $0x70] sm:$0xff] %vm3628_vm7, %v3595_v46  ;;  %v3470_v53 = vpop.permute.xlu1 %3469  ;;  %v3339_v57 = vpop.permute.xlu0 %3338 }
 0x306   : > { %3765 = vst.msk [vmem:[#allocation4 + $0x70] sm:$0xff] %vm3757_vm8, %v3724_v47 }
 0x307   : > { %3379 = vst.msk [vmem:[#allocation4 + $0x80] sm:$0xff] %vm3370_vm5, %v3339_v57  ;;  %3998 = vrot.lane.b32.xlu1 %v3951_v8, %s5873_s30  ;;  %3996 = vrot.lane.b32.xlu0 %v7111_v54, %s5873_s30 }
 0x309   : > { %v3599_v40 = vpop.permute.xlu1 %3598  ;;  %v3464_v6 = vpop.permute.xlu0 %3463 }
 0x30a   : > { %3506 = vst.msk [vmem:[#allocation4 + $0x60] sm:$0xff] %vm3499_vm6, %v3464_v6 }
 0x30d   : > { %v3728_v44 = vpop.permute.xlu1 %3727  ;;  %v3593_v5 = vpop.permute.xlu0 %3592 }
 0x30e   : > { %3635 = vst.msk [vmem:[#allocation4 + $0x60] sm:$0xff] %vm3628_vm7, %v3593_v5 }
 0x311   : > { %v3854_v56 = vpop.permute.xlu1 %3853  ;;  %v3722_v43 = vpop.permute.xlu0 %3721 }
 0x312   : > { %3895 = vst.msk [vmem:[#allocation4 + $0x70] sm:$0xff] %vm3887_vm9, %v3854_v56  ;;  %v7213_v56 = vld [vmem:[%s7268_s4] ss:$0 sm:$0xff] }
 0x313   : > { %3764 = vst.msk [vmem:[#allocation4 + $0x60] sm:$0xff] %vm3757_vm8, %v3722_v43 }
 0x314   : > { %3894 = vst.msk [vmem:[#allocation4 + $0x60] sm:$0xff] %vm3887_vm9, %v3852_v10 }
 0x315   : > { %4023 = vst.msk [vmem:[#allocation4 + $0x60] sm:$0xff] %vm4016_vm10, %v3981_v58  ;;  %v3983_v30 = vpop.permute.xlu1 %3982  ;;  %v3856_v59 = vpop.permute.xlu0 %3855 }
 0x316   : > { %4024 = vst.msk [vmem:[#allocation4 + $0x70] sm:$0xff] %vm4016_vm10, %v3983_v30 }
 0x319   : > { %v3212_v61 = vpop.permute.xlu1 %3211  ;;  %v3985_v11 = vpop.permute.xlu0 %3984 }
 0x31a   : > { %3251 = vst.msk [vmem:[#allocation4 + $0x90] sm:$0xff] %vm3241_vm4, %v3212_v61 }
 0x31c   : > { %v4103_v45 = vld [vmem:[#allocation4 + $0x60] sm:$0xff] }
 0x31d   : > { %5523 = vmatprep.mubr.bf16.mxu1 %v4103_v45  ;;  %v3341_v51 = vpop.permute.xlu1 %3340  ;;  %v4104_v29 = vld [vmem:[#allocation4 + $0x70] sm:$0xff]  ;;  %v3214_v52 = vpop.permute.xlu0 %3213 }
 0x31e   : > { %3380 = vst.msk [vmem:[#allocation4 + $0x90] sm:$0xff] %vm3370_vm5, %v3341_v51  ;;  %5524 = vmatmul.mubr.bf16.gmra.mrb[44].mxu1 %v4104_v29 }
 0x31f   : > { %3252 = vst.msk [vmem:[#allocation4 + $0xa0] sm:$0xff] %vm3241_vm4, %v3214_v52 }
 0x320   : > { %3509 = vst.msk [vmem:[#allocation4 + $0x90] sm:$0xff] %vm3499_vm6, %v3470_v53 }
 0x321   : > { %3638 = vst.msk [vmem:[#allocation4 + $0x90] sm:$0xff] %vm3628_vm7, %v3599_v40  ;;  %v3474_v48 = vpop.permute.xlu1 %3473  ;;  %v3343_v27 = vpop.permute.xlu0 %3342 }
 0x322   : > { %3767 = vst.msk [vmem:[#allocation4 + $0x90] sm:$0xff] %vm3757_vm8, %v3728_v44 }
 0x323   : > { %3381 = vst.msk [vmem:[#allocation4 + $0xa0] sm:$0xff] %vm3370_vm5, %v3343_v27 }
 0x325   : > { %v3603_v16 = vpop.permute.xlu1 %3602  ;;  %v3468_v42 = vpop.permute.xlu0 %3467 }
 0x326   : > { %3508 = vst.msk [vmem:[#allocation4 + $0x80] sm:$0xff] %vm3499_vm6, %v3468_v42 }
 0x329   : > { %v3732_v17 = vpop.permute.xlu1 %3731  ;;  %v3597_v22 = vpop.permute.xlu0 %3596 }
 0x32a   : > { %3637 = vst.msk [vmem:[#allocation4 + $0x80] sm:$0xff] %vm3628_vm7, %v3597_v22 }
 0x32d   : > { %v3858_v13 = vpop.permute.xlu1 %3857  ;;  %v3726_v12 = vpop.permute.xlu0 %3725 }
 0x32e   : > { %3897 = vst.msk [vmem:[#allocation4 + $0x90] sm:$0xff] %vm3887_vm9, %v3858_v13 }
 0x32f   : > { %3766 = vst.msk [vmem:[#allocation4 + $0x80] sm:$0xff] %vm3757_vm8, %v3726_v12 }
 0x330   : > { %3896 = vst.msk [vmem:[#allocation4 + $0x80] sm:$0xff] %vm3887_vm9, %v3856_v59 }
 0x331   : > { %4025 = vst.msk [vmem:[#allocation4 + $0x80] sm:$0xff] %vm4016_vm10, %v3985_v11  ;;  %v3987_v32 = vpop.permute.xlu1 %3986  ;;  %v3860_v60 = vpop.permute.xlu0 %3859 }
 0x332   : > { %4026 = vst.msk [vmem:[#allocation4 + $0x90] sm:$0xff] %vm4016_vm10, %v3987_v32 }
 0x335   : > { %v3216_v49 = vpop.permute.xlu1 %3215  ;;  %v3989_v37 = vpop.permute.xlu0 %3988 }
 0x336   : > { %3253 = vst.msk [vmem:[#allocation4 + $0xb0] sm:$0xff] %vm3241_vm4, %v3216_v49 }
 0x338   : > { %v4105_v21 = vld [vmem:[#allocation4 + $0x80] sm:$0xff] }
 0x339   : > { %5527 = vmatprep.mubr.bf16.mxu1 %v4105_v21  ;;  %v3345_v2 = vpop.permute.xlu1 %3344  ;;  %v4106_v39 = vld [vmem:[#allocation4 + $0x90] sm:$0xff]  ;;  %v3218_v23 = vpop.permute.xlu0 %3217 }
 0x33a   : > { %3382 = vst.msk [vmem:[#allocation4 + $0xb0] sm:$0xff] %vm3370_vm5, %v3345_v2  ;;  %5528 = vmatmul.mubr.bf16.gmra.mrb[48].mxu1 %v4106_v39 }
 0x33b   : > { %3254 = vst.msk [vmem:[#allocation4 + $0xc0] sm:$0xff] %vm3241_vm4, %v3218_v23 }
 0x33c   : > { %3511 = vst.msk [vmem:[#allocation4 + $0xb0] sm:$0xff] %vm3499_vm6, %v3474_v48 }
 0x33d   : > { %3640 = vst.msk [vmem:[#allocation4 + $0xb0] sm:$0xff] %vm3628_vm7, %v3603_v16  ;;  %v3478_v28 = vpop.permute.xlu1 %3477  ;;  %v3347_v54 = vpop.permute.xlu0 %3346 }
 0x33e   : > { %3769 = vst.msk [vmem:[#allocation4 + $0xb0] sm:$0xff] %vm3757_vm8, %v3732_v17 }
 0x33f   : > { %3383 = vst.msk [vmem:[#allocation4 + $0xc0] sm:$0xff] %vm3370_vm5, %v3347_v54 }
 0x341   : > { %v3607_v25 = vpop.permute.xlu1 %3606  ;;  %v3472_v3 = vpop.permute.xlu0 %3471 }
 0x342   : > { %3510 = vst.msk [vmem:[#allocation4 + $0xa0] sm:$0xff] %vm3499_vm6, %v3472_v3 }
 0x345   : > { %v3736_v62 = vpop.permute.xlu1 %3735  ;;  %v3601_v46 = vpop.permute.xlu0 %3600 }
 0x346   : > { %3639 = vst.msk [vmem:[#allocation4 + $0xa0] sm:$0xff] %vm3628_vm7, %v3601_v46 }
 0x349   : > { %v3862_v19 = vpop.permute.xlu1 %3861  ;;  %v3730_v9 = vpop.permute.xlu0 %3729 }
 0x34a   : > { %3899 = vst.msk [vmem:[#allocation4 + $0xb0] sm:$0xff] %vm3887_vm9, %v3862_v19 }
 0x34b   : > { %3768 = vst.msk [vmem:[#allocation4 + $0xa0] sm:$0xff] %vm3757_vm8, %v3730_v9 }
 0x34c   : > { %3898 = vst.msk [vmem:[#allocation4 + $0xa0] sm:$0xff] %vm3887_vm9, %v3860_v60 }
 0x34d   : > { %4027 = vst.msk [vmem:[#allocation4 + $0xa0] sm:$0xff] %vm4016_vm10, %v3989_v37  ;;  %v3991_v47 = vpop.permute.xlu1 %3990  ;;  %v3864_v36 = vpop.permute.xlu0 %3863 }
 0x34e   : > { %4028 = vst.msk [vmem:[#allocation4 + $0xb0] sm:$0xff] %vm4016_vm10, %v3991_v47 }
 0x351   : > { %v3220_v4 = vpop.permute.xlu1 %3219  ;;  %v3993_v7 = vpop.permute.xlu0 %3992 }
 0x352   : > { %3255 = vst.msk [vmem:[#allocation4 + $0xd0] sm:$0xff] %vm3241_vm4, %v3220_v4 }
 0x354   : > { %v4107_v0 = vld [vmem:[#allocation4 + $0xa0] sm:$0xff] }
 0x355   : > { %5531 = vmatprep.mubr.bf16.mxu1 %v4107_v0  ;;  %v3349_v1 = vpop.permute.xlu1 %3348  ;;  %v4108_v14 = vld [vmem:[#allocation4 + $0xb0] sm:$0xff]  ;;  %v3222_v41 = vpop.permute.xlu0 %3221 }
 0x356   : > { %3384 = vst.msk [vmem:[#allocation4 + $0xd0] sm:$0xff] %vm3370_vm5, %v3349_v1  ;;  %5532 = vmatmul.mubr.bf16.gmra.mrb[52].mxu1 %v4108_v14 }
 0x357   : > { %3256 = vst.msk [vmem:[#allocation4 + $0xe0] sm:$0xff] %vm3241_vm4, %v3222_v41 }
 0x358   : > { %3513 = vst.msk [vmem:[#allocation4 + $0xd0] sm:$0xff] %vm3499_vm6, %v3478_v28 }
 0x359   : > { %3642 = vst.msk [vmem:[#allocation4 + $0xd0] sm:$0xff] %vm3628_vm7, %v3607_v25  ;;  %v3482_v10 = vpop.permute.xlu1 %3481  ;;  %v3351_v63 = vpop.permute.xlu0 %3350 }
 0x35a   : > { %3771 = vst.msk [vmem:[#allocation4 + $0xd0] sm:$0xff] %vm3757_vm8, %v3736_v62 }
 0x35b   : > { %3385 = vst.msk [vmem:[#allocation4 + $0xe0] sm:$0xff] %vm3370_vm5, %v3351_v63 }
 0x35d   : > { %v3611_v18 = vpop.permute.xlu1 %3610  ;;  %v3476_v24 = vpop.permute.xlu0 %3475 }
 0x35e   : > { %3512 = vst.msk [vmem:[#allocation4 + $0xc0] sm:$0xff] %vm3499_vm6, %v3476_v24 }
 0x361   : > { %v3740_v55 = vpop.permute.xlu1 %3739  ;;  %v3605_v38 = vpop.permute.xlu0 %3604 }
 0x362   : > { %3641 = vst.msk [vmem:[#allocation4 + $0xc0] sm:$0xff] %vm3628_vm7, %v3605_v38 }
 0x365   : > { %v3866_v50 = vpop.permute.xlu1 %3865  ;;  %v3734_v58 = vpop.permute.xlu0 %3733 }
 0x366   : > { %3901 = vst.msk [vmem:[#allocation4 + $0xd0] sm:$0xff] %vm3887_vm9, %v3866_v50 }
 0x367   : > { %3770 = vst.msk [vmem:[#allocation4 + $0xc0] sm:$0xff] %vm3757_vm8, %v3734_v58 }
 0x368   : > { %3900 = vst.msk [vmem:[#allocation4 + $0xc0] sm:$0xff] %vm3887_vm9, %v3864_v36 }
 0x369   : > { %4029 = vst.msk [vmem:[#allocation4 + $0xc0] sm:$0xff] %vm4016_vm10, %v3993_v7  ;;  %v3995_v35 = vpop.permute.xlu1 %3994  ;;  %v3868_v26 = vpop.permute.xlu0 %3867 }
 0x36a   : > { %4030 = vst.msk [vmem:[#allocation4 + $0xd0] sm:$0xff] %vm4016_vm10, %v3995_v35 }
 0x36d   : > { %v3224_v33 = vpop.permute.xlu1 %3223  ;;  %v3480_v34 = vpop.permute.xlu0 %3479 }
 0x36e   : > { %3257 = vst.msk [vmem:[#allocation4 + $0xf0] sm:$0xff] %vm3241_vm4, %v3224_v33 }
 0x36f   : > { %3514 = vst.msk [vmem:[#allocation4 + $0xe0] sm:$0xff] %vm3499_vm6, %v3480_v34 }
 0x370   : > { %v4109_v15 = vld [vmem:[#allocation4 + $0xc0] sm:$0xff] }
 0x371   : > { %5535 = vmatprep.mubr.bf16.mxu1 %v4109_v15  ;;  %v3353_v20 = vpop.permute.xlu1 %3352  ;;  %v4110_v31 = vld [vmem:[#allocation4 + $0xd0] sm:$0xff]  ;;  %v3609_v8 = vpop.permute.xlu0 %3608 }
 0x372   : > { %3386 = vst.msk [vmem:[#allocation4 + $0xf0] sm:$0xff] %vm3370_vm5, %v3353_v20  ;;  %5536 = vmatmul.mubr.bf16.gmra.mrb[56].mxu1 %v4110_v31 }
 0x373   : > { %3643 = vst.msk [vmem:[#allocation4 + $0xe0] sm:$0xff] %vm3628_vm7, %v3609_v8 }
 0x374   : > { %3515 = vst.msk [vmem:[#allocation4 + $0xf0] sm:$0xff] %vm3499_vm6, %v3482_v10 }
 0x375   : > { %3644 = vst.msk [vmem:[#allocation4 + $0xf0] sm:$0xff] %vm3628_vm7, %v3611_v18  ;;  %v3870_v53 = vpop.permute.xlu1 %3869  ;;  %v3738_v57 = vpop.permute.xlu0 %3737 }
 0x376   : > { %3773 = vst.msk [vmem:[#allocation4 + $0xf0] sm:$0xff] %vm3757_vm8, %v3740_v55  ;;  %3772 = vst.msk [vmem:[#allocation4 + $0xe0] sm:$0xff] %vm3757_vm8, %v3738_v57 }
 0x377   : > { %3903 = vst.msk [vmem:[#allocation4 + $0xf0] sm:$0xff] %vm3887_vm9, %v3870_v53  ;;  %3902 = vst.msk [vmem:[#allocation4 + $0xe0] sm:$0xff] %vm3887_vm9, %v3868_v26 }
 0x379   : > { %v3999_v40 = vpop.permute.xlu1 %3998  ;;  %v3997_v6 = vpop.permute.xlu0 %3996 }
 0x37a   : > { %4032 = vst.msk [vmem:[#allocation4 + $0xf0] sm:$0xff] %vm4016_vm10, %v3999_v40  ;;  %4031 = vst.msk [vmem:[#allocation4 + $0xe0] sm:$0xff] %vm4016_vm10, %v3997_v6 }
 0x381   : > { %v4112_v44 = vld [vmem:[#allocation4 + $0xf0] sm:$0xff]  ;;  %v4111_v5 = vld [vmem:[#allocation4 + $0xe0] sm:$0xff] }
 0x382   : > { %5539 = vmatprep.mubr.bf16.mxu1 %v4111_v5 }
 0x383   : > { %5540 = vmatmul.mubr.bf16.gmra.mrb[60].mxu1 %v4112_v44 }
 0x39d   : > { %v5513_v43 = vpop.f32.mrb[32].mxu1 }
 0x39e   : > { %v4444_v30 = vpop.f32.mrb[33].mxu1  ;;  %v4580_v29 = vadd.f32 %v5513_v43, %v7213_v56 }
 0x39f   : > { %v4578_v59 = vadd.f32 %v7213_v56, %v4444_v30  ;;  %v5514_v61 = vpop.f32.mrb[34].mxu1 }
 0x3a0   : > { %v4447_v11 = vpop.f32.mrb[35].mxu1  ;;  %v4612_v48 = vmax.f32 %v4580_v29, 0.0  ;;  %v4581_v27 = vadd.f32 %v5514_v61, %v7213_v56 }
 0x3a1   : > { %v4610_v45 = vmax.f32 %v4578_v59, 0.0  ;;  %v4579_v51 = vadd.f32 %v7213_v56, %v4447_v11 }
 0x3a2   : > { %v4613_v16 = vmax.f32 %v4581_v27, 0.0 }
 0x3a3   : > { %4642 = vxpose.xlu0.b32.start [1/16] (narrow) %v4610_v45, 32  ;;  %v4611_v52 = vmax.f32 %v4579_v51, 0.0 }
 0x3a7   : > { %4643 = vxpose.xlu0.b32.cont [2/16] (narrow) %v4611_v52, 32 }
 0x3ab   : > { %4644 = vxpose.xlu0.b32.cont [3/16] (narrow) %v4612_v48, 32 }
 0x3af   : > { %4645 = vxpose.xlu0.b32.cont [4/16] (narrow) %v4613_v16, 32 }
 0x3b9   : > { %v5517_v42 = vpop.f32.mrb[36].mxu1 }
 0x3ba   : > { %v4460_v17 = vpop.f32.mrb[37].mxu1  ;;  %v4584_v49 = vadd.f32 %v5517_v42, %v7213_v56 }
 0x3bb   : > { %v4582_v22 = vadd.f32 %v7213_v56, %v4460_v17  ;;  %v5518_v13 = vpop.f32.mrb[38].mxu1 }
 0x3bc   : > { %v4463_v12 = vpop.f32.mrb[39].mxu1  ;;  %v4616_v21 = vmax.f32 %v4584_v49, 0.0  ;;  %v4585_v2 = vadd.f32 %v5518_v13, %v7213_v56 }
 0x3bd   : > { %v4614_v32 = vmax.f32 %v4582_v22, 0.0  ;;  %v4583_v60 = vadd.f32 %v7213_v56, %v4463_v12 }
 0x3be   : > { %v4617_v39 = vmax.f32 %v4585_v2, 0.0 }
 0x3bf   : > { %4646 = vxpose.xlu0.b32.cont [5/16] (narrow) %v4614_v32, 32  ;;  %v4615_v37 = vmax.f32 %v4583_v60, 0.0 }
 0x3c3   : > { %4647 = vxpose.xlu0.b32.cont [6/16] (narrow) %v4615_v37, 32 }
 0x3c7   : > { %4648 = vxpose.xlu0.b32.cont [7/16] (narrow) %v4616_v21, 32 }
 0x3cb   : > { %4649 = vxpose.xlu0.b32.cont [8/16] (narrow) %v4617_v39, 32 }
 0x3d5   : > { %v5521_v23 = vpop.f32.mrb[40].mxu1 }
 0x3d6   : > { %v4476_v28 = vpop.f32.mrb[41].mxu1  ;;  %v4588_v19 = vadd.f32 %v5521_v23, %v7213_v56 }
 0x3d7   : > { %v4586_v54 = vadd.f32 %v7213_v56, %v4476_v28  ;;  %v5522_v25 = vpop.f32.mrb[42].mxu1 }
 0x3d8   : > { %v4479_v3 = vpop.f32.mrb[43].mxu1  ;;  %v4620_v47 = vmax.f32 %v4588_v19, 0.0  ;;  %v4589_v36 = vadd.f32 %v5522_v25, %v7213_v56 }
 0x3d9   : > { %v4618_v62 = vmax.f32 %v4586_v54, 0.0  ;;  %v4587_v46 = vadd.f32 %v7213_v56, %v4479_v3 }
 0x3da   : > { %v4621_v4 = vmax.f32 %v4589_v36, 0.0 }
 0x3db   : > { %4650 = vxpose.xlu0.b32.cont [9/16] (narrow) %v4618_v62, 32  ;;  %v4619_v9 = vmax.f32 %v4587_v46, 0.0 }
 0x3df   : > { %4651 = vxpose.xlu0.b32.cont [10/16] (narrow) %v4619_v9, 32 }
 0x3e3   : > { %4652 = vxpose.xlu0.b32.cont [11/16] (narrow) %v4620_v47, 32 }
 0x3e7   : > { %4653 = vxpose.xlu0.b32.cont [12/16] (narrow) %v4621_v4, 32 }
 0x3f1   : > { %v5525_v7 = vpop.f32.mrb[44].mxu1 }
 0x3f2   : > { %v4492_v0 = vpop.f32.mrb[45].mxu1  ;;  %v4592_v18 = vadd.f32 %v5525_v7, %v7213_v56 }
 0x3f3   : > { %v4590_v1 = vadd.f32 %v7213_v56, %v4492_v0  ;;  %v5526_v14 = vpop.f32.mrb[46].mxu1 }
 0x3f4   : > { %v4495_v41 = vpop.f32.mrb[47].mxu1  ;;  %v4624_v55 = vmax.f32 %v4592_v18, 0.0  ;;  %v4593_v38 = vadd.f32 %v5526_v14, %v7213_v56 }
 0x3f5   : > { %v4622_v10 = vmax.f32 %v4590_v1, 0.0  ;;  %v4591_v63 = vadd.f32 %v7213_v56, %v4495_v41 }
 0x3f6   : > { %v4625_v50 = vmax.f32 %v4593_v38, 0.0 }
 0x3f7   : > { %4654 = vxpose.xlu0.b32.cont [13/16] (narrow) %v4622_v10, 32  ;;  %v4623_v24 = vmax.f32 %v4591_v63, 0.0 }
 0x3fb   : > { %4655 = vxpose.xlu0.b32.cont [14/16] (narrow) %v4623_v24, 32 }
 0x3ff   : > { %4656 = vxpose.xlu0.b32.cont [15/16] (narrow) %v4624_v55, 32 }
 0x403   : > { %4657 = vxpose.xlu0.b32.end [16/16] (narrow) %v4625_v50, 32 }
 0x40d   : > { %v5529_v58 = vpop.f32.mrb[48].mxu1 }
 0x40e   : > { %v4508_v35 = vpop.f32.mrb[49].mxu1  ;;  %v4596_v31 = vadd.f32 %v5529_v58, %v7213_v56 }
 0x40f   : > { %v4594_v26 = vadd.f32 %v7213_v56, %v4508_v35  ;;  %v5530_v33 = vpop.f32.mrb[50].mxu1 }
 0x410   : > { %v4511_v34 = vpop.f32.mrb[51].mxu1  ;;  %v4628_v53 = vmax.f32 %v4596_v31, 0.0  ;;  %v4597_v57 = vadd.f32 %v5530_v33, %v7213_v56 }
 0x411   : > { %v4626_v15 = vmax.f32 %v4594_v26, 0.0  ;;  %v4595_v20 = vadd.f32 %v7213_v56, %v4511_v34 }
 0x412   : > { %v4629_v40 = vmax.f32 %v4597_v57, 0.0 }
 0x413   : > { %4674 = vxpose.xlu1.b32.start [1/16] (narrow) %v4626_v15, 32  ;;  %v4627_v8 = vmax.f32 %v4595_v20, 0.0 }
 0x417   : > { %4675 = vxpose.xlu1.b32.cont [2/16] (narrow) %v4627_v8, 32 }
 0x41b   : > { %4676 = vxpose.xlu1.b32.cont [3/16] (narrow) %v4628_v53, 32 }
 0x41f   : > { %4677 = vxpose.xlu1.b32.cont [4/16] (narrow) %v4629_v40, 32 }
 0x429   : > { %v5533_v6 = vpop.f32.mrb[52].mxu1 }
 0x42a   : > { %v4524_v44 = vpop.f32.mrb[53].mxu1  ;;  %v4600_v11 = vadd.f32 %v5533_v6, %v7213_v56 }
 0x42b   : > { %v4598_v5 = vadd.f32 %v7213_v56, %v4524_v44  ;;  %v5534_v43 = vpop.f32.mrb[54].mxu1 }
 0x42c   : > { %v4527_v30 = vpop.f32.mrb[55].mxu1  ;;  %v4632_v51 = vmax.f32 %v4600_v11, 0.0  ;;  %v4601_v29 = vadd.f32 %v5534_v43, %v7213_v56 }
 0x42d   : > { %v4630_v59 = vmax.f32 %v4598_v5, 0.0  ;;  %v4599_v61 = vadd.f32 %v7213_v56, %v4527_v30 }
 0x42e   : > { %v4633_v52 = vmax.f32 %v4601_v29, 0.0 }
 0x42f   : > { %4678 = vxpose.xlu1.b32.cont [5/16] (narrow) %v4630_v59, 32  ;;  %v4631_v45 = vmax.f32 %v4599_v61, 0.0 }
 0x433   : > { %4679 = vxpose.xlu1.b32.cont [6/16] (narrow) %v4631_v45, 32 }
 0x437   : > { %4680 = vxpose.xlu1.b32.cont [7/16] (narrow) %v4632_v51, 32 }
 0x43b   : > { %4681 = vxpose.xlu1.b32.cont [8/16] (narrow) %v4633_v52, 32 }
 0x445   : > { %v5537_v48 = vpop.f32.mrb[56].mxu1 }
 0x446   : > { %v4540_v27 = vpop.f32.mrb[57].mxu1  ;;  %v4604_v60 = vadd.f32 %v5537_v48, %v7213_v56 }
 0x447   : > { %v4602_v16 = vadd.f32 %v7213_v56, %v4540_v27  ;;  %v5538_v42 = vpop.f32.mrb[58].mxu1  ;;  %v4658_v17 = vpop.trf.xlu0 }
 0x448   : > { %v4543_v22 = vpop.f32.mrb[59].mxu1  ;;  %4706 = vst [vmem:[%s7243_s29] sm:$0xff] %v4658_v17  ;;  %v4636_v21 = vmax.f32 %v4604_v60, 0.0  ;;  %v4605_v2 = vadd.f32 %v5538_v42, %v7213_v56 }
 0x449   : > { %v4634_v13 = vmax.f32 %v4602_v16, 0.0  ;;  %v4603_v12 = vadd.f32 %v7213_v56, %v4543_v22 }
 0x44a   : > { %v4637_v23 = vmax.f32 %v4605_v2, 0.0 }
 0x44b   : > { %4682 = vxpose.xlu1.b32.cont [9/16] (narrow) %v4634_v13, 32  ;;  %v4659_v32 = vpop.trf.xlu0  ;;  %v4635_v49 = vmax.f32 %v4603_v12, 0.0 }
 0x44c   : > { %4708 = vst [vmem:[%s7243_s29 + $0x10] sm:$0xff] %v4659_v32 }
 0x44f   : > { %4683 = vxpose.xlu1.b32.cont [10/16] (narrow) %v4635_v49, 32  ;;  %v4660_v37 = vpop.trf.xlu0 }
 0x450   : > { %4710 = vst [vmem:[%s7243_s29 + $0x20] sm:$0xff] %v4660_v37 }
 0x453   : > { %4684 = vxpose.xlu1.b32.cont [11/16] (narrow) %v4636_v21, 32  ;;  %v4661_v39 = vpop.trf.xlu0 }
 0x454   : > { %4712 = vst [vmem:[%s7243_s29 + $0x30] sm:$0xff] %v4661_v39 }
 0x456   : > { %v5541_v28 = vpop.f32.mrb[60].mxu1 }
 0x457   : > { %4685 = vxpose.xlu1.b32.cont [12/16] (narrow) %v4637_v23, 32  ;;  %v4556_v54 = vpop.f32.mrb[61].mxu1  ;;  %v4608_v9 = vadd.f32 %v5541_v28, %v7213_v56 }
 0x458   : > { %v4606_v25 = vadd.f32 %v7213_v56, %v4556_v54  ;;  %v5542_v3 = vpop.f32.mrb[62].mxu1 }
 0x459   : > { %v4559_v62 = vpop.f32.mrb[63].mxu1  ;;  %v4640_v36 = vmax.f32 %v4608_v9, 0.0  ;;  %v4609_v4 = vadd.f32 %v5542_v3, %v7213_v56 }
 0x45a   : > { %v4638_v46 = vmax.f32 %v4606_v25, 0.0  ;;  %v4607_v19 = vadd.f32 %v7213_v56, %v4559_v62 }
 0x45b   : > { %v4641_v7 = vmax.f32 %v4609_v4, 0.0 }
 0x45c   : > { %4686 = vxpose.xlu1.b32.cont [13/16] (narrow) %v4638_v46, 32  ;;  %v4639_v47 = vmax.f32 %v4607_v19, 0.0 }
 0x460   : > { %4687 = vxpose.xlu1.b32.cont [14/16] (narrow) %v4639_v47, 32 }
 0x464   : > { %4688 = vxpose.xlu1.b32.cont [15/16] (narrow) %v4640_v36, 32 }
 0x468   : > { %4689 = vxpose.xlu1.b32.end [16/16] (narrow) %v4641_v7, 32 }
 0x4ac   : > { %v4690_v0 = vpop.trf.xlu1 }
 0x4ad   : > { %4707 = vst [vmem:[%s7243_s29 + $0x8] sm:$0xff] %v4690_v0 }
 0x4b0   : > { %v4691_v1 = vpop.trf.xlu1 }
 0x4b1   : > { %4709 = vst [vmem:[%s7243_s29 + $0x18] sm:$0xff] %v4691_v1 }
 0x4b4   : > { %v4692_v14 = vpop.trf.xlu1 }
 0x4b5   : > { %4711 = vst [vmem:[%s7243_s29 + $0x28] sm:$0xff] %v4692_v14 }
 0x4b8   : > { %v4693_v41 = vpop.trf.xlu1 }
 0x4b9   : > { %4713 = vst [vmem:[%s7243_s29 + $0x38] sm:$0xff] %v4693_v41 }
 0x4ba PF: > { %s15_s18 = sadd.s32 1, %s5865_s18  }
 0x4bb   : > { %p12_p4 = scmp.ge.s32.totalorder %s15_s18, 4  }
 0x4bd   :  { %14 = sbr.rel (!%p12_p4) target bundleno = 1 (0x1), region = 84 }

</bundles_post_ra>
